<compile_context>
chip_gen: v6e
topology: v6e:2x2x1
jax: 0.10.0
libtpu: 0.0.40
codegen_flags: <defaults>
</compile_context>

<pallas_src>
import jax
import jax.numpy as jnp
from jax.experimental import pallas as pl
from jax.experimental.pallas import tpu as pltpu

KW = 4       # kernel width  (kernel_size = (1, 4))
OC = 64      # out_channels


def _conv1x4_kernel(x_ref, w_ref, b_ref, o_ref):
    # x_ref: (1, H_TILE, W)         raw input rows (no im2col)
    # w_ref: (OC, KW)               resident
    # b_ref: (OC, 1)                resident
    # o_ref: (1, OC, H_TILE, W_out) direct NCHW slab
    _, _, h_tile, w_out = o_ref.shape
    x = x_ref[0].astype(jnp.float32)        # (H_TILE, W)
    w = w_ref[...].astype(jnp.float32)      # (OC, KW)
    b = b_ref[...].astype(jnp.float32)      # (OC, 1)

    # 4-term VPU FMA chain; bias folded into the first term.
    acc = w[:, 0:1][:, :, None] * x[:, 0:w_out][None, :, :] + b[:, :, None]
    for k in range(1, KW):
        acc = acc + w[:, k:k + 1][:, :, None] * x[:, k:k + w_out][None, :, :]

    o_ref[0] = acc.astype(o_ref.dtype)


def _pick_h_tile(H, W_out, bytes_budget=2 * 1024 * 1024):
    # Target ~2 MiB per f32 output tile (OC * H_TILE * W_out * 4 bytes);
    # H_TILE must divide H and be a multiple of 8 (or equal H).
    max_rows = max(8, bytes_budget // (OC * max(W_out, 1) * 4))
    if H <= max_rows:
        return H
    cand = [t for t in range(8, int(max_rows) + 1, 8) if H % t == 0]
    return max(cand) if cand else H


@jax.jit
def conv2d_1x4_pallas(x, weight, bias):
    """x: (N, 1, H, W) f32; weight: (OC, 1, 1, KW); bias: (OC,).

    Returns NCHW output (N, OC, H, W - KW + 1), written directly by the kernel
    (no post-transpose)."""
    N, C, H, W = x.shape
    assert C == 1
    W_out = W - KW + 1
    H_TILE = _pick_h_tile(H, W_out)

    x_rows = x.reshape(N, H, W)          # drop singleton channel (free reshape)
    w_mat = weight.reshape(OC, KW)
    b_col = bias.reshape(OC, 1)

    grid = (N, H // H_TILE)
    out = pl.pallas_call(
        _conv1x4_kernel,
        out_shape=jax.ShapeDtypeStruct((N, OC, H, W_out), x.dtype),
        grid=grid,
        in_specs=[
            pl.BlockSpec((1, H_TILE, W), lambda n, i: (n, i, 0)),
            pl.BlockSpec((OC, KW), lambda n, i: (0, 0)),   # weight: resident
            pl.BlockSpec((OC, 1), lambda n, i: (0, 0)),    # bias:   resident
        ],
        out_specs=pl.BlockSpec((1, OC, H_TILE, W_out), lambda n, i: (n, 0, i, 0)),
        compiler_params=pltpu.CompilerParams(
            dimension_semantics=("parallel", "parallel"),
            vmem_limit_bytes=32 * 1024 * 1024,
        ),
    )(x_rows, w_mat, b_col)
    return out   # already NCHW


if __name__ == "__main__":
    key = jax.random.PRNGKey(0)
    k_x, k_w, k_b = jax.random.split(key, 3)

    # Small shapes consistent with the module: N=2, C=1, H=8, W=131 -> W_out=128
    # (lane-dense output tile at test scale).
    N, C, H, W = 2, 1, 8, 131
    x = jax.random.normal(k_x, (N, C, H, W), dtype=jnp.float32)

    # Deterministic parameter init (matches Conv2d(1, 64, (1, 4)) shapes)
    fan_in = C * 1 * KW
    bound = 1.0 / (fan_in ** 0.5)
    weight = jax.random.uniform(k_w, (OC, C, 1, KW), jnp.float32, -bound, bound)
    bias = jax.random.uniform(k_b, (OC,), jnp.float32, -bound, bound)

    out = conv2d_1x4_pallas(x, weight, bias)
    out = jax.block_until_ready(out)

    # Reference check (pure JAX im2col einsum)
    W_out = W - KW + 1
    ref_patches = jnp.stack([x[:, 0, :, k:k + W_out] for k in range(KW)], axis=-1)
    ref = jnp.einsum("nhwk,ok->nohw", ref_patches, weight.reshape(OC, KW)) \
        + bias[None, :, None, None]
    assert out.shape == (N, OC, H, W_out)
    assert jnp.allclose(out, ref, atol=1e-5, rtol=1e-5), \
        float(jnp.max(jnp.abs(out - ref)))

    print("KERNEL_OK")
</pallas_src>

<mosaic_0001>
module attributes {stable_mosaic.version = 11 : i64} {
  func.func @_conv1x4_kernel(%arg0: i32, %arg1: i32, %arg2: memref<1x8x131xf32, #tpu.memory_space<vmem>>, %arg3: memref<64x4xf32, #tpu.memory_space<vmem>>, %arg4: memref<64x1xf32, #tpu.memory_space<vmem>>, %arg5: memref<1x64x8x128xf32, #tpu.memory_space<vmem>>) attributes {dimension_semantics = [#tpu.dimension_semantics<parallel>, #tpu.dimension_semantics<parallel>], iteration_bounds = array<i64: 2, 1>, scalar_prefetch = 0 : i64, scratch_operands = 0 : i64, tpu.core_type = #tpu.core_type<tc>, window_params = [{transform_indices = @transform_0, window_bounds = array<i64: 1, 8, 131>}, {pipeline_mode = #tpu.pipeline_mode<synchronous>, transform_indices = @transform_1, window_bounds = array<i64: 64, 4>}, {pipeline_mode = #tpu.pipeline_mode<synchronous>, transform_indices = @transform_2, window_bounds = array<i64: 64, 1>}, {transform_indices = @transform_3, window_bounds = array<i64: 1, 64, 8, 128>}]} {
    %c0 = arith.constant 0 : index
    %c0_0 = arith.constant 0 : index
    %c0_1 = arith.constant 0 : index
    %0 = vector.load %arg2[%c0, %c0_0, %c0_1] : memref<1x8x131xf32, #tpu.memory_space<vmem>>, vector<1x8x131xf32>
    %1 = vector.shape_cast %0 : vector<1x8x131xf32> to vector<8x131xf32>
    %c0_2 = arith.constant 0 : index
    %c0_3 = arith.constant 0 : index
    %2 = vector.load %arg3[%c0_2, %c0_3] : memref<64x4xf32, #tpu.memory_space<vmem>>, vector<64x4xf32>
    %c0_4 = arith.constant 0 : index
    %c0_5 = arith.constant 0 : index
    %3 = vector.load %arg4[%c0_4, %c0_5] : memref<64x1xf32, #tpu.memory_space<vmem>>, vector<64x1xf32>
    %4 = vector.extract_strided_slice %2 {offsets = [0, 0], sizes = [64, 1], strides = [1, 1]} : vector<64x4xf32> to vector<64x1xf32>
    %5 = vector.shape_cast %4 : vector<64x1xf32> to vector<64x1x1xf32>
    %6 = vector.extract_strided_slice %1 {offsets = [0, 0], sizes = [8, 128], strides = [1, 1]} : vector<8x131xf32> to vector<8x128xf32>
    %7 = vector.shape_cast %6 : vector<8x128xf32> to vector<1x8x128xf32>
    %8 = vector.broadcast %5 : vector<64x1x1xf32> to vector<64x8x128xf32>
    %9 = vector.broadcast %7 : vector<1x8x128xf32> to vector<64x8x128xf32>
    %10 = arith.mulf %8, %9 : vector<64x8x128xf32>
    %11 = vector.shape_cast %3 : vector<64x1xf32> to vector<64x1x1xf32>
    %12 = vector.broadcast %11 : vector<64x1x1xf32> to vector<64x8x128xf32>
    %13 = arith.addf %10, %12 : vector<64x8x128xf32>
    %14 = vector.extract_strided_slice %2 {offsets = [0, 1], sizes = [64, 1], strides = [1, 1]} : vector<64x4xf32> to vector<64x1xf32>
    %15 = vector.shape_cast %14 : vector<64x1xf32> to vector<64x1x1xf32>
    %16 = vector.extract_strided_slice %1 {offsets = [0, 1], sizes = [8, 128], strides = [1, 1]} : vector<8x131xf32> to vector<8x128xf32>
    %17 = vector.shape_cast %16 : vector<8x128xf32> to vector<1x8x128xf32>
    %18 = vector.broadcast %15 : vector<64x1x1xf32> to vector<64x8x128xf32>
    %19 = vector.broadcast %17 : vector<1x8x128xf32> to vector<64x8x128xf32>
    %20 = arith.mulf %18, %19 : vector<64x8x128xf32>
    %21 = arith.addf %13, %20 : vector<64x8x128xf32>
    %22 = vector.extract_strided_slice %2 {offsets = [0, 2], sizes = [64, 1], strides = [1, 1]} : vector<64x4xf32> to vector<64x1xf32>
    %23 = vector.shape_cast %22 : vector<64x1xf32> to vector<64x1x1xf32>
    %24 = vector.extract_strided_slice %1 {offsets = [0, 2], sizes = [8, 128], strides = [1, 1]} : vector<8x131xf32> to vector<8x128xf32>
    %25 = vector.shape_cast %24 : vector<8x128xf32> to vector<1x8x128xf32>
    %26 = vector.broadcast %23 : vector<64x1x1xf32> to vector<64x8x128xf32>
    %27 = vector.broadcast %25 : vector<1x8x128xf32> to vector<64x8x128xf32>
    %28 = arith.mulf %26, %27 : vector<64x8x128xf32>
    %29 = arith.addf %21, %28 : vector<64x8x128xf32>
    %30 = vector.extract_strided_slice %2 {offsets = [0, 3], sizes = [64, 1], strides = [1, 1]} : vector<64x4xf32> to vector<64x1xf32>
    %31 = vector.shape_cast %30 : vector<64x1xf32> to vector<64x1x1xf32>
    %32 = vector.extract_strided_slice %1 {offsets = [0, 3], sizes = [8, 128], strides = [1, 1]} : vector<8x131xf32> to vector<8x128xf32>
    %33 = vector.shape_cast %32 : vector<8x128xf32> to vector<1x8x128xf32>
    %34 = vector.broadcast %31 : vector<64x1x1xf32> to vector<64x8x128xf32>
    %35 = vector.broadcast %33 : vector<1x8x128xf32> to vector<64x8x128xf32>
    %36 = arith.mulf %34, %35 : vector<64x8x128xf32>
    %37 = arith.addf %29, %36 : vector<64x8x128xf32>
    %c0_6 = arith.constant 0 : index
    %c0_7 = arith.constant 0 : index
    %c0_8 = arith.constant 0 : index
    %c0_9 = arith.constant 0 : index
    %38 = vector.load %arg5[%c0_6, %c0_7, %c0_8, %c0_9] : memref<1x64x8x128xf32, #tpu.memory_space<vmem>>, vector<1x64x8x128xf32>
    %39 = vector.shape_cast %38 : vector<1x64x8x128xf32> to vector<64x8x128xf32>
    %40 = vector.shape_cast %37 : vector<64x8x128xf32> to vector<1x64x8x128xf32>
    tpu.vector_store %arg5[%c0_6, %c0_7, %c0_8, %c0_9], %40 {strides = array<i32>} : memref<1x64x8x128xf32, #tpu.memory_space<vmem>>, vector<1x64x8x128xf32>,
    return
  }
  func.func @transform_0(%arg0: i32, %arg1: i32) -> (i32, i32, i32) {
    %c0_i32 = arith.constant 0 : i32
    %c0_i32_0 = arith.constant 0 : i32
    return %arg0, %arg1, %c0_i32 : i32, i32, i32
  }
  func.func @transform_1(%arg0: i32, %arg1: i32) -> (i32, i32) {
    %c0_i32 = arith.constant 0 : i32
    %c0_i32_0 = arith.constant 0 : i32
    %c0_i32_1 = arith.constant 0 : i32
    return %c0_i32, %c0_i32_0 : i32, i32
  }
  func.func @transform_2(%arg0: i32, %arg1: i32) -> (i32, i32) {
    %c0_i32 = arith.constant 0 : i32
    %c0_i32_0 = arith.constant 0 : i32
    %c0_i32_1 = arith.constant 0 : i32
    return %c0_i32, %c0_i32_0 : i32, i32
  }
  func.func @transform_3(%arg0: i32, %arg1: i32) -> (i32, i32, i32, i32) {
    %c0_i32 = arith.constant 0 : i32
    %c0_i32_0 = arith.constant 0 : i32
    %c0_i32_1 = arith.constant 0 : i32
    return %arg0, %c0_i32, %arg1, %c0_i32_0 : i32, i32, i32, i32
  }
}

</mosaic_0001>

<bundles_post_ra>
// kernel: conv2d_1x4_pallas.1
= control target key start
LH: loop header
LB: loop body
LE: loop exit
PB: predicated region body
PF: predicated region fallthrough
CT: control target
= control target key end

     0   :  { %8 = vsyncpa [#allocation3], 0  ;;  %s9028_s0 = inlined_call_operand.vmem [shape: f32[2,8,131], index: 0, kind: input, shape index: {}]   ;;  %s9029_s1 = inlined_call_operand.vmem [shape: f32[64,4], index: 1, kind: input, shape index: {}]   ;;  %s9030_s2 = inlined_call_operand.vmem [shape: f32[64,1], index: 2, kind: input, shape index: {}]   ;;  %s9031_s3 = inlined_call_operand.hbm [shape: f32[2,64,8,128], index: 3, kind: output, shape index: {}]  }
   0x1   :  { %10 = vsyncpa [#allocation3 + $0x1], 0  ;;  %s5429_s12 = smov 0   ;;  %s5431_s13 = smov 0  }
   0x2   :  { %s5433_s14 = smov 0   ;;  %s5435_s15 = smov 0  }
   0x3   :  { %s5437_s16 = smov 0   ;;  %s5439_s17 = smov 0  }
   0x4 LB: > { %s5210_s18 = sadd.s32 4294967295, %s5396_s17   ;;  %s5211_s19 = sadd.s32 4294967294, %s5396_s17   ;;  %s5396_s17 = sphi %s5439_s17, %s16_s17   ;;  %s5392_s16 = sphi %s5437_s16, %s10033_s16   ;;  %s5388_s15 = sphi %s5435_s15, %s10032_s15   ;;  %s5384_s14 = sphi %s5433_s14, %s10031_s14   ;;  %s5380_s13 = sphi %s5431_s13, %s10030_s13   ;;  %s5376_s12 = sphi %s5429_s12, %s10029_s12  }
   0x5   : > { %s28_s20 = sadd.s32 1, %s5392_s16  ;;  %s107_s21 = sadd.s32 1, %s5384_s14 }
   0x6   : > { %p30_p0 = scmp.ge.s32.totalorder %s28_s20, 2  ;;  %p117_p1 = scmp.ne.s32.totalorder %s5384_s14, %s5380_s13 }
   0x7   : > { %p118_p2 = scmp.eq.s32.totalorder %s5210_s18, 1  ;;  %p123_p3 = scmp.ne.s32.totalorder %s5380_s13, %s5376_s12 }
   0x8   : > { %s10035_s20 = smov (%p30_p0, %s28_s20), 0  ;;  %p124_p5 = scmp.eq.s32.totalorder %s5211_s19, 1 }
   0x9   : > { %p5469_p4 = por %p118_p2, %p117_p1  ;;  %s102_s23 = ssub.s32 %s5392_s16, %s10035_s20 }
   0xa   : > { %p5214_p6 = scmp.ge.s32.totalorder %s5396_s17, 1  ;;  %p105_p7 = scmp.eq.s32.totalorder %s102_s23, 0 }
   0xb   : > { %p5476_p8 = por %p124_p5, %p123_p3  ;;  %p160_p9 = scmp.lt.s32.totalorder %s5396_s17, 3 }
   0xc   : > { %s5482_s25 = scalar_select %p105_p7, %s5384_s14, %s107_s21  }
   0xd   : > { %p161_p10 = pnand %p5214_p6, %p160_p9 }
   0xf   : > { %164 = sbr.rel (%p161_p10) target bundleno = 1585 (0x631), region = 32 }
  0x14   : > { %v227_v0 = vlaneseq  ;;  %v5398_v1 = vmov 0   ;;  %v5399_v2 = vmov 1966171168   ;;  %v199_v4 = vld [vmem:[%s9029_s1] sm:$0xff]  ;;  %v200_v8 = vld [vmem:[%s9029_s1 + $0x8] sm:$0xff]  ;;  %v201_v42 = vld [vmem:[%s9029_s1 + $0x10] sm:$0xff] }
  0x15   : > { %5290 = vset.pattern.permute.xlu0 %v5398_v1  ;;  %v225_v3 = vunpack.c.l.s4 %v5399_v2  ;;  %5291 = vset.pattern.permute.xlu1 %v5398_v1  ;;  %v223_v7 = vcombine.high %v199_v4, %v199_v4  ;;  %v272_v31 = vcombine.high %v200_v8, %v200_v8  ;;  %v321_v53 = vcombine.high %v201_v42, %v201_v42  ;;  %p188_p11 = scmp.lt.s32.totalorder %s5388_s15, 1  ;;  %s5401_s29 = smov 127  }
  0x16   : > { %v228_v5 = vshrl.u32 %v227_v0, 7  ;;  %v202_v0 = vld [vmem:[%s9029_s1 + $0x18] sm:$0xff]  ;;  %s5403_s30 = smov 126   ;;  %s5405_s4 = smov 125   ;;  %vm2935_vm0 = vcmask 1039360   ;;  %vm3896_vm1 = vcmask 1031168  }
  0x17   : > { %v226_v6 = vunpack.c.0.s8 %v225_v3  ;;  %s189_s21 = scalar_select %p188_p11, %s5388_s15, 1  ;;  %vm4857_vm2 = vcmask 1022976  }
  0x18   : > { %v5493_v11 = vsub.s32 0, %v228_v5  ;;  %s185_s5 = sand.u32 1, %s5380_s13   ;;  %s5224_s8 = sshll.u32 %s5388_s15, 13 }
  0x19   : > { %v5490_v9 = vsub.s32 %v226_v6, %v228_v5  ;;  %s5223_s23 = sshll.u32 %s189_s21, 4  ;;  %s5215_s6 = sshll.u32 %s185_s5, 9 }
  0x1a   : > { %s6271_s28 = scalar_lea.vmem %s9028_s0, %s5223_s23  ;;  %s8101_s7 = scalar_lea.vmem [#allocation2], %s5215_s6 }
  0x1b   : > { %v230_v10 = vrot.slane %v199_v4, %v5490_v9  ;;  %v237_v12 = vrot.slane %v223_v7, %v5490_v9  ;;  %v279_v13 = vrot.slane %v200_v8, %v5490_v9  ;;  %v286_v36 = vrot.slane %v272_v31, %v5490_v9  ;;  %s5129_s9 = sshll.u32 %s8101_s7, 4  ;;  %s8976_s18 = scalar_lea.hbm %s9031_s3, %s5224_s8  ;;  %s8978_s9 = int_to_ptr.vmem [resolvable:$true] %s5129_s9 }
  0x1c   : > { %v328_v47 = vrot.slane %v201_v42, %v5490_v9  ;;  %v335_v58 = vrot.slane %v321_v53, %v5490_v9  ;;  %v377_v5 = vrot.slane %v202_v0, %v5490_v9  ;;  %s8983_s15 = scalar_lea.sflag [#allocation3], %s185_s5  ;;  %s5320_s19 = scalar_lea.vmem %s8978_s9, 8192 }
  0x1d   : > { %v246_v14 = vrot.slane %v230_v10, %v5490_v9  ;;  %v253_v15 = vrot.slane %v237_v12, %v5490_v9  ;;  %v239_v16 = vcombine.high %v237_v12, %v237_v12  ;;  %v238_v17 = vcombine.high %v230_v10, %v230_v10  ;;  %p5321_p12 = scmp.ne.s32.totalorder %s8978_s9, %s5320_s19  ;;  %s5406_s21 = smov [#allocation2]  }
  0x1e   : > { %v287_v21 = vcombine.high %v279_v13, %v279_v13  ;;  %v295_v33 = vrot.slane %v279_v13, %v5490_v9  ;;  %v288_v41 = vcombine.high %v286_v36, %v286_v36  ;;  %v302_v44 = vrot.slane %v286_v36, %v5490_v9  ;;  %s5324_s23 = sshll.u32 %s5406_s21, 4  ;;  %s5325_s23 = int_to_ptr.vmem [resolvable:$false] %s5324_s23 }
  0x1f   : > { %v5500_v18 = vrot.slane %v246_v14, %v5493_v11  ;;  %v268_v19 = vcombine.high %v246_v14, %v246_v14  ;;  %v267_v20 = vrot.slane %v239_v16, %v5490_v9  ;;  %v5508_v23 = vrot.slane %v253_v15, %v5493_v11  ;;  %p5322_p13 = pnand %p5321_p12, %p5469_p4  ;;  %s5326_s26 = scalar_lea.vmem %s5325_s23, 16384 }
  0x20   : > { %v260_v24 = vrot.slane %v238_v17, %v5490_v9  ;;  %v309_v26 = vrot.slane %v287_v21, %v5490_v9  ;;  %v269_v28 = vcombine.high %v253_v15, %v253_v15  ;;  %v5536_v37 = vrot.slane %v295_v33, %v5493_v11  ;;  %p5327_p1 = scmp.lt.s32.totalorder %s8978_s9, %s5325_s23  ;;  %p5328_p2 = scmp.lt.s32.totalorder %s5326_s26, %s5320_s19 }
  0x21   : > { %872 = vperm.xlu0 %5290, %v5500_v18   ;;  %v5505_v22 = vrot.slane %v268_v19, %v5493_v11  ;;  %v5513_v25 = vrot.slane %v267_v20, %v5493_v11  ;;  %v271_v35 = vcombine.high %v267_v20, %v267_v20  ;;  %v317_v38 = vcombine.high %v295_v33, %v295_v33  ;;  %p5323_p0 = pneg %p5322_p13 }
  0x22   : > { %v5518_v27 = vrot.slane %v260_v24, %v5493_v11  ;;  %v5522_v29 = vrot.slane %v309_v26, %v5493_v11  ;;  %v270_v30 = vcombine.high %v260_v24, %v260_v24  ;;  %v5526_v32 = vrot.slane %v269_v28, %v5493_v11  ;;  %p5329_p3 = por %p5328_p2, %p5327_p1 }
  0x23   : > { %880 = vperm.xlu1 %5291, %v5505_v22   ;;  %v5540_v39 = vrot.slane %v271_v35, %v5493_v11  ;;  %v319_v40 = vcombine.high %v309_v26, %v309_v26  ;;  %v5547_v43 = vrot.slane %v317_v38, %v5493_v11  ;;  %v316_v46 = vrot.slane %v288_v41, %v5490_v9 }
  0x24   : > { %v5531_v34 = vrot.slane %v270_v30, %v5493_v11  ;;  %v5558_v48 = vrot.slane %v302_v44, %v5493_v11  ;;  %v318_v49 = vcombine.high %v302_v44, %v302_v44  ;;  %v336_v52 = vcombine.high %v328_v47, %v328_v47  ;;  %v203_v30 = vld [vmem:[%s9029_s1 + $0x20] sm:$0xff]  ;;  %p5330_p5 = pnand %p5329_p3, %p5323_p0 }
  0x25   : > { %888 = vperm.xlu0 %5290, %v5508_v23   ;;  %v5552_v45 = vrot.slane %v319_v40, %v5493_v11  ;;  %v5562_v50 = vrot.slane %v316_v46, %v5493_v11  ;;  %v320_v51 = vcombine.high %v316_v46, %v316_v46  ;;  %v344_v55 = vrot.slane %v328_v47, %v5490_v9 }
  0x26   : > { %v5566_v54 = vrot.slane %v318_v49, %v5493_v11  ;;  %v358_v57 = vrot.slane %v336_v52, %v5490_v9  ;;  %v337_v63 = vcombine.high %v335_v58, %v335_v58  ;;  %v351_v2 = vrot.slane %v335_v58, %v5490_v9 }
  0x27   : > { %892 = vperm.xlu1 %5291, %v5513_v25   ;;  %v5571_v56 = vrot.slane %v320_v51, %v5493_v11  ;;  %v5577_v59 = vrot.slane %v344_v55, %v5493_v11  ;;  %v366_v60 = vcombine.high %v344_v55, %v344_v55  ;;  %v385_v12 = vcombine.high %v377_v5, %v377_v5 }
  0x28   : > { %v5581_v61 = vrot.slane %v358_v57, %v5493_v11  ;;  %v368_v62 = vcombine.high %v358_v57, %v358_v57  ;;  %v365_v4 = vrot.slane %v337_v63, %v5490_v9  ;;  %v5599_v6 = vrot.slane %v351_v2, %v5493_v11 }
  0x29   : > { %876 = vperm.xlu0 %5290, %v5518_v27   ;;  %v5588_v1 = vrot.slane %v366_v60, %v5493_v11  ;;  %v367_v7 = vcombine.high %v351_v2, %v351_v2  ;;  %v370_v13 = vcombine.high %v202_v0, %v202_v0  ;;  %v393_v15 = vrot.slane %v377_v5, %v5490_v9  ;;  %v204_v0 = vld [vmem:[%s9029_s1 + $0x28] sm:$0xff] }
  0x2a   : > { %v5593_v3 = vrot.slane %v368_v62, %v5493_v11  ;;  %9134 = vst [vmem:[#allocation6_spill] sm:$0xff] %v5599_v6  ;;  %v5603_v8 = vrot.slane %v365_v4, %v5493_v11  ;;  %v369_v10 = vcombine.high %v365_v4, %v365_v4  ;;  %v407_v17 = vrot.slane %v385_v12, %v5490_v9 }
  0x2b   : > { %908 = vperm.xlu1 %5291, %v5522_v29   ;;  %v5607_v14 = vrot.slane %v367_v7, %v5493_v11  ;;  %v384_v19 = vrot.slane %v370_v13, %v5490_v9  ;;  %v5618_v20 = vrot.slane %v393_v15, %v5493_v11  ;;  %v415_v21 = vcombine.high %v393_v15, %v393_v15 }
  0x2c   : > { %9133 = vst [vmem:[#allocation5_spill] sm:$0xff] %v5593_v3  ;;  %9135 = vst [vmem:[#allocation7_spill] sm:$0xff] %v5603_v8  ;;  %v5612_v16 = vrot.slane %v369_v10, %v5493_v11  ;;  %v5622_v24 = vrot.slane %v407_v17, %v5493_v11  ;;  %v417_v26 = vcombine.high %v407_v17, %v407_v17 }
  0x2d   : > { %896 = vperm.xlu0 %5290, %v5526_v32   ;;  %9136 = vst [vmem:[#allocation8_spill] sm:$0xff] %v5607_v14  ;;  %9138 = vst [vmem:[#allocation10_spill] sm:$0xff] %v5618_v20  ;;  %v386_v28 = vcombine.high %v384_v19, %v384_v19  ;;  %v5629_v31 = vrot.slane %v415_v21, %v5493_v11  ;;  %v400_v33 = vrot.slane %v384_v19, %v5490_v9 }
  0x2e   : > { %9137 = vst [vmem:[#allocation9_spill] sm:$0xff] %v5612_v16  ;;  %9139 = vst [vmem:[#allocation11_spill] sm:$0xff] %v5622_v24  ;;  %v5634_v35 = vrot.slane %v417_v26, %v5493_v11  ;;  %v426_v38 = vrot.slane %v203_v30, %v5490_v9  ;;  %v419_v47 = vcombine.high %v203_v30, %v203_v30 }
  0x2f   : > { %884 = vperm.xlu1 %5291, %v5531_v34   ;;  %9140 = vst [vmem:[#allocation12_spill] sm:$0xff] %v5629_v31  ;;  %v414_v36 = vrot.slane %v386_v28, %v5490_v9  ;;  %v5640_v40 = vrot.slane %v400_v33, %v5493_v11  ;;  %v416_v41 = vcombine.high %v400_v33, %v400_v33 }
  0x30   : > { %9141 = vst [vmem:[#allocation13_spill] sm:$0xff] %v5634_v35  ;;  %v434_v46 = vcombine.high %v426_v38, %v426_v38  ;;  %v442_v51 = vrot.slane %v426_v38, %v5490_v9  ;;  %v433_v55 = vrot.slane %v419_v47, %v5490_v9  ;;  %v475_v10 = vrot.slane %v204_v0, %v5490_v9 }
  0x31   : > { %904 = vperm.xlu0 %5290, %v5536_v37   ;;  %9142 = vst [vmem:[#allocation14_spill] sm:$0xff] %v5640_v40  ;;  %v5644_v42 = vrot.slane %v414_v36, %v5493_v11  ;;  %v418_v44 = vcombine.high %v414_v36, %v414_v36  ;;  %v5648_v49 = vrot.slane %v416_v41, %v5493_v11 }
  0x32   : > { %v456_v53 = vrot.slane %v434_v46, %v5490_v9  ;;  %v5659_v57 = vrot.slane %v442_v51, %v5493_v11  ;;  %v464_v58 = vcombine.high %v442_v51, %v442_v51  ;;  %v435_v63 = vcombine.high %v433_v55, %v433_v55  ;;  %v205_v51 = vld [vmem:[%s9029_s1 + $0x30] sm:$0xff] }
  0x33   : > { %900 = vperm.xlu1 %5291, %v5540_v39   ;;  %9143 = vst [vmem:[#allocation15_spill] sm:$0xff] %v5644_v42  ;;  %9144 = vst [vmem:[#allocation16_spill] sm:$0xff] %v5648_v49  ;;  %v5653_v52 = vrot.slane %v418_v44, %v5493_v11  ;;  %v449_v4 = vrot.slane %v433_v55, %v5490_v9  ;;  %v483_v19 = vcombine.high %v475_v10, %v475_v10 }
  0x34   : > { %9146 = vst [vmem:[#allocation18_spill] sm:$0xff] %v5659_v57  ;;  %v5663_v60 = vrot.slane %v456_v53, %v5493_v11  ;;  %v466_v62 = vcombine.high %v456_v53, %v456_v53  ;;  %v5670_v2 = vrot.slane %v464_v58, %v5493_v11  ;;  %v463_v7 = vrot.slane %v435_v63, %v5490_v9 }
  0x35   : > { %912 = vperm.xlu0 %5290, %v5547_v43   ;;  %9145 = vst [vmem:[#allocation17_spill] sm:$0xff] %v5653_v52  ;;  %v5681_v12 = vrot.slane %v449_v4, %v5493_v11  ;;  %v465_v13 = vcombine.high %v449_v4, %v449_v4  ;;  %v468_v21 = vcombine.high %v204_v0, %v204_v0 }
  0x36   : > { %9147 = vst [vmem:[#allocation19_spill] sm:$0xff] %v5663_v60  ;;  %9148 = vst [vmem:[#allocation20_spill] sm:$0xff] %v5670_v2  ;;  %v5675_v5 = vrot.slane %v466_v62, %v5493_v11  ;;  %v5685_v15 = vrot.slane %v463_v7, %v5493_v11  ;;  %v467_v17 = vcombine.high %v463_v7, %v463_v7 }
  0x37   : > { %916 = vperm.xlu1 %5291, %v5552_v45   ;;  %9150 = vst [vmem:[#allocation22_spill] sm:$0xff] %v5681_v12  ;;  %v5689_v26 = vrot.slane %v465_v13, %v5493_v11  ;;  %v491_v28 = vrot.slane %v475_v10, %v5490_v9  ;;  %v505_v33 = vrot.slane %v483_v19, %v5490_v9 }
  0x38   : > { %9149 = vst [vmem:[#allocation21_spill] sm:$0xff] %v5675_v5  ;;  %9151 = vst [vmem:[#allocation23_spill] sm:$0xff] %v5685_v15  ;;  %v5694_v30 = vrot.slane %v467_v17, %v5493_v11  ;;  %v482_v36 = vrot.slane %v468_v21, %v5490_v9  ;;  %v524_v63 = vrot.slane %v205_v51, %v5490_v9 }
  0x39   : > { %920 = vperm.xlu0 %5290, %v5558_v48   ;;  %9152 = vst [vmem:[#allocation24_spill] sm:$0xff] %v5689_v26  ;;  %v5700_v38 = vrot.slane %v491_v28, %v5493_v11  ;;  %v513_v41 = vcombine.high %v491_v28, %v491_v28  ;;  %v5704_v44 = vrot.slane %v505_v33, %v5493_v11 }
  0x3a   : > { %9153 = vst [vmem:[#allocation25_spill] sm:$0xff] %v5694_v30  ;;  %v515_v46 = vcombine.high %v505_v33, %v505_v33  ;;  %v484_v47 = vcombine.high %v482_v36, %v482_v36  ;;  %v498_v55 = vrot.slane %v482_v36, %v5490_v9  ;;  %v532_v13 = vcombine.high %v524_v63, %v524_v63 }
  0x3b   : > { %924 = vperm.xlu1 %5291, %v5562_v50   ;;  %9154 = vst [vmem:[#allocation26_spill] sm:$0xff] %v5700_v38  ;;  %9155 = vst [vmem:[#allocation27_spill] sm:$0xff] %v5704_v44  ;;  %v5711_v53 = vrot.slane %v513_v41, %v5493_v11  ;;  %v517_v17 = vcombine.high %v205_v51, %v205_v51  ;;  %v540_v21 = vrot.slane %v524_v63, %v5490_v9 }
  0x3c   : > { %v5716_v58 = vrot.slane %v515_v46, %v5493_v11  ;;  %v512_v62 = vrot.slane %v484_v47, %v5490_v9  ;;  %v5722_v0 = vrot.slane %v498_v55, %v5493_v11  ;;  %v514_v4 = vcombine.high %v498_v55, %v498_v55 }
  0x3d   : > { %928 = vperm.xlu0 %5290, %v5566_v54   ;;  %9156 = vst [vmem:[#allocation28_spill] sm:$0xff] %v5711_v53  ;;  %v554_v33 = vrot.slane %v532_v13, %v5490_v9  ;;  %v531_v36 = vrot.slane %v517_v17, %v5490_v9  ;;  %v5741_v41 = vrot.slane %v540_v21, %v5493_v11 }
  0x3e   : > { %9157 = vst [vmem:[#allocation29_spill] sm:$0xff] %v5716_v58  ;;  %9158 = vst [vmem:[#allocation30_spill] sm:$0xff] %v5722_v0  ;;  %v5726_v7 = vrot.slane %v512_v62, %v5493_v11  ;;  %v516_v10 = vcombine.high %v512_v62, %v512_v62  ;;  %v5730_v19 = vrot.slane %v514_v4, %v5493_v11  ;;  %v206_v62 = vld [vmem:[%s9029_s1 + $0x38] sm:$0xff] }
  0x3f   : > { %932 = vperm.xlu1 %5291, %v5571_v56   ;;  %9162 = vst [vmem:[#allocation34_spill] sm:$0xff] %v5741_v41  ;;  %v562_v46 = vcombine.high %v540_v21, %v540_v21  ;;  %v5745_v47 = vrot.slane %v554_v33, %v5493_v11  ;;  %v564_v51 = vcombine.high %v554_v33, %v554_v33 }
  0x40   : > { %9159 = vst [vmem:[#allocation31_spill] sm:$0xff] %v5726_v7  ;;  %9160 = vst [vmem:[#allocation32_spill] sm:$0xff] %v5730_v19  ;;  %v5735_v28 = vrot.slane %v516_v10, %v5493_v11  ;;  %v533_v55 = vcombine.high %v531_v36, %v531_v36  ;;  %v547_v4 = vrot.slane %v531_v36, %v5490_v9 }
  0x41   : > { %936 = vperm.xlu0 %5290, %v5577_v59   ;;  %9163 = vst [vmem:[#allocation35_spill] sm:$0xff] %v5745_v47  ;;  %v5752_v63 = vrot.slane %v562_v46, %v5493_v11  ;;  %v5757_v10 = vrot.slane %v564_v51, %v5493_v11  ;;  %v573_v17 = vrot.slane %v206_v62, %v5490_v9 }
  0x42   : > { %9161 = vst [vmem:[#allocation33_spill] sm:$0xff] %v5735_v28  ;;  %v561_v13 = vrot.slane %v533_v55, %v5490_v9  ;;  %v5763_v21 = vrot.slane %v547_v4, %v5493_v11  ;;  %v563_v33 = vcombine.high %v547_v4, %v547_v4 }
  0x43   : > { %940 = vperm.xlu1 %5291, %v5581_v61   ;;  %9164 = vst [vmem:[#allocation36_spill] sm:$0xff] %v5752_v63  ;;  %9165 = vst [vmem:[#allocation37_spill] sm:$0xff] %v5757_v10  ;;  %v589_v55 = vrot.slane %v573_v17, %v5490_v9 }
  0x44   : > { %9166 = vst [vmem:[#allocation38_spill] sm:$0xff] %v5763_v21  ;;  %v5767_v46 = vrot.slane %v561_v13, %v5493_v11  ;;  %v565_v36 = vcombine.high %v561_v13, %v561_v13  ;;  %v5771_v51 = vrot.slane %v563_v33, %v5493_v11 }
  0x45   : > { %944 = vperm.xlu0 %5290, %v5588_v1   ;;  %v611_v13 = vcombine.high %v589_v55, %v589_v55 }
  0x46   : > { %9167 = vst [vmem:[#allocation39_spill] sm:$0xff] %v5767_v46  ;;  %9168 = vst [vmem:[#allocation40_spill] sm:$0xff] %v5771_v51 }
  0x47   : > { %948 = vperm.xlu1 %5291, %v5593_v3  }
  0x49   : > { %952 = vperm.xlu0 %5290, %v5599_v6  }
  0x4b   : > { %956 = vperm.xlu1 %5291, %v5603_v8  }
  0x4d   : > { %960 = vperm.xlu0 %5290, %v5607_v14  }
  0x4f   : > { %964 = vperm.xlu1 %5291, %v5612_v16  }
  0x51   : > { %968 = vperm.xlu0 %5290, %v5618_v20  }
  0x53   : > { %972 = vperm.xlu1 %5291, %v5622_v24  }
  0x55   : > { %976 = vperm.xlu0 %5290, %v5629_v31  }
  0x57   : > { %980 = vperm.xlu1 %5291, %v5634_v35  }
  0x59   : > { %984 = vperm.xlu0 %5290, %v5640_v40  }
  0x5b   : > { %988 = vperm.xlu1 %5291, %v5644_v42  }
  0x5d   : > { %992 = vperm.xlu0 %5290, %v5648_v49  }
  0x5f   : > { %996 = vperm.xlu1 %5291, %v5653_v52  }
  0x61   : > { %1000 = vperm.xlu0 %5290, %v5659_v57  }
  0x63   : > { %1004 = vperm.xlu1 %5291, %v5663_v60  }
  0x65   : > { %1008 = vperm.xlu0 %5290, %v5670_v2  }
  0x67   : > { %1012 = vperm.xlu1 %5291, %v5675_v5  }
  0x69   : > { %1016 = vperm.xlu0 %5290, %v5681_v12  }
  0x6b   : > { %1020 = vperm.xlu1 %5291, %v5685_v15  }
  0x6d   : > { %1024 = vperm.xlu0 %5290, %v5689_v26  }
  0x6f   : > { %1028 = vperm.xlu1 %5291, %v5694_v30  }
  0x71   : > { %1032 = vperm.xlu0 %5290, %v5700_v38  }
  0x73   : > { %1036 = vperm.xlu1 %5291, %v5704_v44  }
  0x75   : > { %1040 = vperm.xlu0 %5290, %v5711_v53  }
  0x77   : > { %1044 = vperm.xlu1 %5291, %v5716_v58  }
  0x79   : > { %1048 = vperm.xlu0 %5290, %v5722_v0  }
  0x7b   : > { %1052 = vperm.xlu1 %5291, %v5726_v7  }
  0x7d   : > { %1056 = vperm.xlu0 %5290, %v5730_v19  }
  0x7f   : > { %1060 = vperm.xlu1 %5291, %v5735_v28  }
  0x81   : > { %1064 = vperm.xlu0 %5290, %v5741_v41   ;;  %v581_v41 = vcombine.high %v573_v17, %v573_v17 }
  0x83   : > { %1068 = vperm.xlu1 %5291, %v5745_v47   ;;  %v566_v47 = vcombine.high %v206_v62, %v206_v62  ;;  %v603_v4 = vrot.slane %v581_v41, %v5490_v9  ;;  %v5782_v62 = vrot.slane %v589_v55, %v5493_v11  ;;  %v5793_v41 = vrot.slane %v611_v13, %v5493_v11 }
  0x85   : > { %1072 = vperm.xlu0 %5290, %v5752_v63   ;;  %v5776_v63 = vrot.slane %v565_v36, %v5493_v11  ;;  %9170 = vst [vmem:[#allocation42_spill] sm:$0xff] %v5782_v62  ;;  %v5786_v33 = vrot.slane %v603_v4, %v5493_v11  ;;  %v613_v17 = vcombine.high %v603_v4, %v603_v4  ;;  %v207_v36 = vld [vmem:[%s9030_s2] sm:$0xff]  ;;  %9172 = vst [vmem:[#allocation44_spill] sm:$0xff] %v5793_v41 }
  0x86   : > { %v1206_v4 = vrot.slane %v207_v36, %v5490_v9 }
  0x87   : > { %1076 = vperm.xlu1 %5291, %v5757_v10   ;;  %9169 = vst [vmem:[#allocation41_spill] sm:$0xff] %v5776_v63  ;;  %v580_v10 = vrot.slane %v566_v47, %v5490_v9  ;;  %9171 = vst [vmem:[#allocation43_spill] sm:$0xff] %v5786_v33  ;;  %v5798_v55 = vrot.slane %v613_v17, %v5493_v11 }
  0x88   : > { %v1222_v17 = vrot.slane %v1206_v4, %v5490_v9 }
  0x89   : > { %1080 = vperm.xlu0 %5290, %v5763_v21   ;;  %v582_v21 = vcombine.high %v580_v10, %v580_v10  ;;  %v596_v47 = vrot.slane %v580_v10, %v5490_v9  ;;  %9173 = vst [vmem:[#allocation45_spill] sm:$0xff] %v5798_v55 }
  0x8b   : > { %1084 = vperm.xlu1 %5291, %v5767_v46   ;;  %v1199_v46 = vcombine.high %v207_v36, %v207_v36  ;;  %v1244_v36 = vcombine.high %v1222_v17, %v1222_v17 }
  0x8d   : > { %1088 = vperm.xlu0 %5290, %v5771_v51   ;;  %v610_v51 = vrot.slane %v582_v21, %v5490_v9 }
  0x8f   : > { %1092 = vperm.xlu1 %5291, %v5776_v63   ;;  %v5804_v63 = vrot.slane %v596_v47, %v5493_v11  ;;  %v5808_v13 = vrot.slane %v610_v51, %v5493_v11  ;;  %v614_v10 = vcombine.high %v610_v51, %v610_v51  ;;  %v1594_v51 = vrot.slane %v1222_v17, %v5493_v11 }
  0x91   : > { %1096 = vperm.xlu0 %5290, %v5782_v62   ;;  %9174 = vst [vmem:[#allocation46_spill] sm:$0xff] %v5804_v63  ;;  %v612_v62 = vcombine.high %v596_v47, %v596_v47  ;;  %9175 = vst [vmem:[#allocation47_spill] sm:$0xff] %v5808_v13 }
  0x93   : > { %1100 = vperm.xlu1 %5291, %v5786_v33   ;;  %v1214_v33 = vcombine.high %v1206_v4, %v1206_v4  ;;  %v5812_v21 = vrot.slane %v612_v62, %v5493_v11 }
  0x95   : > { %1104 = vperm.xlu0 %5290, %v5793_v41   ;;  %9176 = vst [vmem:[#allocation48_spill] sm:$0xff] %v5812_v21  ;;  %v5817_v41 = vrot.slane %v614_v10, %v5493_v11  ;;  %v1236_v47 = vrot.slane %v1214_v33, %v5490_v9  ;;  %v1602_v33 = vrot.slane %v1244_v36, %v5493_v11 }
  0x97   : > { %1108 = vperm.xlu1 %5291, %v5798_v55   ;;  %9177 = vst [vmem:[#allocation49_spill] sm:$0xff] %v5817_v41  ;;  %v1213_v55 = vrot.slane %v1199_v46, %v5490_v9  ;;  %v1598_v4 = vrot.slane %v1236_v47, %v5493_v11  ;;  %v208_v46 = vld [vmem:[%s9030_s2 + $0x8] sm:$0xff] }
  0x99   : > { %1112 = vperm.xlu0 %5290, %v5804_v63   ;;  %v1246_v63 = vcombine.high %v1236_v47, %v1236_v47  ;;  %v1215_v10 = vcombine.high %v1213_v55, %v1213_v55  ;;  %v1255_v47 = vrot.slane %v208_v46, %v5490_v9 }
  0x9b   : > { %1116 = vperm.xlu1 %5291, %v5808_v13  }
  0x9c   : > { %v5821_v19 = vpop.permute.xlu0 %872 }
  0x9d   : > { %9178 = vst [vmem:[#allocation50_spill] sm:$0xff] %v5821_v19  ;;  %1120 = vperm.xlu0 %5290, %v5812_v21   ;;  %v1229_v19 = vrot.slane %v1213_v55, %v5490_v9  ;;  %v1243_v21 = vrot.slane %v1215_v10, %v5490_v9  ;;  %v1271_v10 = vrot.slane %v1255_v47, %v5490_v9 }
  0x9e   : > { %v5825_v62 = vpop.permute.xlu1 %880 }
  0x9f   : > { %9179 = vst [vmem:[#allocation51_spill] sm:$0xff] %v5825_v62  ;;  %1124 = vperm.xlu1 %5291, %v5817_v41   ;;  %v1606_v62 = vrot.slane %v1246_v63, %v5493_v11  ;;  %v1245_v28 = vcombine.high %v1229_v19, %v1229_v19  ;;  %v1614_v55 = vrot.slane %v1243_v21, %v5493_v11 }
  0xa0   : > { %v5829_v13 = vpop.permute.xlu0 %888  ;;  %v1247_v36 = vcombine.high %v1243_v21, %v1243_v21  ;;  %v1626_v21 = vrot.slane %v1271_v10, %v5493_v11 }
  0xa1   : > { %9180 = vst [vmem:[#allocation52_spill] sm:$0xff] %v5829_v13  ;;  %1848 = vperm.xlu0 %5290, %v1594_v51   ;;  %v1610_v13 = vrot.slane %v1229_v19, %v5493_v11  ;;  %v1618_v63 = vrot.slane %v1245_v28, %v5493_v11 }
  0xa2   : > { %v5836_v17 = vpop.permute.xlu1 %892  ;;  %v1622_v19 = vrot.slane %v1247_v36, %v5493_v11 }
  0xa3   : > { %9181 = vst [vmem:[#allocation53_spill] sm:$0xff] %v5836_v17  ;;  %1852 = vperm.xlu1 %5291, %v1598_v4   ;;  %v1263_v17 = vcombine.high %v1255_v47, %v1255_v47  ;;  %v1248_v4 = vcombine.high %v208_v46, %v208_v46  ;;  %v1293_v46 = vcombine.high %v1271_v10, %v1271_v10 }
  0xa4   : > { %v5841_v41 = vpop.permute.xlu0 %876 }
  0xa5   : > { %9182 = vst [vmem:[#allocation54_spill] sm:$0xff] %v5841_v41  ;;  %1856 = vperm.xlu0 %5290, %v1602_v33   ;;  %v1285_v33 = vrot.slane %v1263_v17, %v5490_v9  ;;  %v209_v17 = vld [vmem:[%s9030_s2 + $0x10] sm:$0xff]  ;;  %v1634_v36 = vrot.slane %v1293_v46, %v5493_v11 }
  0xa6   : > { %v5844_v51 = vpop.permute.xlu1 %908 }
  0xa7   : > { %9183 = vst [vmem:[#allocation55_spill] sm:$0xff] %v5844_v51  ;;  %1860 = vperm.xlu1 %5291, %v1606_v62   ;;  %v1262_v62 = vrot.slane %v1248_v4, %v5490_v9  ;;  %v1630_v28 = vrot.slane %v1285_v33, %v5493_v11  ;;  %v1295_v47 = vcombine.high %v1285_v33, %v1285_v33 }
  0xa8   : > { %v5847_v0 = vpop.permute.xlu0 %896  ;;  %v1304_v33 = vrot.slane %v209_v17, %v5490_v9 }
  0xa9   : > { %9184 = vst [vmem:[#allocation56_spill] sm:$0xff] %v5847_v0  ;;  %1864 = vperm.xlu0 %5290, %v1610_v13   ;;  %v1264_v0 = vcombine.high %v1262_v62, %v1262_v62  ;;  %v1278_v4 = vrot.slane %v1262_v62, %v5490_v9  ;;  %v1638_v10 = vrot.slane %v1295_v47, %v5493_v11 }
  0xaa   : > { %v5851_v41 = vpop.permute.xlu1 %884  ;;  %v1320_v47 = vrot.slane %v1304_v33, %v5490_v9 }
  0xab   : > { %9185 = vst [vmem:[#allocation57_spill] sm:$0xff] %v5851_v41  ;;  %1868 = vperm.xlu1 %5291, %v1614_v55  }
  0xac   : > { %v5856_v51 = vpop.permute.xlu0 %904 }
  0xad   : > { %9186 = vst [vmem:[#allocation58_spill] sm:$0xff] %v5856_v51  ;;  %1872 = vperm.xlu0 %5290, %v1618_v63  }
  0xae   : > { %v5859_v13 = vpop.permute.xlu1 %900 }
  0xaf   : > { %9187 = vst [vmem:[#allocation59_spill] sm:$0xff] %v5859_v13  ;;  %1876 = vperm.xlu1 %5291, %v1622_v19   ;;  %v1292_v19 = vrot.slane %v1264_v0, %v5490_v9  ;;  %v1294_v13 = vcombine.high %v1278_v4, %v1278_v4 }
  0xb0   : > { %v5862_v55 = vpop.permute.xlu0 %912 }
  0xb1   : > { %9188 = vst [vmem:[#allocation60_spill] sm:$0xff] %v5862_v55  ;;  %1880 = vperm.xlu0 %5290, %v1626_v21   ;;  %v1642_v55 = vrot.slane %v1278_v4, %v5493_v11  ;;  %v1646_v62 = vrot.slane %v1292_v19, %v5493_v11  ;;  %v1296_v46 = vcombine.high %v1292_v19, %v1292_v19 }
  0xb2   : > { %v5869_v63 = vpop.permute.xlu1 %916  ;;  %v1650_v0 = vrot.slane %v1294_v13, %v5493_v11  ;;  %v1342_v19 = vcombine.high %v1320_v47, %v1320_v47 }
  0xb3   : > { %9189 = vst [vmem:[#allocation61_spill] sm:$0xff] %v5869_v63  ;;  %1884 = vperm.xlu1 %5291, %v1630_v28   ;;  %v1312_v63 = vcombine.high %v1304_v33, %v1304_v33  ;;  %v1297_v28 = vcombine.high %v209_v17, %v209_v17  ;;  %v1658_v17 = vrot.slane %v1320_v47, %v5493_v11 }
  0xb4   : > { %v5874_v51 = vpop.permute.xlu0 %920 }
  0xb5   : > { %9190 = vst [vmem:[#allocation62_spill] sm:$0xff] %v5874_v51  ;;  %1888 = vperm.xlu0 %5290, %v1634_v36   ;;  %v1654_v36 = vrot.slane %v1296_v46, %v5493_v11  ;;  %v1334_v4 = vrot.slane %v1312_v63, %v5490_v9  ;;  %v210_v63 = vld [vmem:[%s9030_s2 + $0x18] sm:$0xff]  ;;  %v1666_v46 = vrot.slane %v1342_v19, %v5493_v11 }
  0xb6   : > { %v5877_v21 = vpop.permute.xlu1 %924 }
  0xb7   : > { %9191 = vst [vmem:[#allocation63_spill] sm:$0xff] %v5877_v21  ;;  %1892 = vperm.xlu1 %5291, %v1638_v10   ;;  %v1311_v10 = vrot.slane %v1297_v28, %v5490_v9  ;;  %v1662_v13 = vrot.slane %v1334_v4, %v5493_v11  ;;  %v1344_v33 = vcombine.high %v1334_v4, %v1334_v4 }
  0xb8   : > { %v5880_v41 = vpop.permute.xlu0 %928  ;;  %v1353_v4 = vrot.slane %v210_v63, %v5490_v9 }
  0xb9   : > { %9192 = vst [vmem:[#allocation64_spill] sm:$0xff] %v5880_v41  ;;  %1896 = vperm.xlu0 %5290, %v1642_v55   ;;  %v1327_v28 = vrot.slane %v1311_v10, %v5490_v9  ;;  %v1670_v47 = vrot.slane %v1344_v33, %v5493_v11 }
  0xba   : > { %v5884_v51 = vpop.permute.xlu1 %932  ;;  %v1369_v33 = vrot.slane %v1353_v4, %v5490_v9 }
  0xbb   : > { %9193 = vst [vmem:[#allocation65_spill] sm:$0xff] %v5884_v51  ;;  %1900 = vperm.xlu1 %5291, %v1646_v62   ;;  %v1313_v51 = vcombine.high %v1311_v10, %v1311_v10 }
  0xbc   : > { %v5889_v21 = vpop.permute.xlu0 %936 }
  0xbd   : > { %9194 = vst [vmem:[#allocation66_spill] sm:$0xff] %v5889_v21  ;;  %1904 = vperm.xlu0 %5290, %v1650_v0   ;;  %v1343_v21 = vcombine.high %v1327_v28, %v1327_v28 }
  0xbe   : > { %v5892_v55 = vpop.permute.xlu1 %940 }
  0xbf   : > { %9195 = vst [vmem:[#allocation67_spill] sm:$0xff] %v5892_v55  ;;  %1908 = vperm.xlu1 %5291, %v1654_v36   ;;  %v1341_v36 = vrot.slane %v1313_v51, %v5490_v9  ;;  %v1682_v51 = vrot.slane %v1343_v21, %v5493_v11 }
  0xc0   : > { %v5895_v62 = vpop.permute.xlu0 %944 }
  0xc1   : > { %9196 = vst [vmem:[#allocation68_spill] sm:$0xff] %v5895_v62  ;;  %1912 = vperm.xlu0 %5290, %v1658_v17   ;;  %v1674_v62 = vrot.slane %v1327_v28, %v5493_v11  ;;  %v1678_v10 = vrot.slane %v1341_v36, %v5493_v11  ;;  %v1345_v19 = vcombine.high %v1341_v36, %v1341_v36 }
  0xc2   : > { %v5902_v0 = vpop.permute.xlu1 %948  ;;  %v1391_v36 = vcombine.high %v1369_v33, %v1369_v33 }
  0xc3   : > { %9197 = vst [vmem:[#allocation69_spill] sm:$0xff] %v5902_v0  ;;  %1916 = vperm.xlu1 %5291, %v1662_v13   ;;  %v1361_v0 = vcombine.high %v1353_v4, %v1353_v4  ;;  %v1346_v13 = vcombine.high %v210_v63, %v210_v63  ;;  %v1690_v63 = vrot.slane %v1369_v33, %v5493_v11 }
  0xc4   : > { %v5907_v55 = vpop.permute.xlu0 %952 }
  0xc5   : > { %9198 = vst [vmem:[#allocation70_spill] sm:$0xff] %v5907_v55  ;;  %1920 = vperm.xlu0 %5290, %v1666_v46   ;;  %v1686_v46 = vrot.slane %v1345_v19, %v5493_v11  ;;  %v1383_v28 = vrot.slane %v1361_v0, %v5490_v9  ;;  %v211_v0 = vld [vmem:[%s9030_s2 + $0x20] sm:$0xff]  ;;  %v1698_v19 = vrot.slane %v1391_v36, %v5493_v11 }
  0xc6   : > { %v5910_v17 = vpop.permute.xlu1 %956 }
  0xc7   : > { %9199 = vst [vmem:[#allocation71_spill] sm:$0xff] %v5910_v17  ;;  %1924 = vperm.xlu1 %5291, %v1670_v47   ;;  %v1360_v47 = vrot.slane %v1346_v13, %v5490_v9  ;;  %v1694_v21 = vrot.slane %v1383_v28, %v5493_v11  ;;  %v1393_v4 = vcombine.high %v1383_v28, %v1383_v28 }
  0xc8   : > { %v5913_v41 = vpop.permute.xlu0 %960  ;;  %v1402_v28 = vrot.slane %v211_v0, %v5490_v9 }
  0xc9   : > { %9200 = vst [vmem:[#allocation72_spill] sm:$0xff] %v5913_v41  ;;  %1928 = vperm.xlu0 %5290, %v1674_v62   ;;  %v1376_v13 = vrot.slane %v1360_v47, %v5490_v9  ;;  %v1702_v33 = vrot.slane %v1393_v4, %v5493_v11 }
  0xca   : > { %v5917_v55 = vpop.permute.xlu1 %964  ;;  %v1418_v4 = vrot.slane %v1402_v28, %v5490_v9 }
  0xcb   : > { %9201 = vst [vmem:[#allocation73_spill] sm:$0xff] %v5917_v55  ;;  %1932 = vperm.xlu1 %5291, %v1678_v10   ;;  %v1362_v55 = vcombine.high %v1360_v47, %v1360_v47 }
  0xcc   : > { %v5922_v17 = vpop.permute.xlu0 %968 }
  0xcd   : > { %9202 = vst [vmem:[#allocation74_spill] sm:$0xff] %v5922_v17  ;;  %1936 = vperm.xlu0 %5290, %v1682_v51   ;;  %v1392_v17 = vcombine.high %v1376_v13, %v1376_v13 }
  0xce   : > { %v5925_v62 = vpop.permute.xlu1 %972 }
  0xcf   : > { %9203 = vst [vmem:[#allocation75_spill] sm:$0xff] %v5925_v62  ;;  %1940 = vperm.xlu1 %5291, %v1686_v46   ;;  %v1390_v46 = vrot.slane %v1362_v55, %v5490_v9  ;;  %v1714_v55 = vrot.slane %v1392_v17, %v5493_v11 }
  0xd0   : > { %v5928_v10 = vpop.permute.xlu0 %976 }
  0xd1   : > { %9204 = vst [vmem:[#allocation76_spill] sm:$0xff] %v5928_v10  ;;  %1944 = vperm.xlu0 %5290, %v1690_v63   ;;  %v1706_v10 = vrot.slane %v1376_v13, %v5493_v11  ;;  %v1710_v47 = vrot.slane %v1390_v46, %v5493_v11  ;;  %v1394_v36 = vcombine.high %v1390_v46, %v1390_v46 }
  0xd2   : > { %v5935_v51 = vpop.permute.xlu1 %980  ;;  %v1722_v46 = vrot.slane %v1418_v4, %v5493_v11 }
  0xd3   : > { %9205 = vst [vmem:[#allocation77_spill] sm:$0xff] %v5935_v51  ;;  %1948 = vperm.xlu1 %5291, %v1694_v21   ;;  %v1395_v51 = vcombine.high %v211_v0, %v211_v0  ;;  %v1410_v21 = vcombine.high %v1402_v28, %v1402_v28  ;;  %v1440_v0 = vcombine.high %v1418_v4, %v1418_v4 }
  0xd4   : > { %v5940_v62 = vpop.permute.xlu0 %984 }
  0xd5   : > { %9206 = vst [vmem:[#allocation78_spill] sm:$0xff] %v5940_v62  ;;  %1952 = vperm.xlu0 %5290, %v1698_v19   ;;  %v1718_v19 = vrot.slane %v1394_v36, %v5493_v11  ;;  %v1432_v13 = vrot.slane %v1410_v21, %v5490_v9  ;;  %v212_v36 = vld [vmem:[%s9030_s2 + $0x28] sm:$0xff] }
  0xd6   : > { %v5943_v63 = vpop.permute.xlu1 %988 }
  0xd7   : > { %9207 = vst [vmem:[#allocation79_spill] sm:$0xff] %v5943_v63  ;;  %1956 = vperm.xlu1 %5291, %v1702_v33   ;;  %v1409_v33 = vrot.slane %v1395_v51, %v5490_v9  ;;  %v1442_v17 = vcombine.high %v1432_v13, %v1432_v13  ;;  %v1726_v28 = vrot.slane %v1432_v13, %v5493_v11 }
  0xd8   : > { %v5946_v41 = vpop.permute.xlu0 %992  ;;  %v1730_v51 = vrot.slane %v1440_v0, %v5493_v11  ;;  %v1451_v13 = vrot.slane %v212_v36, %v5490_v9 }
  0xd9   : > { %9208 = vst [vmem:[#allocation80_spill] sm:$0xff] %v5946_v41  ;;  %1960 = vperm.xlu0 %5290, %v1706_v10   ;;  %v1425_v21 = vrot.slane %v1409_v33, %v5490_v9  ;;  %v1734_v4 = vrot.slane %v1442_v17, %v5493_v11 }
  0xda   : > { %v5950_v62 = vpop.permute.xlu1 %996  ;;  %v1467_v17 = vrot.slane %v1451_v13, %v5490_v9 }
  0xdb   : > { %9209 = vst [vmem:[#allocation81_spill] sm:$0xff] %v5950_v62  ;;  %1964 = vperm.xlu1 %5291, %v1710_v47   ;;  %v1411_v62 = vcombine.high %v1409_v33, %v1409_v33 }
  0xdc   : > { %v5955_v63 = vpop.permute.xlu0 %1000 }
  0xdd   : > { %9210 = vst [vmem:[#allocation82_spill] sm:$0xff] %v5955_v63  ;;  %1968 = vperm.xlu0 %5290, %v1714_v55   ;;  %v1441_v63 = vcombine.high %v1425_v21, %v1425_v21 }
  0xde   : > { %v5958_v10 = vpop.permute.xlu1 %1004 }
  0xdf   : > { %9211 = vst [vmem:[#allocation83_spill] sm:$0xff] %v5958_v10  ;;  %1972 = vperm.xlu1 %5291, %v1718_v19   ;;  %v1439_v19 = vrot.slane %v1411_v62, %v5490_v9  ;;  %v1746_v62 = vrot.slane %v1441_v63, %v5493_v11 }
  0xe0   : > { %v5961_v47 = vpop.permute.xlu0 %1008 }
  0xe1   : > { %9212 = vst [vmem:[#allocation84_spill] sm:$0xff] %v5961_v47  ;;  %1976 = vperm.xlu0 %5290, %v1722_v46   ;;  %v1738_v47 = vrot.slane %v1425_v21, %v5493_v11  ;;  %v1742_v33 = vrot.slane %v1439_v19, %v5493_v11  ;;  %v1443_v0 = vcombine.high %v1439_v19, %v1439_v19 }
  0xe2   : > { %v5968_v55 = vpop.permute.xlu1 %1012  ;;  %v1489_v19 = vcombine.high %v1467_v17, %v1467_v17 }
  0xe3   : > { %9213 = vst [vmem:[#allocation85_spill] sm:$0xff] %v5968_v55  ;;  %1980 = vperm.xlu1 %5291, %v1726_v28   ;;  %v1459_v55 = vcombine.high %v1451_v13, %v1451_v13  ;;  %v1444_v28 = vcombine.high %v212_v36, %v212_v36  ;;  %v1754_v36 = vrot.slane %v1467_v17, %v5493_v11 }
  0xe4   : > { %v5973_v10 = vpop.permute.xlu0 %1016 }
  0xe5   : > { %9214 = vst [vmem:[#allocation86_spill] sm:$0xff] %v5973_v10  ;;  %1984 = vperm.xlu0 %5290, %v1730_v51   ;;  %v1750_v51 = vrot.slane %v1443_v0, %v5493_v11  ;;  %v1481_v21 = vrot.slane %v1459_v55, %v5490_v9  ;;  %v213_v55 = vld [vmem:[%s9030_s2 + $0x30] sm:$0xff]  ;;  %v1762_v0 = vrot.slane %v1489_v19, %v5493_v11 }
  0xe6   : > { %v5976_v46 = vpop.permute.xlu1 %1020 }
  0xe7   : > { %9215 = vst [vmem:[#allocation87_spill] sm:$0xff] %v5976_v46  ;;  %1988 = vperm.xlu1 %5291, %v1734_v4   ;;  %v1458_v4 = vrot.slane %v1444_v28, %v5490_v9  ;;  %v1758_v63 = vrot.slane %v1481_v21, %v5493_v11  ;;  %v1491_v13 = vcombine.high %v1481_v21, %v1481_v21 }
  0xe8   : > { %v5979_v41 = vpop.permute.xlu0 %1024  ;;  %v1500_v21 = vrot.slane %v213_v55, %v5490_v9 }
  0xe9   : > { %9216 = vst [vmem:[#allocation88_spill] sm:$0xff] %v5979_v41  ;;  %1992 = vperm.xlu0 %5290, %v1738_v47   ;;  %v1474_v28 = vrot.slane %v1458_v4, %v5490_v9  ;;  %v1766_v17 = vrot.slane %v1491_v13, %v5493_v11 }
  0xea   : > { %v5983_v10 = vpop.permute.xlu1 %1028  ;;  %v1516_v13 = vrot.slane %v1500_v21, %v5490_v9 }
  0xeb   : > { %9217 = vst [vmem:[#allocation89_spill] sm:$0xff] %v5983_v10  ;;  %1996 = vperm.xlu1 %5291, %v1742_v33   ;;  %v1460_v10 = vcombine.high %v1458_v4, %v1458_v4 }
  0xec   : > { %v5988_v46 = vpop.permute.xlu0 %1032 }
  0xed   : > { %9218 = vst [vmem:[#allocation90_spill] sm:$0xff] %v5988_v46  ;;  %2000 = vperm.xlu0 %5290, %v1746_v62   ;;  %v1490_v46 = vcombine.high %v1474_v28, %v1474_v28 }
  0xee   : > { %v5991_v47 = vpop.permute.xlu1 %1036 }
  0xef   : > { %9219 = vst [vmem:[#allocation91_spill] sm:$0xff] %v5991_v47  ;;  %2004 = vperm.xlu1 %5291, %v1750_v51   ;;  %v1488_v51 = vrot.slane %v1460_v10, %v5490_v9  ;;  %v1778_v10 = vrot.slane %v1490_v46, %v5493_v11 }
  0xf0   : > { %v5994_v33 = vpop.permute.xlu0 %1040 }
  0xf1   : > { %9220 = vst [vmem:[#allocation92_spill] sm:$0xff] %v5994_v33  ;;  %2008 = vperm.xlu0 %5290, %v1754_v36   ;;  %v1770_v33 = vrot.slane %v1474_v28, %v5493_v11  ;;  %v1774_v4 = vrot.slane %v1488_v51, %v5493_v11  ;;  %v1492_v19 = vcombine.high %v1488_v51, %v1488_v51 }
  0xf2   : > { %v6001_v62 = vpop.permute.xlu1 %1044  ;;  %v1538_v51 = vcombine.high %v1516_v13, %v1516_v13 }
  0xf3   : > { %9221 = vst [vmem:[#allocation93_spill] sm:$0xff] %v6001_v62  ;;  %2012 = vperm.xlu1 %5291, %v1758_v63   ;;  %v1508_v62 = vcombine.high %v1500_v21, %v1500_v21  ;;  %v1493_v63 = vcombine.high %v213_v55, %v213_v55  ;;  %v1786_v55 = vrot.slane %v1516_v13, %v5493_v11 }
  0xf4   : > { %v6006_v47 = vpop.permute.xlu0 %1048 }
  0xf5   : > { %9222 = vst [vmem:[#allocation94_spill] sm:$0xff] %v6006_v47  ;;  %2016 = vperm.xlu0 %5290, %v1762_v0   ;;  %v1782_v0 = vrot.slane %v1492_v19, %v5493_v11  ;;  %v1530_v28 = vrot.slane %v1508_v62, %v5490_v9  ;;  %v214_v62 = vld [vmem:[%s9030_s2 + $0x38] sm:$0xff]  ;;  %v1794_v19 = vrot.slane %v1538_v51, %v5493_v11 }
  0xf6   : > { %v6009_v36 = vpop.permute.xlu1 %1052 }
  0xf7   : > { %9223 = vst [vmem:[#allocation95_spill] sm:$0xff] %v6009_v36  ;;  %2020 = vperm.xlu1 %5291, %v1766_v17   ;;  %v1507_v17 = vrot.slane %v1493_v63, %v5490_v9  ;;  %v1790_v46 = vrot.slane %v1530_v28, %v5493_v11  ;;  %v1540_v21 = vcombine.high %v1530_v28, %v1530_v28 }
  0xf8   : > { %v6012_v41 = vpop.permute.xlu0 %1056  ;;  %v1549_v28 = vrot.slane %v214_v62, %v5490_v9 }
  0xf9   : > { %9224 = vst [vmem:[#allocation96_spill] sm:$0xff] %v6012_v41  ;;  %2024 = vperm.xlu0 %5290, %v1770_v33   ;;  %v1523_v63 = vrot.slane %v1507_v17, %v5490_v9  ;;  %v1798_v13 = vrot.slane %v1540_v21, %v5493_v11 }
  0xfa   : > { %v6016_v47 = vpop.permute.xlu1 %1060  ;;  %v1565_v21 = vrot.slane %v1549_v28, %v5490_v9 }
  0xfb   : > { %9225 = vst [vmem:[#allocation97_spill] sm:$0xff] %v6016_v47  ;;  %2028 = vperm.xlu1 %5291, %v1774_v4   ;;  %v1509_v47 = vcombine.high %v1507_v17, %v1507_v17 }
  0xfc   : > { %v6021_v36 = vpop.permute.xlu0 %1064 }
  0xfd   : > { %9226 = vst [vmem:[#allocation98_spill] sm:$0xff] %v6021_v36  ;;  %2032 = vperm.xlu0 %5290, %v1778_v10   ;;  %v1539_v36 = vcombine.high %v1523_v63, %v1523_v63 }
  0xfe   : > { %v6024_v33 = vpop.permute.xlu1 %1068 }
  0xff   : > { %9227 = vst [vmem:[#allocation99_spill] sm:$0xff] %v6024_v33  ;;  %2036 = vperm.xlu1 %5291, %v1782_v0   ;;  %v1537_v0 = vrot.slane %v1509_v47, %v5490_v9  ;;  %v1810_v47 = vrot.slane %v1539_v36, %v5493_v11 }
 0x100   : > { %v6027_v4 = vpop.permute.xlu0 %1072 }
 0x101   : > { %9228 = vst [vmem:[#allocation100_spill] sm:$0xff] %v6027_v4  ;;  %2040 = vperm.xlu0 %5290, %v1786_v55   ;;  %v1802_v4 = vrot.slane %v1523_v63, %v5493_v11  ;;  %v1806_v17 = vrot.slane %v1537_v0, %v5493_v11  ;;  %v1541_v51 = vcombine.high %v1537_v0, %v1537_v0 }
 0x102   : > { %v6034_v10 = vpop.permute.xlu1 %1076  ;;  %v1587_v0 = vcombine.high %v1565_v21, %v1565_v21 }
 0x103   : > { %9229 = vst [vmem:[#allocation101_spill] sm:$0xff] %v6034_v10  ;;  %2044 = vperm.xlu1 %5291, %v1790_v46   ;;  %v1557_v10 = vcombine.high %v1549_v28, %v1549_v28  ;;  %v1542_v46 = vcombine.high %v214_v62, %v214_v62  ;;  %v1818_v62 = vrot.slane %v1565_v21, %v5493_v11 }
 0x104   : > { %v6039_v33 = vpop.permute.xlu0 %1080 }
 0x105   : > { %9230 = vst [vmem:[#allocation102_spill] sm:$0xff] %v6039_v33  ;;  %2048 = vperm.xlu0 %5290, %v1794_v19   ;;  %v1814_v19 = vrot.slane %v1541_v51, %v5493_v11  ;;  %v1579_v63 = vrot.slane %v1557_v10, %v5490_v9  ;;  %v1826_v10 = vrot.slane %v1587_v0, %v5493_v11 }
 0x106   : > { %v6042_v55 = vpop.permute.xlu1 %1084 }
 0x107   : > { %9231 = vst [vmem:[#allocation103_spill] sm:$0xff] %v6042_v55  ;;  %2052 = vperm.xlu1 %5291, %v1798_v13   ;;  %v1556_v13 = vrot.slane %v1542_v46, %v5490_v9  ;;  %v1822_v36 = vrot.slane %v1579_v63, %v5493_v11  ;;  %v1589_v28 = vcombine.high %v1579_v63, %v1579_v63 }
 0x108   : > { %v6045_v41 = vpop.permute.xlu0 %1088 }
 0x109   : > { %9232 = vst [vmem:[#allocation104_spill] sm:$0xff] %v6045_v41  ;;  %2056 = vperm.xlu0 %5290, %v1802_v4   ;;  %v1572_v51 = vrot.slane %v1556_v13, %v5490_v9 }
 0x10a   : > { %v6049_v33 = vpop.permute.xlu1 %1092 }
 0x10b   : > { %9233 = vst [vmem:[#allocation105_spill] sm:$0xff] %v6049_v33  ;;  %2060 = vperm.xlu1 %5291, %v1806_v17   ;;  %v1558_v33 = vcombine.high %v1556_v13, %v1556_v13  ;;  %v1588_v63 = vcombine.high %v1572_v51, %v1572_v51 }
 0x10c   : > { %v6054_v55 = vpop.permute.xlu0 %1096 }
 0x10d   : > { %9234 = vst [vmem:[#allocation106_spill] sm:$0xff] %v6054_v55  ;;  %2064 = vperm.xlu0 %5290, %v1810_v47   ;;  %v1830_v47 = vrot.slane %v1589_v28, %v5493_v11  ;;  %v1586_v21 = vrot.slane %v1558_v33, %v5490_v9 }
 0x10e   : > { %v6057_v4 = vpop.permute.xlu1 %1100 }
 0x10f   : > { %9235 = vst [vmem:[#allocation107_spill] sm:$0xff] %v6057_v4  ;;  %2068 = vperm.xlu1 %5291, %v1814_v19   ;;  %v1834_v19 = vrot.slane %v1572_v51, %v5493_v11  ;;  %v1590_v0 = vcombine.high %v1586_v21, %v1586_v21 }
 0x110   : > { %v6060_v17 = vpop.permute.xlu0 %1104 }
 0x111   : > { %9236 = vst [vmem:[#allocation108_spill] sm:$0xff] %v6060_v17  ;;  %2072 = vperm.xlu0 %5290, %v1818_v62   ;;  %v1838_v62 = vrot.slane %v1586_v21, %v5493_v11  ;;  %v1846_v9 = vrot.slane %v1590_v0, %v5493_v11 }
 0x112   : > { %v6064_v46 = vpop.permute.xlu1 %1108 }
 0x113   : > { %9237 = vst [vmem:[#allocation109_spill] sm:$0xff] %v6064_v46  ;;  %2076 = vperm.xlu1 %5291, %v1822_v36   ;;  %v1842_v36 = vrot.slane %v1588_v63, %v5493_v11 }
 0x114   : > { %v6068_v4 = vpop.permute.xlu0 %1112 }
 0x115   : > { %9238 = vst [vmem:[#allocation110_spill] sm:$0xff] %v6068_v4  ;;  %2080 = vperm.xlu0 %5290, %v1826_v10  }
 0x116   : > { %v6071_v55 = vpop.permute.xlu1 %1116 }
 0x117   : > { %9239 = vst [vmem:[#allocation111_spill] sm:$0xff] %v6071_v55  ;;  %2084 = vperm.xlu1 %5291, %v1830_v47   ;;  %v5400_v47 = vmov 1  }
 0x118   : > { %v6074_v13 = vpop.permute.xlu0 %1120 }
 0x119   : > { %9240 = vst [vmem:[#allocation112_spill] sm:$0xff] %v6074_v13  ;;  %2088 = vperm.xlu0 %5290, %v1834_v19  }
 0x11a   : > { %v6077_v28 = vpop.permute.xlu1 %1124 }
 0x11b   : > { %9241 = vst [vmem:[#allocation113_spill] sm:$0xff] %v6077_v28  ;;  %2092 = vperm.xlu1 %5291, %v1838_v62  }
 0x11c   : > { %v6080_v33 = vpop.permute.xlu0 %1848 }
 0x11d   : > { %9242 = vst [vmem:[#allocation114_spill] sm:$0xff] %v6080_v33  ;;  %2096 = vperm.xlu0 %5290, %v1842_v36  }
 0x11e   : > { %v6082_v10 = vpop.permute.xlu1 %1852 }
 0x11f   : > { %9243 = vst [vmem:[#allocation115_spill] sm:$0xff] %v6082_v10  ;;  %2100 = vperm.xlu1 %5291, %v1846_v9  }
 0x120   : > { %v6084_v51 = vpop.permute.xlu0 %1856 }
 0x121   : > { %9244 = vst [vmem:[#allocation116_spill] sm:$0xff] %v6084_v51  ;;  %5292 = vset.pattern.permute.xlu0 %v5400_v47 }
 0x122   : > { %2168 = vperm.xlu0 %5292, %v5500_v18   ;;  %v6087_v21 = vpop.permute.xlu1 %1860 }
 0x123   : > { %9245 = vst [vmem:[#allocation117_spill] sm:$0xff] %v6087_v21  ;;  %5293 = vset.pattern.permute.xlu1 %v5400_v47 }
 0x124   : > { %v6089_v19 = vpop.permute.xlu0 %1864  ;;  %2172 = vperm.xlu1 %5293, %v5518_v27  }
 0x125   : > { %9246 = vst [vmem:[#allocation118_spill] sm:$0xff] %v6089_v19 }
 0x126   : > { %2180 = vperm.xlu0 %5292, %v5531_v34   ;;  %v6093_v11 = vpop.permute.xlu1 %1868 }
 0x127   : > { %9247 = vst [vmem:[#allocation119_spill] sm:$0xff] %v6093_v11 }
 0x128   : > { %v6095_v63 = vpop.permute.xlu0 %1872  ;;  %2176 = vperm.xlu1 %5293, %v5505_v22  }
 0x129   : > { %9248 = vst [vmem:[#allocation120_spill] sm:$0xff] %v6095_v63 }
 0x12a   : > { %2188 = vperm.xlu0 %5292, %v5513_v25   ;;  %v6099_v62 = vpop.permute.xlu1 %1876 }
 0x12b   : > { %9249 = vst [vmem:[#allocation121_spill] sm:$0xff] %v6099_v62 }
 0x12c   : > { %v6101_v0 = vpop.permute.xlu0 %1880  ;;  %2184 = vperm.xlu1 %5293, %v5508_v23  }
 0x12d   : > { %9250 = vst [vmem:[#allocation122_spill] sm:$0xff] %v6101_v0 }
 0x12e   : > { %2196 = vperm.xlu0 %5292, %v5540_v39   ;;  %v6105_v36 = vpop.permute.xlu1 %1884 }
 0x12f   : > { %9251 = vst [vmem:[#allocation123_spill] sm:$0xff] %v6105_v36 }
 0x130   : > { %v6107_v9 = vpop.permute.xlu0 %1888  ;;  %2192 = vperm.xlu1 %5293, %v5526_v32  }
 0x131   : > { %9252 = vst [vmem:[#allocation124_spill] sm:$0xff] %v6107_v9  ;;  %v9295_v9 = vld [vmem:[#allocation32_spill] sm:$0xff] }
 0x132   : > { %2204 = vperm.xlu0 %5292, %v5522_v29   ;;  %v6111_v47 = vpop.permute.xlu1 %1892 }
 0x133   : > { %9253 = vst [vmem:[#allocation125_spill] sm:$0xff] %v6111_v47 }
 0x134   : > { %v6113_v28 = vpop.permute.xlu0 %1896  ;;  %2200 = vperm.xlu1 %5293, %v5536_v37  }
 0x135   : > { %9254 = vst [vmem:[#allocation126_spill] sm:$0xff] %v6113_v28  ;;  %v9291_v28 = vld [vmem:[#allocation30_spill] sm:$0xff] }
 0x136   : > { %2212 = vperm.xlu0 %5292, %v5552_v45   ;;  %v6117_v13 = vpop.permute.xlu1 %1900 }
 0x137   : > { %9255 = vst [vmem:[#allocation127_spill] sm:$0xff] %v6117_v13 }
 0x138   : > { %v6119_v55 = vpop.permute.xlu0 %1904  ;;  %2208 = vperm.xlu1 %5293, %v5547_v43  }
 0x139   : > { %9256 = vst [vmem:[#allocation128_spill] sm:$0xff] %v6119_v55 }
 0x13a   : > { %2220 = vperm.xlu0 %5292, %v5562_v50   ;;  %v6123_v4 = vpop.permute.xlu1 %1908 }
 0x13b   : > { %9257 = vst [vmem:[#allocation129_spill] sm:$0xff] %v6123_v4 }
 0x13c   : > { %v6125_v46 = vpop.permute.xlu0 %1912  ;;  %2216 = vperm.xlu1 %5293, %v5558_v48  }
 0x13d   : > { %9258 = vst [vmem:[#allocation130_spill] sm:$0xff] %v6125_v46 }
 0x13e   : > { %2228 = vperm.xlu0 %5292, %v5571_v56   ;;  %v6129_v17 = vpop.permute.xlu1 %1916 }
 0x13f   : > { %9259 = vst [vmem:[#allocation131_spill] sm:$0xff] %v6129_v17 }
 0x140   : > { %v6131_v41 = vpop.permute.xlu0 %1920  ;;  %2224 = vperm.xlu1 %5293, %v5566_v54  }
 0x141   : > { %9260 = vst [vmem:[#allocation132_spill] sm:$0xff] %v6131_v41 }
 0x142   : > { %2236 = vperm.xlu0 %5292, %v5581_v61   ;;  %v6135_v55 = vpop.permute.xlu1 %1924 }
 0x143   : > { %9261 = vst [vmem:[#allocation133_spill] sm:$0xff] %v6135_v55 }
 0x144   : > { %v6137_v13 = vpop.permute.xlu0 %1928  ;;  %2232 = vperm.xlu1 %5293, %v5577_v59  }
 0x145   : > { %9262 = vst [vmem:[#allocation134_spill] sm:$0xff] %v6137_v13 }
 0x146   : > { %2244 = vperm.xlu0 %5292, %v5593_v3   ;;  %v6141_v46 = vpop.permute.xlu1 %1932  ;;  %v5402_v3 = vmov 2  }
 0x147   : > { %9263 = vst [vmem:[#allocation135_spill] sm:$0xff] %v6141_v46 }
 0x148   : > { %v6143_v4 = vpop.permute.xlu0 %1936  ;;  %2240 = vperm.xlu1 %5293, %v5588_v1  }
 0x149   : > { %9264 = vst [vmem:[#allocation136_spill] sm:$0xff] %v6143_v4 }
 0x14a   : > { %2252 = vperm.xlu0 %5292, %v5603_v8   ;;  %v6147_v41 = vpop.permute.xlu1 %1940 }
 0x14b   : > { %9265 = vst [vmem:[#allocation137_spill] sm:$0xff] %v6147_v41 }
 0x14c   : > { %v6149_v17 = vpop.permute.xlu0 %1944  ;;  %2248 = vperm.xlu1 %5293, %v5599_v6  }
 0x14d   : > { %9266 = vst [vmem:[#allocation138_spill] sm:$0xff] %v6149_v17 }
 0x14e   : > { %2260 = vperm.xlu0 %5292, %v5612_v16   ;;  %v6153_v13 = vpop.permute.xlu1 %1948 }
 0x14f   : > { %9267 = vst [vmem:[#allocation139_spill] sm:$0xff] %v6153_v13 }
 0x150   : > { %v6155_v55 = vpop.permute.xlu0 %1952  ;;  %2256 = vperm.xlu1 %5293, %v5607_v14  }
 0x151   : > { %9268 = vst [vmem:[#allocation140_spill] sm:$0xff] %v6155_v55 }
 0x152   : > { %2268 = vperm.xlu0 %5292, %v5622_v24   ;;  %v6159_v4 = vpop.permute.xlu1 %1956 }
 0x153   : > { %9269 = vst [vmem:[#allocation141_spill] sm:$0xff] %v6159_v4 }
 0x154   : > { %v6161_v46 = vpop.permute.xlu0 %1960  ;;  %2264 = vperm.xlu1 %5293, %v5618_v20  }
 0x155   : > { %9270 = vst [vmem:[#allocation142_spill] sm:$0xff] %v6161_v46 }
 0x156   : > { %2276 = vperm.xlu0 %5292, %v5634_v35   ;;  %v6165_v17 = vpop.permute.xlu1 %1964 }
 0x157   : > { %9271 = vst [vmem:[#allocation143_spill] sm:$0xff] %v6165_v17 }
 0x158   : > { %v6167_v41 = vpop.permute.xlu0 %1968  ;;  %2272 = vperm.xlu1 %5293, %v5629_v31  }
 0x159   : > { %9272 = vst [vmem:[#allocation144_spill] sm:$0xff] %v6167_v41 }
 0x15a   : > { %2284 = vperm.xlu0 %5292, %v5644_v42   ;;  %v6171_v55 = vpop.permute.xlu1 %1972 }
 0x15b   : > { %9273 = vst [vmem:[#allocation145_spill] sm:$0xff] %v6171_v55 }
 0x15c   : > { %v6173_v13 = vpop.permute.xlu0 %1976  ;;  %2280 = vperm.xlu1 %5293, %v5640_v40  }
 0x15d   : > { %9274 = vst [vmem:[#allocation146_spill] sm:$0xff] %v6173_v13 }
 0x15e   : > { %2292 = vperm.xlu0 %5292, %v5653_v52   ;;  %v6177_v46 = vpop.permute.xlu1 %1980 }
 0x15f   : > { %9275 = vst [vmem:[#allocation147_spill] sm:$0xff] %v6177_v46 }
 0x160   : > { %v6179_v4 = vpop.permute.xlu0 %1984  ;;  %2288 = vperm.xlu1 %5293, %v5648_v49  }
 0x161   : > { %9276 = vst [vmem:[#allocation148_spill] sm:$0xff] %v6179_v4 }
 0x162   : > { %2300 = vperm.xlu0 %5292, %v5663_v60   ;;  %v6183_v41 = vpop.permute.xlu1 %1988 }
 0x163   : > { %9277 = vst [vmem:[#allocation149_spill] sm:$0xff] %v6183_v41 }
 0x164   : > { %v6185_v17 = vpop.permute.xlu0 %1992  ;;  %2296 = vperm.xlu1 %5293, %v5659_v57  }
 0x165   : > { %9278 = vst [vmem:[#allocation150_spill] sm:$0xff] %v6185_v17 }
 0x166   : > { %2308 = vperm.xlu0 %5292, %v5675_v5   ;;  %v6189_v13 = vpop.permute.xlu1 %1996 }
 0x167   : > { %9279 = vst [vmem:[#allocation151_spill] sm:$0xff] %v6189_v13 }
 0x168   : > { %v6191_v55 = vpop.permute.xlu0 %2000  ;;  %2304 = vperm.xlu1 %5293, %v5670_v2  }
 0x169   : > { %9280 = vst [vmem:[#allocation152_spill] sm:$0xff] %v6191_v55 }
 0x16a   : > { %2316 = vperm.xlu0 %5292, %v5685_v15   ;;  %v6195_v4 = vpop.permute.xlu1 %2004 }
 0x16b   : > { %9281 = vst [vmem:[#allocation153_spill] sm:$0xff] %v6195_v4 }
 0x16c   : > { %v6197_v46 = vpop.permute.xlu0 %2008  ;;  %2312 = vperm.xlu1 %5293, %v5681_v12  }
 0x16d   : > { %9282 = vst [vmem:[#allocation154_spill] sm:$0xff] %v6197_v46 }
 0x16e   : > { %2324 = vperm.xlu0 %5292, %v5694_v30   ;;  %v6201_v17 = vpop.permute.xlu1 %2012 }
 0x16f   : > { %9283 = vst [vmem:[#allocation155_spill] sm:$0xff] %v6201_v17 }
 0x170   : > { %v6203_v41 = vpop.permute.xlu0 %2016  ;;  %2320 = vperm.xlu1 %5293, %v5689_v26  }
 0x171   : > { %9284 = vst [vmem:[#allocation156_spill] sm:$0xff] %v6203_v41 }
 0x172   : > { %2332 = vperm.xlu0 %5292, %v5704_v44   ;;  %v6207_v55 = vpop.permute.xlu1 %2020 }
 0x173   : > { %9285 = vst [vmem:[#allocation157_spill] sm:$0xff] %v6207_v55  ;;  %v9292_v55 = vld [vmem:[#allocation33_spill] sm:$0xff] }
 0x174   : > { %v6209_v13 = vpop.permute.xlu0 %2024  ;;  %2328 = vperm.xlu1 %5293, %v5700_v38  }
 0x175   : > { %9286 = vst [vmem:[#allocation158_spill] sm:$0xff] %v6209_v13 }
 0x176   : > { %2340 = vperm.xlu0 %5292, %v5716_v58   ;;  %v6213_v46 = vpop.permute.xlu1 %2028 }
 0x177   : > { %9287 = vst [vmem:[#allocation159_spill] sm:$0xff] %v6213_v46 }
 0x178   : > { %v6215_v4 = vpop.permute.xlu0 %2032  ;;  %2336 = vperm.xlu1 %5293, %v5711_v53  }
 0x179   : > { %9288 = vst [vmem:[#allocation160_spill] sm:$0xff] %v6215_v4  ;;  %v9296_v4 = vld [vmem:[#allocation35_spill] sm:$0xff] }
 0x17a   : > { %2348 = vperm.xlu0 %5292, %v5726_v7   ;;  %v6219_v41 = vpop.permute.xlu1 %2036 }
 0x17b   : > { %9289 = vst [vmem:[#allocation161_spill] sm:$0xff] %v6219_v41  ;;  %v9299_v41 = vld [vmem:[#allocation34_spill] sm:$0xff] }
 0x17c   : > { %v6221_v17 = vpop.permute.xlu0 %2040  ;;  %2344 = vperm.xlu1 %5293, %v9291_v28  }
 0x17d   : > { %9290 = vst [vmem:[#allocation162_spill] sm:$0xff] %v6221_v17  ;;  %v9300_v17 = vld [vmem:[#allocation37_spill] sm:$0xff] }
 0x17e   : > { %2356 = vperm.xlu0 %5292, %v9292_v55   ;;  %v6225_v13 = vpop.permute.xlu1 %2044 }
 0x17f   : > { %9293 = vst [vmem:[#allocation163_spill] sm:$0xff] %v6225_v13  ;;  %v9303_v13 = vld [vmem:[#allocation36_spill] sm:$0xff] }
 0x180   : > { %v6227_v47 = vpop.permute.xlu0 %2048  ;;  %2352 = vperm.xlu1 %5293, %v9295_v9  }
 0x181   : > { %9294 = vst [vmem:[#allocation164_spill] sm:$0xff] %v6227_v47  ;;  %v9304_v47 = vld [vmem:[#allocation39_spill] sm:$0xff] }
 0x182   : > { %2364 = vperm.xlu0 %5292, %v9296_v4   ;;  %v6231_v46 = vpop.permute.xlu1 %2052 }
 0x183   : > { %9297 = vst [vmem:[#allocation165_spill] sm:$0xff] %v6231_v46  ;;  %v9307_v46 = vld [vmem:[#allocation38_spill] sm:$0xff] }
 0x184   : > { %v6233_v36 = vpop.permute.xlu0 %2056  ;;  %2360 = vperm.xlu1 %5293, %v9299_v41  }
 0x185   : > { %9298 = vst [vmem:[#allocation166_spill] sm:$0xff] %v6233_v36  ;;  %v9308_v36 = vld [vmem:[#allocation41_spill] sm:$0xff] }
 0x186   : > { %2372 = vperm.xlu0 %5292, %v9300_v17   ;;  %v6237_v0 = vpop.permute.xlu1 %2060  ;;  %v9324_v17 = vld [vmem:[#allocation48_spill] sm:$0xff] }
 0x187   : > { %9301 = vst [vmem:[#allocation167_spill] sm:$0xff] %v6237_v0  ;;  %v9311_v0 = vld [vmem:[#allocation40_spill] sm:$0xff] }
 0x188   : > { %v6239_v62 = vpop.permute.xlu0 %2064  ;;  %2368 = vperm.xlu1 %5293, %v9303_v13  }
 0x189   : > { %9302 = vst [vmem:[#allocation168_spill] sm:$0xff] %v6239_v62  ;;  %v9312_v62 = vld [vmem:[#allocation43_spill] sm:$0xff] }
 0x18a   : > { %2380 = vperm.xlu0 %5292, %v9304_v47   ;;  %v6243_v63 = vpop.permute.xlu1 %2068 }
 0x18b   : > { %9305 = vst [vmem:[#allocation169_spill] sm:$0xff] %v6243_v63  ;;  %v9315_v63 = vld [vmem:[#allocation42_spill] sm:$0xff] }
 0x18c   : > { %v6245_v11 = vpop.permute.xlu0 %2072  ;;  %2376 = vperm.xlu1 %5293, %v9307_v46  }
 0x18d   : > { %9306 = vst [vmem:[#allocation170_spill] sm:$0xff] %v6245_v11  ;;  %v9316_v11 = vld [vmem:[#allocation45_spill] sm:$0xff] }
 0x18e   : > { %2388 = vperm.xlu0 %5292, %v9308_v36   ;;  %v6249_v19 = vpop.permute.xlu1 %2076  ;;  %v9319_v36 = vld [vmem:[#allocation44_spill] sm:$0xff] }
 0x18f   : > { %9309 = vst [vmem:[#allocation171_spill] sm:$0xff] %v6249_v19 }
 0x190   : > { %v6252_v21 = vpop.permute.xlu0 %2080  ;;  %2384 = vperm.xlu1 %5293, %v9311_v0  }
 0x191   : > { %9310 = vst [vmem:[#allocation172_spill] sm:$0xff] %v6252_v21  ;;  %v6277_v21 = vld [vmem:[%s6271_s28 + $0x8] sm:$0xff] }
 0x192   : > { %2396 = vperm.xlu0 %5292, %v9312_v62   ;;  %v6256_v51 = vpop.permute.xlu1 %2084  ;;  %v9323_v62 = vld [vmem:[#allocation49_spill] sm:$0xff] }
 0x193   : > { %9313 = vst [vmem:[#allocation173_spill] sm:$0xff] %v6256_v51  ;;  %v9320_v51 = vld [vmem:[#allocation47_spill] sm:$0xff] }
 0x194   : > { %v6259_v10 = vpop.permute.xlu0 %2088  ;;  %2392 = vperm.xlu1 %5293, %v9315_v63  }
 0x195   : > { %9314 = vst [vmem:[#allocation174_spill] sm:$0xff] %v6259_v10 }
 0x196   : > { %2404 = vperm.xlu0 %5292, %v9316_v11   ;;  %v6263_v33 = vpop.permute.xlu1 %2092  ;;  %v9322_v11 = vld [vmem:[#allocation46_spill] sm:$0xff] }
 0x197   : > { %9317 = vst [vmem:[#allocation175_spill] sm:$0xff] %v6263_v33 }
 0x198   : > { %v6265_v19 = vpop.permute.xlu0 %2096  ;;  %2400 = vperm.xlu1 %5293, %v9319_v36   ;;  %v6283_v36 = vld [vmem:[%s6271_s28] sm:$0xff] }
 0x199   : > { %9318 = vst [vmem:[#allocation176_spill] sm:$0xff] %v6265_v19 }
 0x19a   : > { %2412 = vperm.xlu0 %5292, %v9320_v51   ;;  %v6274_v10 = vpop.permute.xlu1 %2100 }
 0x19b   : > { %9321 = vst [vmem:[#allocation177_spill] sm:$0xff] %v6274_v10 }
 0x19c   : > { %2408 = vperm.xlu1 %5293, %v9322_v11  }
 0x19d   : > { %v2169_v33 = vpop.permute.xlu0 %2168 }
 0x19e   : > { %v2424_v19 = vmul.f32 %v2169_v33, %v6277_v21  ;;  %2420 = vperm.xlu0 %5292, %v9323_v62   ;;  %v2423_v63 = vmul.f32 %v2169_v33, %v6283_v36 }
 0x19f   : > { %v2173_v47 = vpop.permute.xlu1 %2172 }
 0x1a0   : > { %2416 = vperm.xlu1 %5293, %v9324_v17   ;;  %v2426_v51 = vmul.f32 %v2173_v47, %v6277_v21  ;;  %v2425_v4 = vmul.f32 %v2173_v47, %v6283_v36 }
 0x1a1   : > { %v2181_v0 = vpop.permute.xlu0 %2180 }
 0x1a2   : > { %2681 = vrot.lane.b32.xlu0 %v2424_v19, %s5401_s29  ;;  %v2430_v55 = vmul.f32 %v2181_v0, %v6277_v21  ;;  %v2429_v47 = vmul.f32 %v2181_v0, %v6283_v36 }
 0x1a3   : > { %v2177_v10 = vpop.permute.xlu1 %2176  ;;  %5295 = vset.pattern.permute.xlu0 %v5402_v3 }
 0x1a4   : > { %2679 = vrot.lane.b32.xlu1 %v2423_v63, %s5401_s29  ;;  %v2428_v46 = vmul.f32 %v2177_v10, %v6277_v21  ;;  %v2427_v17 = vmul.f32 %v2177_v10, %v6283_v36 }
 0x1a5   : > { %v2189_v11 = vpop.permute.xlu0 %2188  ;;  %5294 = vset.pattern.permute.xlu1 %v5402_v3 }
 0x1a6   : > { %2685 = vrot.lane.b32.xlu0 %v2426_v51, %s5401_s29  ;;  %v2434_v7 = vmul.f32 %v2189_v11, %v6277_v21  ;;  %v2433_v0 = vmul.f32 %v2189_v11, %v6283_v36 }
 0x1a7   : > { %v2185_v62 = vpop.permute.xlu1 %2184 }
 0x1a8   : > { %2683 = vrot.lane.b32.xlu1 %v2425_v4, %s5401_s29  ;;  %v2432_v13 = vmul.f32 %v2185_v62, %v6277_v21  ;;  %v2431_v10 = vmul.f32 %v2185_v62, %v6283_v36 }
 0x1a9   : > { %v2197_v33 = vpop.permute.xlu0 %2196 }
 0x1aa   : > { %2689 = vrot.lane.b32.xlu0 %v2428_v46, %s5401_s29  ;;  %v2438_v58 = vmul.f32 %v2197_v33, %v6277_v21  ;;  %v2437_v11 = vmul.f32 %v2197_v33, %v6283_v36 }
 0x1ab   : > { %v2193_v19 = vpop.permute.xlu1 %2192 }
 0x1ac   : > { %2687 = vrot.lane.b32.xlu1 %v2427_v17, %s5401_s29  ;;  %v2436_v41 = vmul.f32 %v2193_v19, %v6277_v21  ;;  %v2435_v62 = vmul.f32 %v2193_v19, %v6283_v36 }
 0x1ad   : > { %v2205_v63 = vpop.permute.xlu0 %2204 }
 0x1ae   : > { %2693 = vrot.lane.b32.xlu0 %v2430_v55, %s5401_s29  ;;  %v2442_v44 = vmul.f32 %v2205_v63, %v6277_v21 }
 0x1af   : > { %v2201_v51 = vpop.permute.xlu1 %2200 }
 0x1b0   : > { %2691 = vrot.lane.b32.xlu1 %v2429_v47, %s5401_s29  ;;  %v2440_v9 = vmul.f32 %v2201_v51, %v6277_v21  ;;  %v2439_v19 = vmul.f32 %v2201_v51, %v6283_v36 }
 0x1b1   : > { %v2213_v4 = vpop.permute.xlu0 %2212 }
 0x1b2   : > { %2697 = vrot.lane.b32.xlu0 %v2432_v13, %s5401_s29 }
 0x1b3   : > { %v2209_v46 = vpop.permute.xlu1 %2208 }
 0x1b4   : > { %2695 = vrot.lane.b32.xlu1 %v2431_v10, %s5401_s29 }
 0x1b5   : > { %v2221_v17 = vpop.permute.xlu0 %2220 }
 0x1b6   : > { %2701 = vrot.lane.b32.xlu0 %v2434_v7, %s5401_s29 }
 0x1b7   : > { %v2217_v55 = vpop.permute.xlu1 %2216 }
 0x1b8   : > { %2699 = vrot.lane.b32.xlu1 %v2433_v0, %s5401_s29 }
 0x1b9   : > { %v2229_v47 = vpop.permute.xlu0 %2228 }
 0x1ba   : > { %2705 = vrot.lane.b32.xlu0 %v2436_v41, %s5401_s29 }
 0x1bb   : > { %v2225_v13 = vpop.permute.xlu1 %2224 }
 0x1bc   : > { %2703 = vrot.lane.b32.xlu1 %v2435_v62, %s5401_s29 }
 0x1bd   : > { %v2237_v10 = vpop.permute.xlu0 %2236 }
 0x1be   : > { %2709 = vrot.lane.b32.xlu0 %v2438_v58, %s5401_s29  ;;  %v2441_v58 = vmul.f32 %v2205_v63, %v6283_v36 }
 0x1bf   : > { %v2233_v7 = vpop.permute.xlu1 %2232 }
 0x1c0   : > { %2707 = vrot.lane.b32.xlu1 %v2437_v11, %s5401_s29  ;;  %v2444_v11 = vmul.f32 %v2209_v46, %v6277_v21 }
 0x1c1   : > { %v6318_v0 = vpop.permute.xlu0 %2244 }
 0x1c2   : > { %2713 = vrot.lane.b32.xlu0 %v2440_v9, %s5401_s29  ;;  %v2443_v9 = vmul.f32 %v2209_v46, %v6283_v36 }
 0x1c3   : > { %v2241_v41 = vpop.permute.xlu1 %2240 }
 0x1c4   : > { %2711 = vrot.lane.b32.xlu1 %v2439_v19, %s5401_s29  ;;  %v2446_v19 = vmul.f32 %v2213_v4, %v6277_v21 }
 0x1c5   : > { %v6324_v62 = vpop.permute.xlu0 %2252 }
 0x1c6   : > { %2717 = vrot.lane.b32.xlu0 %v2442_v44, %s5401_s29  ;;  %v2445_v44 = vmul.f32 %v2213_v4, %v6283_v36  ;;  %v2465_v2 = vmul.f32 %v6324_v62, %v6283_v36 }
 0x1c7   : > { %v6328_v33 = vpop.permute.xlu1 %2248 }
 0x1c8   : > { %2715 = vrot.lane.b32.xlu1 %v2441_v58, %s5401_s29  ;;  %v2448_v58 = vmul.f32 %v2217_v55, %v6277_v21  ;;  %v2463_v52 = vmul.f32 %v6328_v33, %v6283_v36 }
 0x1c9   : > { %v6332_v51 = vpop.permute.xlu0 %2260 }
 0x1ca   : > { %2721 = vrot.lane.b32.xlu0 %v2444_v11, %s5401_s29  ;;  %v2447_v11 = vmul.f32 %v2217_v55, %v6283_v36  ;;  %v2469_v57 = vmul.f32 %v6332_v51, %v6283_v36 }
 0x1cb   : > { %v6336_v28 = vpop.permute.xlu1 %2256 }
 0x1cc   : > { %2719 = vrot.lane.b32.xlu1 %v2443_v9, %s5401_s29  ;;  %v2450_v9 = vmul.f32 %v2221_v17, %v6277_v21  ;;  %v2467_v42 = vmul.f32 %v6336_v28, %v6283_v36 }
 0x1cd   : > { %v6340_v63 = vpop.permute.xlu0 %2268 }
 0x1ce   : > { %2725 = vrot.lane.b32.xlu0 %v2446_v19, %s5401_s29  ;;  %v2449_v19 = vmul.f32 %v2221_v17, %v6283_v36  ;;  %v2473_v49 = vmul.f32 %v6340_v63, %v6283_v36 }
 0x1cf   : > { %v6344_v30 = vpop.permute.xlu1 %2264 }
 0x1d0   : > { %2723 = vrot.lane.b32.xlu1 %v2445_v44, %s5401_s29  ;;  %v2452_v44 = vmul.f32 %v2225_v13, %v6277_v21  ;;  %v2471_v35 = vmul.f32 %v6344_v30, %v6283_v36 }
 0x1d1   : > { %v6348_v46 = vpop.permute.xlu0 %2276 }
 0x1d2   : > { %2729 = vrot.lane.b32.xlu0 %v2448_v58, %s5401_s29  ;;  %v2451_v58 = vmul.f32 %v2225_v13, %v6283_v36  ;;  %v2477_v40 = vmul.f32 %v6348_v46, %v6283_v36 }
 0x1d3   : > { %v6352_v53 = vpop.permute.xlu1 %2272 }
 0x1d4   : > { %2727 = vrot.lane.b32.xlu1 %v2447_v11, %s5401_s29  ;;  %v2454_v11 = vmul.f32 %v2229_v47, %v6277_v21  ;;  %v2475_v24 = vmul.f32 %v6352_v53, %v6283_v36 }
 0x1d5   : > { %v6356_v4 = vpop.permute.xlu0 %2284 }
 0x1d6   : > { %2733 = vrot.lane.b32.xlu0 %v2450_v9, %s5401_s29  ;;  %v2453_v9 = vmul.f32 %v2229_v47, %v6283_v36  ;;  %v2481_v31 = vmul.f32 %v6356_v4, %v6283_v36 }
 0x1d7   : > { %v6360_v15 = vpop.permute.xlu1 %2280 }
 0x1d8   : > { %2731 = vrot.lane.b32.xlu1 %v2449_v19, %s5401_s29  ;;  %v2456_v19 = vmul.f32 %v2233_v7, %v6277_v21  ;;  %v2479_v16 = vmul.f32 %v6360_v15, %v6283_v36 }
 0x1d9   : > { %v6364_v55 = vpop.permute.xlu0 %2292 }
 0x1da   : > { %2737 = vrot.lane.b32.xlu0 %v2452_v44, %s5401_s29  ;;  %v2455_v44 = vmul.f32 %v2233_v7, %v6283_v36  ;;  %v2485_v20 = vmul.f32 %v6364_v55, %v6283_v36 }
 0x1db   : > { %v6368_v38 = vpop.permute.xlu1 %2288 }
 0x1dc   : > { %2735 = vrot.lane.b32.xlu1 %v2451_v58, %s5401_s29  ;;  %v2458_v58 = vmul.f32 %v2237_v10, %v6277_v21  ;;  %v2483_v8 = vmul.f32 %v6368_v38, %v6283_v36 }
 0x1dd   : > { %v6372_v17 = vpop.permute.xlu0 %2300 }
 0x1de   : > { %2741 = vrot.lane.b32.xlu0 %v2454_v11, %s5401_s29  ;;  %v2457_v11 = vmul.f32 %v2237_v10, %v6283_v36 }
 0x1df   : > { %v6376_v5 = vpop.permute.xlu1 %2296 }
 0x1e0   : > { %2739 = vrot.lane.b32.xlu1 %v2453_v9, %s5401_s29  ;;  %v2460_v9 = vmul.f32 %v2241_v41, %v6277_v21 }
 0x1e1   : > { %v6380_v13 = vpop.permute.xlu0 %2308 }
 0x1e2   : > { %2745 = vrot.lane.b32.xlu0 %v2456_v19, %s5401_s29  ;;  %v2459_v19 = vmul.f32 %v2241_v41, %v6283_v36  ;;  %v2464_v41 = vmul.f32 %v6328_v33, %v6277_v21  ;;  %v2468_v33 = vmul.f32 %v6336_v28, %v6277_v21  ;;  %v2472_v28 = vmul.f32 %v6344_v30, %v6277_v21 }
 0x1e3   : > { %v6384_v26 = vpop.permute.xlu1 %2304  ;;  %v2476_v30 = vmul.f32 %v6352_v53, %v6277_v21  ;;  %v2480_v53 = vmul.f32 %v6360_v15, %v6277_v21  ;;  %v2484_v15 = vmul.f32 %v6368_v38, %v6277_v21  ;;  %v2488_v38 = vmul.f32 %v6376_v5, %v6277_v21 }
 0x1e4   : > { %2743 = vrot.lane.b32.xlu1 %v2455_v44, %s5401_s29  ;;  %v2462_v44 = vmul.f32 %v6318_v0, %v6277_v21 }
 0x1e5   : > { %v6388_v47 = vpop.permute.xlu0 %2316 }
 0x1e6   : > { %2749 = vrot.lane.b32.xlu0 %v2458_v58, %s5401_s29  ;;  %v2461_v58 = vmul.f32 %v6318_v0, %v6283_v36  ;;  %v2466_v0 = vmul.f32 %v6324_v62, %v6277_v21  ;;  %v2470_v62 = vmul.f32 %v6332_v51, %v6277_v21  ;;  %v2474_v51 = vmul.f32 %v6340_v63, %v6277_v21 }
 0x1e7   : > { %v6392_v60 = vpop.permute.xlu1 %2312  ;;  %v2478_v63 = vmul.f32 %v6348_v46, %v6277_v21  ;;  %v2482_v46 = vmul.f32 %v6356_v4, %v6277_v21  ;;  %v2486_v4 = vmul.f32 %v6364_v55, %v6277_v21 }
 0x1e8   : > { %2747 = vrot.lane.b32.xlu1 %v2457_v11, %s5401_s29 }
 0x1e9   : > { %v6396_v7 = vpop.permute.xlu0 %2324 }
 0x1ea   : > { %2753 = vrot.lane.b32.xlu0 %v2460_v9, %s5401_s29 }
 0x1eb   : > { %v6400_v12 = vpop.permute.xlu1 %2320 }
 0x1ec   : > { %2751 = vrot.lane.b32.xlu1 %v2459_v19, %s5401_s29 }
 0x1ed   : > { %v6405_v10 = vpop.permute.xlu0 %2332 }
 0x1ee   : > { %2757 = vrot.lane.b32.xlu0 %v2462_v44, %s5401_s29 }
 0x1ef   : > { %v6410_v11 = vpop.permute.xlu1 %2328 }
 0x1f0   : > { %2755 = vrot.lane.b32.xlu1 %v2461_v58, %s5401_s29 }
 0x1f1   : > { %v6415_v9 = vpop.permute.xlu0 %2340 }
 0x1f2   : > { %2761 = vrot.lane.b32.xlu0 %v2464_v41, %s5401_s29 }
 0x1f3   : > { %v6420_v19 = vpop.permute.xlu1 %2336 }
 0x1f4   : > { %2759 = vrot.lane.b32.xlu1 %v2463_v52, %s5401_s29 }
 0x1f5   : > { %v6425_v44 = vpop.permute.xlu0 %2348 }
 0x1f6   : > { %2765 = vrot.lane.b32.xlu0 %v2466_v0, %s5401_s29 }
 0x1f7   : > { %v6430_v58 = vpop.permute.xlu1 %2344 }
 0x1f8   : > { %2763 = vrot.lane.b32.xlu1 %v2465_v2, %s5401_s29 }
 0x1f9   : > { %v6435_v41 = vpop.permute.xlu0 %2356 }
 0x1fa   : > { %2769 = vrot.lane.b32.xlu0 %v2468_v33, %s5401_s29 }
 0x1fb   : > { %v6440_v52 = vpop.permute.xlu1 %2352 }
 0x1fc   : > { %2767 = vrot.lane.b32.xlu1 %v2467_v42, %s5401_s29 }
 0x1fd   : > { %v6445_v0 = vpop.permute.xlu0 %2364 }
 0x1fe   : > { %2773 = vrot.lane.b32.xlu0 %v2470_v62, %s5401_s29 }
 0x1ff   : > { %v6450_v2 = vpop.permute.xlu1 %2360 }
 0x200   : > { %2771 = vrot.lane.b32.xlu1 %v2469_v57, %s5401_s29 }
 0x201   : > { %v6455_v33 = vpop.permute.xlu0 %2372 }
 0x202   : > { %2777 = vrot.lane.b32.xlu0 %v2472_v28, %s5401_s29 }
 0x203   : > { %v6460_v42 = vpop.permute.xlu1 %2368 }
 0x204   : > { %2775 = vrot.lane.b32.xlu1 %v2471_v35, %s5401_s29 }
 0x205   : > { %v6465_v62 = vpop.permute.xlu0 %2380 }
 0x206   : > { %2781 = vrot.lane.b32.xlu0 %v2474_v51, %s5401_s29 }
 0x207   : > { %v6470_v57 = vpop.permute.xlu1 %2376 }
 0x208   : > { %2779 = vrot.lane.b32.xlu1 %v2473_v49, %s5401_s29 }
 0x209   : > { %v6475_v28 = vpop.permute.xlu0 %2388 }
 0x20a   : > { %2785 = vrot.lane.b32.xlu0 %v2476_v30, %s5401_s29 }
 0x20b   : > { %v6480_v35 = vpop.permute.xlu1 %2384 }
 0x20c   : > { %2783 = vrot.lane.b32.xlu1 %v2475_v24, %s5401_s29 }
 0x20d   : > { %v6485_v51 = vpop.permute.xlu0 %2396 }
 0x20e   : > { %2789 = vrot.lane.b32.xlu0 %v2478_v63, %s5401_s29 }
 0x20f   : > { %v6490_v49 = vpop.permute.xlu1 %2392 }
 0x210   : > { %2787 = vrot.lane.b32.xlu1 %v2477_v40, %s5401_s29 }
 0x211   : > { %v6495_v30 = vpop.permute.xlu0 %2404 }
 0x212   : > { %2793 = vrot.lane.b32.xlu0 %v2480_v53, %s5401_s29 }
 0x213   : > { %v6500_v24 = vpop.permute.xlu1 %2400 }
 0x214   : > { %2791 = vrot.lane.b32.xlu1 %v2479_v16, %s5401_s29 }
 0x215   : > { %v6505_v63 = vpop.permute.xlu0 %2412 }
 0x216   : > { %2797 = vrot.lane.b32.xlu0 %v2482_v46, %s5401_s29 }
 0x217   : > { %v6510_v40 = vpop.permute.xlu1 %2408 }
 0x218   : > { %2795 = vrot.lane.b32.xlu1 %v2481_v31, %s5401_s29 }
 0x219   : > { %v6515_v53 = vpop.permute.xlu0 %2420 }
 0x21a   : > { %2801 = vrot.lane.b32.xlu0 %v2484_v15, %s5401_s29 }
 0x21b   : > { %v6520_v16 = vpop.permute.xlu1 %2416 }
 0x21c   : > { %2799 = vrot.lane.b32.xlu1 %v2483_v8, %s5401_s29  ;;  %v2487_v8 = vmul.f32 %v6376_v5, %v6283_v36  ;;  %v2492_v5 = vmul.f32 %v6384_v26, %v6277_v21 }
 0x21d   : > { %v6525_v46 = vpop.permute.xlu0 %2681 }
 0x21e   : > { %9325 = vst [vmem:[#allocation178_spill] sm:$0xff] %v6525_v46  ;;  %2805 = vrot.lane.b32.xlu0 %v2486_v4, %s5401_s29  ;;  %v2490_v4 = vmul.f32 %v6372_v17, %v6277_v21  ;;  %v9487_v46 = vld [vmem:[#allocation46_spill] sm:$0xff] }
 0x21f   : > { %v6530_v31 = vpop.permute.xlu1 %2679 }
 0x220   : > { %9326 = vst [vmem:[#allocation179_spill] sm:$0xff] %v6530_v31  ;;  %2803 = vrot.lane.b32.xlu1 %v2485_v20, %s5401_s29  ;;  %v2489_v20 = vmul.f32 %v6372_v17, %v6283_v36  ;;  %v2494_v17 = vmul.f32 %v6380_v13, %v6277_v21 }
 0x221   : > { %v6535_v15 = vpop.permute.xlu0 %2685 }
 0x222   : > { %9327 = vst [vmem:[#allocation180_spill] sm:$0xff] %v6535_v15  ;;  %2809 = vrot.lane.b32.xlu0 %v2488_v38, %s5401_s29  ;;  %v9485_v15 = vld [vmem:[#allocation41_spill] sm:$0xff] }
 0x223   : > { %v6540_v55 = vpop.permute.xlu1 %2683 }
 0x224   : > { %9328 = vst [vmem:[#allocation181_spill] sm:$0xff] %v6540_v55  ;;  %2807 = vrot.lane.b32.xlu1 %v2487_v8, %s5401_s29  ;;  %v2491_v55 = vmul.f32 %v6384_v26, %v6283_v36  ;;  %v2496_v26 = vmul.f32 %v6392_v60, %v6277_v21 }
 0x225   : > { %v6545_v31 = vpop.permute.xlu0 %2689 }
 0x226   : > { %9329 = vst [vmem:[#allocation182_spill] sm:$0xff] %v6545_v31  ;;  %2813 = vrot.lane.b32.xlu0 %v2490_v4, %s5401_s29  ;;  %v9483_v31 = vld [vmem:[#allocation44_spill] sm:$0xff] }
 0x227   : > { %v6550_v3 = vpop.permute.xlu1 %2687 }
 0x228   : > { %9330 = vst [vmem:[#allocation183_spill] sm:$0xff] %v6550_v3  ;;  %2811 = vrot.lane.b32.xlu1 %v2489_v20, %s5401_s29  ;;  %v2493_v3 = vmul.f32 %v6380_v13, %v6283_v36  ;;  %v2498_v13 = vmul.f32 %v6388_v47, %v6277_v21 }
 0x229   : > { %v6555_v38 = vpop.permute.xlu0 %2693 }
 0x22a   : > { %9331 = vst [vmem:[#allocation184_spill] sm:$0xff] %v6555_v38  ;;  %2817 = vrot.lane.b32.xlu0 %v2492_v5, %s5401_s29 }
 0x22b   : > { %v6560_v8 = vpop.permute.xlu1 %2691 }
 0x22c   : > { %9332 = vst [vmem:[#allocation185_spill] sm:$0xff] %v6560_v8  ;;  %2815 = vrot.lane.b32.xlu1 %v2491_v55, %s5401_s29  ;;  %v2495_v8 = vmul.f32 %v6392_v60, %v6283_v36  ;;  %v2500_v60 = vmul.f32 %v6400_v12, %v6277_v21 }
 0x22d   : > { %v6565_v4 = vpop.permute.xlu0 %2697 }
 0x22e   : > { %9333 = vst [vmem:[#allocation186_spill] sm:$0xff] %v6565_v4  ;;  %2821 = vrot.lane.b32.xlu0 %v2494_v17, %s5401_s29 }
 0x22f   : > { %v6570_v20 = vpop.permute.xlu1 %2695 }
 0x230   : > { %9334 = vst [vmem:[#allocation187_spill] sm:$0xff] %v6570_v20  ;;  %2819 = vrot.lane.b32.xlu1 %v2493_v3, %s5401_s29  ;;  %v2497_v20 = vmul.f32 %v6388_v47, %v6283_v36  ;;  %v2502_v47 = vmul.f32 %v6396_v7, %v6277_v21 }
 0x231   : > { %v6575_v5 = vpop.permute.xlu0 %2701 }
 0x232   : > { %9335 = vst [vmem:[#allocation188_spill] sm:$0xff] %v6575_v5  ;;  %2825 = vrot.lane.b32.xlu0 %v2496_v26, %s5401_s29 }
 0x233   : > { %v6580_v55 = vpop.permute.xlu1 %2699 }
 0x234   : > { %9336 = vst [vmem:[#allocation189_spill] sm:$0xff] %v6580_v55  ;;  %2823 = vrot.lane.b32.xlu1 %v2495_v8, %s5401_s29  ;;  %v2499_v55 = vmul.f32 %v6400_v12, %v6283_v36  ;;  %v2504_v12 = vmul.f32 %v6410_v11, %v6277_v21 }
 0x235   : > { %v6585_v17 = vpop.permute.xlu0 %2705 }
 0x236   : > { %9337 = vst [vmem:[#allocation190_spill] sm:$0xff] %v6585_v17  ;;  %2829 = vrot.lane.b32.xlu0 %v2498_v13, %s5401_s29 }
 0x237   : > { %v6590_v3 = vpop.permute.xlu1 %2703 }
 0x238   : > { %9338 = vst [vmem:[#allocation191_spill] sm:$0xff] %v6590_v3  ;;  %2827 = vrot.lane.b32.xlu1 %v2497_v20, %s5401_s29  ;;  %v2501_v3 = vmul.f32 %v6396_v7, %v6283_v36  ;;  %v2506_v7 = vmul.f32 %v6405_v10, %v6277_v21 }
 0x239   : > { %v6595_v26 = vpop.permute.xlu0 %2709 }
 0x23a   : > { %9339 = vst [vmem:[#allocation192_spill] sm:$0xff] %v6595_v26  ;;  %2833 = vrot.lane.b32.xlu0 %v2500_v60, %s5401_s29 }
 0x23b   : > { %v6600_v8 = vpop.permute.xlu1 %2707 }
 0x23c   : > { %9340 = vst [vmem:[#allocation193_spill] sm:$0xff] %v6600_v8  ;;  %2831 = vrot.lane.b32.xlu1 %v2499_v55, %s5401_s29  ;;  %v2503_v8 = vmul.f32 %v6410_v11, %v6283_v36  ;;  %v2508_v11 = vmul.f32 %v6420_v19, %v6277_v21 }
 0x23d   : > { %v6605_v13 = vpop.permute.xlu0 %2713 }
 0x23e   : > { %9341 = vst [vmem:[#allocation194_spill] sm:$0xff] %v6605_v13  ;;  %2837 = vrot.lane.b32.xlu0 %v2502_v47, %s5401_s29 }
 0x23f   : > { %v6610_v20 = vpop.permute.xlu1 %2711 }
 0x240   : > { %9342 = vst [vmem:[#allocation195_spill] sm:$0xff] %v6610_v20  ;;  %2835 = vrot.lane.b32.xlu1 %v2501_v3, %s5401_s29  ;;  %v2505_v20 = vmul.f32 %v6405_v10, %v6283_v36  ;;  %v2510_v10 = vmul.f32 %v6415_v9, %v6277_v21 }
 0x241   : > { %v6615_v60 = vpop.permute.xlu0 %2717 }
 0x242   : > { %9343 = vst [vmem:[#allocation196_spill] sm:$0xff] %v6615_v60  ;;  %2841 = vrot.lane.b32.xlu0 %v2504_v12, %s5401_s29 }
 0x243   : > { %v6620_v55 = vpop.permute.xlu1 %2715 }
 0x244   : > { %9344 = vst [vmem:[#allocation197_spill] sm:$0xff] %v6620_v55  ;;  %2839 = vrot.lane.b32.xlu1 %v2503_v8, %s5401_s29  ;;  %v2507_v55 = vmul.f32 %v6420_v19, %v6283_v36  ;;  %v2512_v19 = vmul.f32 %v6430_v58, %v6277_v21 }
 0x245   : > { %v6625_v47 = vpop.permute.xlu0 %2721 }
 0x246   : > { %9345 = vst [vmem:[#allocation198_spill] sm:$0xff] %v6625_v47  ;;  %2845 = vrot.lane.b32.xlu0 %v2506_v7, %s5401_s29 }
 0x247   : > { %v6630_v3 = vpop.permute.xlu1 %2719 }
 0x248   : > { %9346 = vst [vmem:[#allocation199_spill] sm:$0xff] %v6630_v3  ;;  %2843 = vrot.lane.b32.xlu1 %v2505_v20, %s5401_s29  ;;  %v2509_v3 = vmul.f32 %v6415_v9, %v6283_v36  ;;  %v2514_v9 = vmul.f32 %v6425_v44, %v6277_v21 }
 0x249   : > { %v6635_v12 = vpop.permute.xlu0 %2725 }
 0x24a   : > { %9347 = vst [vmem:[#allocation200_spill] sm:$0xff] %v6635_v12  ;;  %2849 = vrot.lane.b32.xlu0 %v2508_v11, %s5401_s29 }
 0x24b   : > { %v6640_v8 = vpop.permute.xlu1 %2723 }
 0x24c   : > { %9348 = vst [vmem:[#allocation201_spill] sm:$0xff] %v6640_v8  ;;  %2847 = vrot.lane.b32.xlu1 %v2507_v55, %s5401_s29  ;;  %v2511_v8 = vmul.f32 %v6430_v58, %v6283_v36  ;;  %v2516_v58 = vmul.f32 %v6440_v52, %v6277_v21 }
 0x24d   : > { %v6645_v7 = vpop.permute.xlu0 %2729 }
 0x24e   : > { %9349 = vst [vmem:[#allocation202_spill] sm:$0xff] %v6645_v7  ;;  %2853 = vrot.lane.b32.xlu0 %v2510_v10, %s5401_s29 }
 0x24f   : > { %v6650_v20 = vpop.permute.xlu1 %2727 }
 0x250   : > { %9350 = vst [vmem:[#allocation203_spill] sm:$0xff] %v6650_v20  ;;  %2851 = vrot.lane.b32.xlu1 %v2509_v3, %s5401_s29  ;;  %v2513_v20 = vmul.f32 %v6425_v44, %v6283_v36  ;;  %v2518_v44 = vmul.f32 %v6435_v41, %v6277_v21 }
 0x251   : > { %v6655_v11 = vpop.permute.xlu0 %2733 }
 0x252   : > { %9351 = vst [vmem:[#allocation204_spill] sm:$0xff] %v6655_v11  ;;  %2857 = vrot.lane.b32.xlu0 %v2512_v19, %s5401_s29 }
 0x253   : > { %v6660_v55 = vpop.permute.xlu1 %2731 }
 0x254   : > { %9352 = vst [vmem:[#allocation205_spill] sm:$0xff] %v6660_v55  ;;  %2855 = vrot.lane.b32.xlu1 %v2511_v8, %s5401_s29  ;;  %v2515_v55 = vmul.f32 %v6440_v52, %v6283_v36  ;;  %v2520_v52 = vmul.f32 %v6450_v2, %v6277_v21 }
 0x255   : > { %v6665_v10 = vpop.permute.xlu0 %2737 }
 0x256   : > { %9353 = vst [vmem:[#allocation206_spill] sm:$0xff] %v6665_v10  ;;  %2861 = vrot.lane.b32.xlu0 %v2514_v9, %s5401_s29 }
 0x257   : > { %v6670_v3 = vpop.permute.xlu1 %2735 }
 0x258   : > { %9354 = vst [vmem:[#allocation207_spill] sm:$0xff] %v6670_v3  ;;  %2859 = vrot.lane.b32.xlu1 %v2513_v20, %s5401_s29  ;;  %v2517_v3 = vmul.f32 %v6435_v41, %v6283_v36  ;;  %v2522_v41 = vmul.f32 %v6445_v0, %v6277_v21 }
 0x259   : > { %v6675_v19 = vpop.permute.xlu0 %2741 }
 0x25a   : > { %9355 = vst [vmem:[#allocation208_spill] sm:$0xff] %v6675_v19  ;;  %2865 = vrot.lane.b32.xlu0 %v2516_v58, %s5401_s29 }
 0x25b   : > { %v6680_v8 = vpop.permute.xlu1 %2739 }
 0x25c   : > { %9356 = vst [vmem:[#allocation209_spill] sm:$0xff] %v6680_v8  ;;  %2863 = vrot.lane.b32.xlu1 %v2515_v55, %s5401_s29  ;;  %v2519_v8 = vmul.f32 %v6450_v2, %v6283_v36  ;;  %v2524_v2 = vmul.f32 %v6460_v42, %v6277_v21 }
 0x25d   : > { %v6685_v9 = vpop.permute.xlu0 %2745 }
 0x25e   : > { %9357 = vst [vmem:[#allocation210_spill] sm:$0xff] %v6685_v9  ;;  %2869 = vrot.lane.b32.xlu0 %v2518_v44, %s5401_s29 }
 0x25f   : > { %v6690_v20 = vpop.permute.xlu1 %2743 }
 0x260   : > { %9358 = vst [vmem:[#allocation211_spill] sm:$0xff] %v6690_v20  ;;  %2867 = vrot.lane.b32.xlu1 %v2517_v3, %s5401_s29  ;;  %v2521_v20 = vmul.f32 %v6445_v0, %v6283_v36  ;;  %v2526_v0 = vmul.f32 %v6455_v33, %v6277_v21 }
 0x261   : > { %v6695_v58 = vpop.permute.xlu0 %2749 }
 0x262   : > { %9359 = vst [vmem:[#allocation212_spill] sm:$0xff] %v6695_v58  ;;  %2873 = vrot.lane.b32.xlu0 %v2520_v52, %s5401_s29 }
 0x263   : > { %v6700_v55 = vpop.permute.xlu1 %2747 }
 0x264   : > { %9360 = vst [vmem:[#allocation213_spill] sm:$0xff] %v6700_v55  ;;  %2871 = vrot.lane.b32.xlu1 %v2519_v8, %s5401_s29  ;;  %v2523_v55 = vmul.f32 %v6460_v42, %v6283_v36  ;;  %v2528_v42 = vmul.f32 %v6470_v57, %v6277_v21 }
 0x265   : > { %v6705_v44 = vpop.permute.xlu0 %2753 }
 0x266   : > { %9361 = vst [vmem:[#allocation214_spill] sm:$0xff] %v6705_v44  ;;  %2877 = vrot.lane.b32.xlu0 %v2522_v41, %s5401_s29 }
 0x267   : > { %v6710_v3 = vpop.permute.xlu1 %2751 }
 0x268   : > { %9362 = vst [vmem:[#allocation215_spill] sm:$0xff] %v6710_v3  ;;  %2875 = vrot.lane.b32.xlu1 %v2521_v20, %s5401_s29  ;;  %v2525_v3 = vmul.f32 %v6455_v33, %v6283_v36  ;;  %v2530_v33 = vmul.f32 %v6465_v62, %v6277_v21 }
 0x269   : > { %v6715_v52 = vpop.permute.xlu0 %2757 }
 0x26a   : > { %9363 = vst [vmem:[#allocation216_spill] sm:$0xff] %v6715_v52  ;;  %2881 = vrot.lane.b32.xlu0 %v2524_v2, %s5401_s29 }
 0x26b   : > { %v6720_v8 = vpop.permute.xlu1 %2755 }
 0x26c   : > { %9364 = vst [vmem:[#allocation217_spill] sm:$0xff] %v6720_v8  ;;  %2879 = vrot.lane.b32.xlu1 %v2523_v55, %s5401_s29  ;;  %v2527_v8 = vmul.f32 %v6470_v57, %v6283_v36  ;;  %v2532_v57 = vmul.f32 %v6480_v35, %v6277_v21 }
 0x26d   : > { %v6725_v41 = vpop.permute.xlu0 %2761 }
 0x26e   : > { %9365 = vst [vmem:[#allocation218_spill] sm:$0xff] %v6725_v41  ;;  %2885 = vrot.lane.b32.xlu0 %v2526_v0, %s5401_s29 }
 0x26f   : > { %v6730_v20 = vpop.permute.xlu1 %2759 }
 0x270   : > { %9366 = vst [vmem:[#allocation219_spill] sm:$0xff] %v6730_v20  ;;  %2883 = vrot.lane.b32.xlu1 %v2525_v3, %s5401_s29  ;;  %v2529_v20 = vmul.f32 %v6465_v62, %v6283_v36  ;;  %v2534_v62 = vmul.f32 %v6475_v28, %v6277_v21 }
 0x271   : > { %v6735_v2 = vpop.permute.xlu0 %2765 }
 0x272   : > { %9367 = vst [vmem:[#allocation220_spill] sm:$0xff] %v6735_v2  ;;  %2889 = vrot.lane.b32.xlu0 %v2528_v42, %s5401_s29 }
 0x273   : > { %v6740_v55 = vpop.permute.xlu1 %2763 }
 0x274   : > { %9368 = vst [vmem:[#allocation221_spill] sm:$0xff] %v6740_v55  ;;  %2887 = vrot.lane.b32.xlu1 %v2527_v8, %s5401_s29  ;;  %v2531_v55 = vmul.f32 %v6480_v35, %v6283_v36  ;;  %v2536_v35 = vmul.f32 %v6490_v49, %v6277_v21 }
 0x275   : > { %v6745_v0 = vpop.permute.xlu0 %2769 }
 0x276   : > { %9369 = vst [vmem:[#allocation222_spill] sm:$0xff] %v6745_v0  ;;  %2893 = vrot.lane.b32.xlu0 %v2530_v33, %s5401_s29 }
 0x277   : > { %v6750_v3 = vpop.permute.xlu1 %2767 }
 0x278   : > { %9370 = vst [vmem:[#allocation223_spill] sm:$0xff] %v6750_v3  ;;  %2891 = vrot.lane.b32.xlu1 %v2529_v20, %s5401_s29  ;;  %v2533_v3 = vmul.f32 %v6475_v28, %v6283_v36  ;;  %v2538_v28 = vmul.f32 %v6485_v51, %v6277_v21 }
 0x279   : > { %v6755_v42 = vpop.permute.xlu0 %2773 }
 0x27a   : > { %9371 = vst [vmem:[#allocation224_spill] sm:$0xff] %v6755_v42  ;;  %2897 = vrot.lane.b32.xlu0 %v2532_v57, %s5401_s29 }
 0x27b   : > { %v6760_v8 = vpop.permute.xlu1 %2771 }
 0x27c   : > { %9372 = vst [vmem:[#allocation225_spill] sm:$0xff] %v6760_v8  ;;  %2895 = vrot.lane.b32.xlu1 %v2531_v55, %s5401_s29  ;;  %v2535_v8 = vmul.f32 %v6490_v49, %v6283_v36  ;;  %v2540_v49 = vmul.f32 %v6500_v24, %v6277_v21 }
 0x27d   : > { %v6765_v33 = vpop.permute.xlu0 %2777 }
 0x27e   : > { %9373 = vst [vmem:[#allocation226_spill] sm:$0xff] %v6765_v33  ;;  %2901 = vrot.lane.b32.xlu0 %v2534_v62, %s5401_s29 }
 0x27f   : > { %v6770_v20 = vpop.permute.xlu1 %2775 }
 0x280   : > { %9374 = vst [vmem:[#allocation227_spill] sm:$0xff] %v6770_v20  ;;  %2899 = vrot.lane.b32.xlu1 %v2533_v3, %s5401_s29  ;;  %v2537_v20 = vmul.f32 %v6485_v51, %v6283_v36  ;;  %v2542_v51 = vmul.f32 %v6495_v30, %v6277_v21 }
 0x281   : > { %v6775_v57 = vpop.permute.xlu0 %2781 }
 0x282   : > { %9375 = vst [vmem:[#allocation228_spill] sm:$0xff] %v6775_v57  ;;  %2905 = vrot.lane.b32.xlu0 %v2536_v35, %s5401_s29 }
 0x283   : > { %v6780_v55 = vpop.permute.xlu1 %2779 }
 0x284   : > { %9376 = vst [vmem:[#allocation229_spill] sm:$0xff] %v6780_v55  ;;  %2903 = vrot.lane.b32.xlu1 %v2535_v8, %s5401_s29  ;;  %v2539_v55 = vmul.f32 %v6500_v24, %v6283_v36  ;;  %v2544_v24 = vmul.f32 %v6510_v40, %v6277_v21 }
 0x285   : > { %v6785_v62 = vpop.permute.xlu0 %2785 }
 0x286   : > { %9377 = vst [vmem:[#allocation230_spill] sm:$0xff] %v6785_v62  ;;  %2909 = vrot.lane.b32.xlu0 %v2538_v28, %s5401_s29 }
 0x287   : > { %v6790_v3 = vpop.permute.xlu1 %2783 }
 0x288   : > { %9378 = vst [vmem:[#allocation231_spill] sm:$0xff] %v6790_v3  ;;  %2907 = vrot.lane.b32.xlu1 %v2537_v20, %s5401_s29  ;;  %v2541_v3 = vmul.f32 %v6495_v30, %v6283_v36  ;;  %v2546_v30 = vmul.f32 %v6505_v63, %v6277_v21 }
 0x289   : > { %v6795_v35 = vpop.permute.xlu0 %2789 }
 0x28a   : > { %9379 = vst [vmem:[#allocation232_spill] sm:$0xff] %v6795_v35  ;;  %2913 = vrot.lane.b32.xlu0 %v2540_v49, %s5401_s29 }
 0x28b   : > { %v6800_v8 = vpop.permute.xlu1 %2787 }
 0x28c   : > { %9380 = vst [vmem:[#allocation233_spill] sm:$0xff] %v6800_v8  ;;  %2911 = vrot.lane.b32.xlu1 %v2539_v55, %s5401_s29  ;;  %v2543_v8 = vmul.f32 %v6510_v40, %v6283_v36  ;;  %v2548_v40 = vmul.f32 %v6520_v16, %v6277_v21 }
 0x28d   : > { %v6805_v28 = vpop.permute.xlu0 %2793 }
 0x28e   : > { %9381 = vst [vmem:[#allocation234_spill] sm:$0xff] %v6805_v28  ;;  %2917 = vrot.lane.b32.xlu0 %v2542_v51, %s5401_s29 }
 0x28f   : > { %v6810_v20 = vpop.permute.xlu1 %2791 }
 0x290   : > { %9382 = vst [vmem:[#allocation235_spill] sm:$0xff] %v6810_v20  ;;  %2915 = vrot.lane.b32.xlu1 %v2541_v3, %s5401_s29  ;;  %v2545_v20 = vmul.f32 %v6505_v63, %v6283_v36  ;;  %v2550_v63 = vmul.f32 %v6515_v53, %v6277_v21 }
 0x291   : > { %v6815_v49 = vpop.permute.xlu0 %2797 }
 0x292   : > { %9383 = vst [vmem:[#allocation236_spill] sm:$0xff] %v6815_v49  ;;  %2921 = vrot.lane.b32.xlu0 %v2544_v24, %s5401_s29 }
 0x293   : > { %v6820_v55 = vpop.permute.xlu1 %2795 }
 0x294   : > { %9384 = vst [vmem:[#allocation237_spill] sm:$0xff] %v6820_v55  ;;  %2919 = vrot.lane.b32.xlu1 %v2543_v8, %s5401_s29  ;;  %v2547_v55 = vmul.f32 %v6520_v16, %v6283_v36 }
 0x295   : > { %v6825_v51 = vpop.permute.xlu0 %2801 }
 0x296   : > { %9385 = vst [vmem:[#allocation238_spill] sm:$0xff] %v6825_v51  ;;  %2925 = vrot.lane.b32.xlu0 %v2546_v30, %s5401_s29 }
 0x297   : > { %v6830_v3 = vpop.permute.xlu1 %2799 }
 0x298   : > { %9386 = vst [vmem:[#allocation239_spill] sm:$0xff] %v6830_v3  ;;  %2923 = vrot.lane.b32.xlu1 %v2545_v20, %s5401_s29  ;;  %v2549_v3 = vmul.f32 %v6515_v53, %v6283_v36 }
 0x299   : > { %v6835_v24 = vpop.permute.xlu0 %2805 }
 0x29a   : > { %9387 = vst [vmem:[#allocation240_spill] sm:$0xff] %v6835_v24  ;;  %2929 = vrot.lane.b32.xlu0 %v2548_v40, %s5401_s29 }
 0x29b   : > { %v6840_v8 = vpop.permute.xlu1 %2803 }
 0x29c   : > { %9388 = vst [vmem:[#allocation241_spill] sm:$0xff] %v6840_v8  ;;  %2927 = vrot.lane.b32.xlu1 %v2547_v55, %s5401_s29 }
 0x29d   : > { %v6845_v30 = vpop.permute.xlu0 %2809 }
 0x29e   : > { %9389 = vst [vmem:[#allocation242_spill] sm:$0xff] %v6845_v30  ;;  %2933 = vrot.lane.b32.xlu0 %v2550_v63, %s5401_s29 }
 0x29f   : > { %v6850_v20 = vpop.permute.xlu1 %2807 }
 0x2a0   : > { %9390 = vst [vmem:[#allocation243_spill] sm:$0xff] %v6850_v20  ;;  %2931 = vrot.lane.b32.xlu1 %v2549_v3, %s5401_s29 }
 0x2a1   : > { %v6853_v16 = vpop.permute.xlu0 %2813 }
 0x2a2   : > { %9391 = vst [vmem:[#allocation244_spill] sm:$0xff] %v6853_v16  ;;  %3133 = vperm.xlu0 %5295, %v5518_v27  }
 0x2a3   : > { %v6856_v40 = vpop.permute.xlu1 %2811 }
 0x2a4   : > { %9392 = vst [vmem:[#allocation245_spill] sm:$0xff] %v6856_v40  ;;  %3129 = vperm.xlu1 %5294, %v5500_v18  }
 0x2a5   : > { %v6859_v21 = vpop.permute.xlu0 %2817 }
 0x2a6   : > { %9393 = vst [vmem:[#allocation246_spill] sm:$0xff] %v6859_v21  ;;  %3145 = vperm.xlu0 %5295, %v5508_v23  }
 0x2a7   : > { %v6862_v55 = vpop.permute.xlu1 %2815 }
 0x2a8   : > { %9394 = vst [vmem:[#allocation247_spill] sm:$0xff] %v6862_v55  ;;  %3137 = vperm.xlu1 %5294, %v5505_v22  }
 0x2a9   : > { %v6865_v36 = vpop.permute.xlu0 %2821 }
 0x2aa   : > { %9395 = vst [vmem:[#allocation248_spill] sm:$0xff] %v6865_v36  ;;  %3153 = vperm.xlu0 %5295, %v5526_v32  }
 0x2ab   : > { %v6868_v53 = vpop.permute.xlu1 %2819 }
 0x2ac   : > { %9396 = vst [vmem:[#allocation249_spill] sm:$0xff] %v6868_v53  ;;  %3141 = vperm.xlu1 %5294, %v5531_v34  }
 0x2ad   : > { %v6871_v3 = vpop.permute.xlu0 %2825 }
 0x2ae   : > { %9397 = vst [vmem:[#allocation250_spill] sm:$0xff] %v6871_v3  ;;  %3161 = vperm.xlu0 %5295, %v5536_v37  }
 0x2af   : > { %v6874_v63 = vpop.permute.xlu1 %2823 }
 0x2b0   : > { %9398 = vst [vmem:[#allocation251_spill] sm:$0xff] %v6874_v63  ;;  %3149 = vperm.xlu1 %5294, %v5513_v25  }
 0x2b1   : > { %v6877_v21 = vpop.permute.xlu0 %2829 }
 0x2b2   : > { %9399 = vst [vmem:[#allocation252_spill] sm:$0xff] %v6877_v21  ;;  %3169 = vperm.xlu0 %5295, %v5547_v43  }
 0x2b3   : > { %v6880_v55 = vpop.permute.xlu1 %2827 }
 0x2b4   : > { %9400 = vst [vmem:[#allocation253_spill] sm:$0xff] %v6880_v55  ;;  %3157 = vperm.xlu1 %5294, %v5540_v39  }
 0x2b5   : > { %v6883_v36 = vpop.permute.xlu0 %2833 }
 0x2b6   : > { %9401 = vst [vmem:[#allocation254_spill] sm:$0xff] %v6883_v36  ;;  %3177 = vperm.xlu0 %5295, %v5558_v48  }
 0x2b7   : > { %v6886_v53 = vpop.permute.xlu1 %2831 }
 0x2b8   : > { %9402 = vst [vmem:[#allocation255_spill] sm:$0xff] %v6886_v53  ;;  %3165 = vperm.xlu1 %5294, %v5522_v29  }
 0x2b9   : > { %v6889_v3 = vpop.permute.xlu0 %2837 }
 0x2ba   : > { %9403 = vst [vmem:[#allocation256_spill] sm:$0xff] %v6889_v3  ;;  %3185 = vperm.xlu0 %5295, %v5566_v54  }
 0x2bb   : > { %v6892_v63 = vpop.permute.xlu1 %2835 }
 0x2bc   : > { %9404 = vst [vmem:[#allocation257_spill] sm:$0xff] %v6892_v63  ;;  %3173 = vperm.xlu1 %5294, %v5552_v45  }
 0x2bd   : > { %v6895_v21 = vpop.permute.xlu0 %2841 }
 0x2be   : > { %9405 = vst [vmem:[#allocation258_spill] sm:$0xff] %v6895_v21  ;;  %3193 = vperm.xlu0 %5295, %v5577_v59  }
 0x2bf   : > { %v6898_v55 = vpop.permute.xlu1 %2839 }
 0x2c0   : > { %9406 = vst [vmem:[#allocation259_spill] sm:$0xff] %v6898_v55  ;;  %3181 = vperm.xlu1 %5294, %v5562_v50  }
 0x2c1   : > { %v6901_v36 = vpop.permute.xlu0 %2845 }
 0x2c2   : > { %9407 = vst [vmem:[#allocation260_spill] sm:$0xff] %v6901_v36  ;;  %3201 = vperm.xlu0 %5295, %v5588_v1   ;;  %v9413_v36 = vld [vmem:[#allocation5_spill] sm:$0xff] }
 0x2c3   : > { %v6904_v53 = vpop.permute.xlu1 %2843 }
 0x2c4   : > { %9408 = vst [vmem:[#allocation261_spill] sm:$0xff] %v6904_v53  ;;  %3189 = vperm.xlu1 %5294, %v5571_v56   ;;  %v9415_v53 = vld [vmem:[#allocation10_spill] sm:$0xff] }
 0x2c5   : > { %v6907_v3 = vpop.permute.xlu0 %2849 }
 0x2c6   : > { %9409 = vst [vmem:[#allocation262_spill] sm:$0xff] %v6907_v3  ;;  %3209 = vperm.xlu0 %5295, %v5599_v6   ;;  %v9417_v3 = vld [vmem:[#allocation7_spill] sm:$0xff] }
 0x2c7   : > { %v6910_v63 = vpop.permute.xlu1 %2847 }
 0x2c8   : > { %9410 = vst [vmem:[#allocation263_spill] sm:$0xff] %v6910_v63  ;;  %3197 = vperm.xlu1 %5294, %v5581_v61   ;;  %v9419_v63 = vld [vmem:[#allocation12_spill] sm:$0xff] }
 0x2c9   : > { %v6913_v21 = vpop.permute.xlu0 %2853 }
 0x2ca   : > { %9411 = vst [vmem:[#allocation264_spill] sm:$0xff] %v6913_v21  ;;  %3217 = vperm.xlu0 %5295, %v5607_v14   ;;  %v9421_v21 = vld [vmem:[#allocation9_spill] sm:$0xff] }
 0x2cb   : > { %v6916_v55 = vpop.permute.xlu1 %2851 }
 0x2cc   : > { %9412 = vst [vmem:[#allocation265_spill] sm:$0xff] %v6916_v55  ;;  %3205 = vperm.xlu1 %5294, %v9413_v36   ;;  %v9423_v55 = vld [vmem:[#allocation14_spill] sm:$0xff] }
 0x2cd   : > { %v6919_v40 = vpop.permute.xlu0 %2857 }
 0x2ce   : > { %9414 = vst [vmem:[#allocation5_spill] sm:$0xff] %v6919_v40  ;;  %3225 = vperm.xlu0 %5295, %v9415_v53   ;;  %v9425_v40 = vld [vmem:[#allocation11_spill] sm:$0xff] }
 0x2cf   : > { %v6922_v16 = vpop.permute.xlu1 %2855 }
 0x2d0   : > { %9416 = vst [vmem:[#allocation266_spill] sm:$0xff] %v6922_v16  ;;  %3213 = vperm.xlu1 %5294, %v9417_v3   ;;  %v9427_v16 = vld [vmem:[#allocation16_spill] sm:$0xff] }
 0x2d1   : > { %v6925_v20 = vpop.permute.xlu0 %2861 }
 0x2d2   : > { %9418 = vst [vmem:[#allocation7_spill] sm:$0xff] %v6925_v20  ;;  %3233 = vperm.xlu0 %5295, %v9419_v63   ;;  %v9429_v20 = vld [vmem:[#allocation13_spill] sm:$0xff] }
 0x2d3   : > { %v6928_v30 = vpop.permute.xlu1 %2859 }
 0x2d4   : > { %9420 = vst [vmem:[#allocation267_spill] sm:$0xff] %v6928_v30  ;;  %3221 = vperm.xlu1 %5294, %v9421_v21   ;;  %v9431_v30 = vld [vmem:[#allocation18_spill] sm:$0xff] }
 0x2d5   : > { %v6931_v8 = vpop.permute.xlu0 %2865 }
 0x2d6   : > { %9422 = vst [vmem:[#allocation268_spill] sm:$0xff] %v6931_v8  ;;  %3241 = vperm.xlu0 %5295, %v9423_v55   ;;  %v9433_v8 = vld [vmem:[#allocation15_spill] sm:$0xff] }
 0x2d7   : > { %v6934_v24 = vpop.permute.xlu1 %2863 }
 0x2d8   : > { %9424 = vst [vmem:[#allocation269_spill] sm:$0xff] %v6934_v24  ;;  %3229 = vperm.xlu1 %5294, %v9425_v40   ;;  %v9435_v24 = vld [vmem:[#allocation20_spill] sm:$0xff] }
 0x2d9   : > { %v6937_v51 = vpop.permute.xlu0 %2869 }
 0x2da   : > { %9426 = vst [vmem:[#allocation270_spill] sm:$0xff] %v6937_v51  ;;  %3249 = vperm.xlu0 %5295, %v9427_v16   ;;  %v9437_v51 = vld [vmem:[#allocation17_spill] sm:$0xff] }
 0x2db   : > { %v6940_v49 = vpop.permute.xlu1 %2867 }
 0x2dc   : > { %9428 = vst [vmem:[#allocation271_spill] sm:$0xff] %v6940_v49  ;;  %3237 = vperm.xlu1 %5294, %v9429_v20   ;;  %v9439_v49 = vld [vmem:[#allocation22_spill] sm:$0xff] }
 0x2dd   : > { %v6943_v28 = vpop.permute.xlu0 %2873 }
 0x2de   : > { %9430 = vst [vmem:[#allocation272_spill] sm:$0xff] %v6943_v28  ;;  %3257 = vperm.xlu0 %5295, %v9431_v30   ;;  %v9441_v28 = vld [vmem:[#allocation19_spill] sm:$0xff] }
 0x2df   : > { %v6946_v35 = vpop.permute.xlu1 %2871 }
 0x2e0   : > { %9432 = vst [vmem:[#allocation273_spill] sm:$0xff] %v6946_v35  ;;  %3245 = vperm.xlu1 %5294, %v9433_v8   ;;  %v9443_v35 = vld [vmem:[#allocation24_spill] sm:$0xff] }
 0x2e1   : > { %v6949_v62 = vpop.permute.xlu0 %2877 }
 0x2e2   : > { %9434 = vst [vmem:[#allocation274_spill] sm:$0xff] %v6949_v62  ;;  %3265 = vperm.xlu0 %5295, %v9435_v24   ;;  %v9445_v62 = vld [vmem:[#allocation21_spill] sm:$0xff] }
 0x2e3   : > { %v6952_v57 = vpop.permute.xlu1 %2875 }
 0x2e4   : > { %9436 = vst [vmem:[#allocation275_spill] sm:$0xff] %v6952_v57  ;;  %3253 = vperm.xlu1 %5294, %v9437_v51   ;;  %v9447_v57 = vld [vmem:[#allocation26_spill] sm:$0xff] }
 0x2e5   : > { %v6955_v33 = vpop.permute.xlu0 %2881 }
 0x2e6   : > { %9438 = vst [vmem:[#allocation276_spill] sm:$0xff] %v6955_v33  ;;  %3273 = vperm.xlu0 %5295, %v9439_v49   ;;  %v9449_v33 = vld [vmem:[#allocation23_spill] sm:$0xff] }
 0x2e7   : > { %v6958_v42 = vpop.permute.xlu1 %2879 }
 0x2e8   : > { %9440 = vst [vmem:[#allocation277_spill] sm:$0xff] %v6958_v42  ;;  %3261 = vperm.xlu1 %5294, %v9441_v28   ;;  %v9451_v42 = vld [vmem:[#allocation28_spill] sm:$0xff] }
 0x2e9   : > { %v6961_v0 = vpop.permute.xlu0 %2885 }
 0x2ea   : > { %9442 = vst [vmem:[#allocation278_spill] sm:$0xff] %v6961_v0  ;;  %3281 = vperm.xlu0 %5295, %v9443_v35   ;;  %v9453_v0 = vld [vmem:[#allocation25_spill] sm:$0xff] }
 0x2eb   : > { %v6964_v2 = vpop.permute.xlu1 %2883 }
 0x2ec   : > { %9444 = vst [vmem:[#allocation279_spill] sm:$0xff] %v6964_v2  ;;  %3269 = vperm.xlu1 %5294, %v9445_v62   ;;  %v9455_v2 = vld [vmem:[#allocation30_spill] sm:$0xff] }
 0x2ed   : > { %v6967_v41 = vpop.permute.xlu0 %2889 }
 0x2ee   : > { %9446 = vst [vmem:[#allocation280_spill] sm:$0xff] %v6967_v41  ;;  %3289 = vperm.xlu0 %5295, %v9447_v57   ;;  %v9457_v41 = vld [vmem:[#allocation27_spill] sm:$0xff] }
 0x2ef   : > { %v6970_v52 = vpop.permute.xlu1 %2887 }
 0x2f0   : > { %9448 = vst [vmem:[#allocation281_spill] sm:$0xff] %v6970_v52  ;;  %3277 = vperm.xlu1 %5294, %v9449_v33   ;;  %v9459_v52 = vld [vmem:[#allocation32_spill] sm:$0xff] }
 0x2f1   : > { %v6973_v44 = vpop.permute.xlu0 %2893 }
 0x2f2   : > { %9450 = vst [vmem:[#allocation282_spill] sm:$0xff] %v6973_v44  ;;  %3297 = vperm.xlu0 %5295, %v9451_v42   ;;  %v9461_v44 = vld [vmem:[#allocation29_spill] sm:$0xff] }
 0x2f3   : > { %v6976_v58 = vpop.permute.xlu1 %2891 }
 0x2f4   : > { %9452 = vst [vmem:[#allocation283_spill] sm:$0xff] %v6976_v58  ;;  %3285 = vperm.xlu1 %5294, %v9453_v0   ;;  %v9463_v58 = vld [vmem:[#allocation34_spill] sm:$0xff] }
 0x2f5   : > { %v6979_v9 = vpop.permute.xlu0 %2897 }
 0x2f6   : > { %9454 = vst [vmem:[#allocation284_spill] sm:$0xff] %v6979_v9  ;;  %3305 = vperm.xlu0 %5295, %v9455_v2   ;;  %v9465_v9 = vld [vmem:[#allocation31_spill] sm:$0xff] }
 0x2f7   : > { %v6982_v19 = vpop.permute.xlu1 %2895 }
 0x2f8   : > { %9456 = vst [vmem:[#allocation285_spill] sm:$0xff] %v6982_v19  ;;  %3293 = vperm.xlu1 %5294, %v9457_v41   ;;  %v9467_v19 = vld [vmem:[#allocation36_spill] sm:$0xff] }
 0x2f9   : > { %v6985_v10 = vpop.permute.xlu0 %2901 }
 0x2fa   : > { %9458 = vst [vmem:[#allocation286_spill] sm:$0xff] %v6985_v10  ;;  %3313 = vperm.xlu0 %5295, %v9459_v52   ;;  %v9469_v10 = vld [vmem:[#allocation33_spill] sm:$0xff] }
 0x2fb   : > { %v6988_v11 = vpop.permute.xlu1 %2899 }
 0x2fc   : > { %9460 = vst [vmem:[#allocation287_spill] sm:$0xff] %v6988_v11  ;;  %3301 = vperm.xlu1 %5294, %v9461_v44   ;;  %v9471_v11 = vld [vmem:[#allocation38_spill] sm:$0xff] }
 0x2fd   : > { %v6991_v7 = vpop.permute.xlu0 %2905 }
 0x2fe   : > { %9462 = vst [vmem:[#allocation288_spill] sm:$0xff] %v6991_v7  ;;  %3321 = vperm.xlu0 %5295, %v9463_v58   ;;  %v9473_v7 = vld [vmem:[#allocation35_spill] sm:$0xff] }
 0x2ff   : > { %v6994_v12 = vpop.permute.xlu1 %2903 }
 0x300   : > { %9464 = vst [vmem:[#allocation289_spill] sm:$0xff] %v6994_v12  ;;  %3309 = vperm.xlu1 %5294, %v9465_v9   ;;  %v9475_v12 = vld [vmem:[#allocation40_spill] sm:$0xff] }
 0x301   : > { %v6997_v47 = vpop.permute.xlu0 %2909 }
 0x302   : > { %9466 = vst [vmem:[#allocation290_spill] sm:$0xff] %v6997_v47  ;;  %3329 = vperm.xlu0 %5295, %v9467_v19   ;;  %v9477_v47 = vld [vmem:[#allocation37_spill] sm:$0xff]  ;;  %v7048_v19 = vld [vmem:[%s6271_s28 + $0x8] sm:$0xff] }
 0x303   : > { %v7000_v60 = vpop.permute.xlu1 %2907 }
 0x304   : > { %9468 = vst [vmem:[#allocation291_spill] sm:$0xff] %v7000_v60  ;;  %3317 = vperm.xlu1 %5294, %v9469_v10   ;;  %v9479_v60 = vld [vmem:[#allocation42_spill] sm:$0xff] }
 0x305   : > { %v7003_v13 = vpop.permute.xlu0 %2913 }
 0x306   : > { %9470 = vst [vmem:[#allocation292_spill] sm:$0xff] %v7003_v13  ;;  %3337 = vperm.xlu0 %5295, %v9471_v11   ;;  %v9481_v13 = vld [vmem:[#allocation39_spill] sm:$0xff] }
 0x307   : > { %v7006_v26 = vpop.permute.xlu1 %2911 }
 0x308   : > { %9472 = vst [vmem:[#allocation293_spill] sm:$0xff] %v7006_v26  ;;  %3325 = vperm.xlu1 %5294, %v9473_v7  }
 0x309   : > { %v7009_v17 = vpop.permute.xlu0 %2917 }
 0x30a   : > { %9474 = vst [vmem:[#allocation294_spill] sm:$0xff] %v7009_v17  ;;  %3345 = vperm.xlu0 %5295, %v9475_v12   ;;  %v9491_v12 = vld [vmem:[#allocation48_spill] sm:$0xff] }
 0x30b   : > { %v7012_v5 = vpop.permute.xlu1 %2915 }
 0x30c   : > { %9476 = vst [vmem:[#allocation295_spill] sm:$0xff] %v7012_v5  ;;  %3333 = vperm.xlu1 %5294, %v9477_v47  }
 0x30d   : > { %v7015_v4 = vpop.permute.xlu0 %2921 }
 0x30e   : > { %9478 = vst [vmem:[#allocation296_spill] sm:$0xff] %v7015_v4  ;;  %3353 = vperm.xlu0 %5295, %v9479_v60   ;;  %v9489_v60 = vld [vmem:[#allocation43_spill] sm:$0xff] }
 0x30f   : > { %v7018_v38 = vpop.permute.xlu1 %2919 }
 0x310   : > { %9480 = vst [vmem:[#allocation297_spill] sm:$0xff] %v7018_v38  ;;  %3341 = vperm.xlu1 %5294, %v9481_v13  }
 0x311   : > { %v7021_v26 = vpop.permute.xlu0 %2925 }
 0x312   : > { %9482 = vst [vmem:[#allocation298_spill] sm:$0xff] %v7021_v26  ;;  %3361 = vperm.xlu0 %5295, %v9483_v31   ;;  %v9493_v31 = vld [vmem:[#allocation45_spill] sm:$0xff] }
 0x313   : > { %v7024_v17 = vpop.permute.xlu1 %2923 }
 0x314   : > { %9484 = vst [vmem:[#allocation299_spill] sm:$0xff] %v7024_v17  ;;  %3349 = vperm.xlu1 %5294, %v9485_v15   ;;  %v7040_v15 = vld [vmem:[%s6271_s28] sm:$0xff] }
 0x315   : > { %v7027_v5 = vpop.permute.xlu0 %2929 }
 0x316   : > { %9486 = vst [vmem:[#allocation300_spill] sm:$0xff] %v7027_v5  ;;  %3369 = vperm.xlu0 %5295, %v9487_v46   ;;  %v9494_v46 = vld [vmem:[#allocation47_spill] sm:$0xff] }
 0x317   : > { %v7030_v4 = vpop.permute.xlu1 %2927 }
 0x318   : > { %9488 = vst [vmem:[#allocation301_spill] sm:$0xff] %v7030_v4  ;;  %3357 = vperm.xlu1 %5294, %v9489_v60  }
 0x319   : > { %v7033_v38 = vpop.permute.xlu0 %2933 }
 0x31a   : > { %9490 = vst [vmem:[#allocation302_spill] sm:$0xff] %v7033_v38  ;;  %3377 = vperm.xlu0 %5295, %v9491_v12   ;;  %v9495_v12 = vld [vmem:[#allocation49_spill] sm:$0xff] }
 0x31b   : > { %v7036_v26 = vpop.permute.xlu1 %2931 }
 0x31c   : > { %9492 = vst [vmem:[#allocation303_spill] sm:$0xff] %v7036_v26  ;;  %3365 = vperm.xlu1 %5294, %v9493_v31  }
 0x31d   : > { %v3134_v17 = vpop.permute.xlu0 %3133 }
 0x31e   : > { %v3386_v60 = vmul.f32 %v7040_v15, %v3134_v17  ;;  %v3387_v47 = vmul.f32 %v7048_v19, %v3134_v17 }
 0x31f   : > { %v3130_v11 = vpop.permute.xlu1 %3129 }
 0x320   : > { %v3384_v5 = vmul.f32 %v7040_v15, %v3130_v11  ;;  %3373 = vperm.xlu1 %5294, %v9494_v46   ;;  %v3385_v31 = vmul.f32 %v7048_v19, %v3130_v11 }
 0x321   : > { %v3146_v4 = vpop.permute.xlu0 %3145 }
 0x322   : > { %3640 = vrot.lane.b32.xlu0 %v3384_v5, %s5403_s30  ;;  %v3392_v7 = vmul.f32 %v7040_v15, %v3146_v4 }
 0x323   : > { %v3138_v38 = vpop.permute.xlu1 %3137 }
 0x324   : > { %3381 = vperm.xlu1 %5294, %v9495_v12   ;;  %v3388_v58 = vmul.f32 %v7040_v15, %v3138_v38  ;;  %v3389_v11 = vmul.f32 %v7048_v19, %v3138_v38  ;;  %v3393_v38 = vmul.f32 %v7048_v19, %v3146_v4 }
 0x325   : > { %v3154_v26 = vpop.permute.xlu0 %3153 }
 0x326   : > { %3644 = vrot.lane.b32.xlu0 %v3386_v60, %s5403_s30  ;;  %v3396_v10 = vmul.f32 %v7040_v15, %v3154_v26  ;;  %v3397_v4 = vmul.f32 %v7048_v19, %v3154_v26 }
 0x327   : > { %v3142_v13 = vpop.permute.xlu1 %3141 }
 0x328   : > { %3642 = vrot.lane.b32.xlu1 %v3385_v31, %s5403_s30  ;;  %v3390_v12 = vmul.f32 %v7040_v15, %v3142_v13  ;;  %v3391_v17 = vmul.f32 %v7048_v19, %v3142_v13 }
 0x329   : > { %v3162_v46 = vpop.permute.xlu0 %3161 }
 0x32a   : > { %3648 = vrot.lane.b32.xlu0 %v3388_v58, %s5403_s30  ;;  %v3401_v26 = vmul.f32 %v7048_v19, %v3162_v46 }
 0x32b   : > { %v3150_v5 = vpop.permute.xlu1 %3149 }
 0x32c   : > { %3646 = vrot.lane.b32.xlu1 %v3387_v47, %s5403_s30  ;;  %v3394_v2 = vmul.f32 %v7040_v15, %v3150_v5  ;;  %v3395_v13 = vmul.f32 %v7048_v19, %v3150_v5 }
 0x32d   : > { %v3170_v52 = vpop.permute.xlu0 %3169 }
 0x32e   : > { %3652 = vrot.lane.b32.xlu0 %v3390_v12, %s5403_s30 }
 0x32f   : > { %v3158_v60 = vpop.permute.xlu1 %3157 }
 0x330   : > { %3650 = vrot.lane.b32.xlu1 %v3389_v11, %s5403_s30  ;;  %v3398_v42 = vmul.f32 %v7040_v15, %v3158_v60 }
 0x331   : > { %v3178_v31 = vpop.permute.xlu0 %3177 }
 0x332   : > { %3656 = vrot.lane.b32.xlu0 %v3392_v7, %s5403_s30 }
 0x333   : > { %v3166_v58 = vpop.permute.xlu1 %3165 }
 0x334   : > { %3654 = vrot.lane.b32.xlu1 %v3391_v17, %s5403_s30 }
 0x335   : > { %v3186_v47 = vpop.permute.xlu0 %3185 }
 0x336   : > { %3660 = vrot.lane.b32.xlu0 %v3394_v2, %s5403_s30 }
 0x337   : > { %v3174_v12 = vpop.permute.xlu1 %3173 }
 0x338   : > { %3658 = vrot.lane.b32.xlu1 %v3393_v38, %s5403_s30  ;;  %v3400_v38 = vmul.f32 %v7040_v15, %v3162_v46 }
 0x339   : > { %v7070_v11 = vpop.permute.xlu0 %3193 }
 0x33a   : > { %3664 = vrot.lane.b32.xlu0 %v3396_v10, %s5403_s30  ;;  %v3399_v10 = vmul.f32 %v7048_v19, %v3158_v60 }
 0x33b   : > { %v3182_v7 = vpop.permute.xlu1 %3181 }
 0x33c   : > { %3662 = vrot.lane.b32.xlu1 %v3395_v13, %s5403_s30  ;;  %v3402_v13 = vmul.f32 %v7040_v15, %v3166_v58 }
 0x33d   : > { %v7076_v17 = vpop.permute.xlu0 %3201 }
 0x33e   : > { %3668 = vrot.lane.b32.xlu0 %v3398_v42, %s5403_s30  ;;  %v3421_v62 = vmul.f32 %v7048_v19, %v7076_v17 }
 0x33f   : > { %v3190_v2 = vpop.permute.xlu1 %3189 }
 0x340   : > { %3666 = vrot.lane.b32.xlu1 %v3397_v4, %s5403_s30  ;;  %v3404_v4 = vmul.f32 %v7040_v15, %v3170_v52 }
 0x341   : > { %v7082_v9 = vpop.permute.xlu0 %3209 }
 0x342   : > { %3672 = vrot.lane.b32.xlu0 %v3400_v38, %s5403_s30  ;;  %v3403_v38 = vmul.f32 %v7048_v19, %v3166_v58  ;;  %v3425_v28 = vmul.f32 %v7048_v19, %v7082_v9 }
 0x343   : > { %v3198_v5 = vpop.permute.xlu1 %3197 }
 0x344   : > { %3670 = vrot.lane.b32.xlu1 %v3399_v10, %s5403_s30  ;;  %v3406_v10 = vmul.f32 %v7040_v15, %v3174_v12  ;;  %v3418_v33 = vmul.f32 %v7040_v15, %v3198_v5  ;;  %v3419_v30 = vmul.f32 %v7048_v19, %v3198_v5  ;;  %v3424_v5 = vmul.f32 %v7040_v15, %v7082_v9 }
 0x345   : > { %v7088_v57 = vpop.permute.xlu0 %3217 }
 0x346   : > { %3676 = vrot.lane.b32.xlu0 %v3402_v13, %s5403_s30  ;;  %v3405_v13 = vmul.f32 %v7048_v19, %v3170_v52  ;;  %v3429_v51 = vmul.f32 %v7048_v19, %v7088_v57 }
 0x347   : > { %v7092_v42 = vpop.permute.xlu1 %3205 }
 0x348   : > { %3674 = vrot.lane.b32.xlu1 %v3401_v26, %s5403_s30  ;;  %v3408_v26 = vmul.f32 %v7040_v15, %v3178_v31  ;;  %v3423_v16 = vmul.f32 %v7048_v19, %v7092_v42 }
 0x349   : > { %v7096_v60 = vpop.permute.xlu0 %3225 }
 0x34a   : > { %3680 = vrot.lane.b32.xlu0 %v3404_v4, %s5403_s30  ;;  %v3407_v4 = vmul.f32 %v7048_v19, %v3174_v12  ;;  %v3433_v8 = vmul.f32 %v7048_v19, %v7096_v60 }
 0x34b   : > { %v7100_v44 = vpop.permute.xlu1 %3213 }
 0x34c   : > { %3678 = vrot.lane.b32.xlu1 %v3403_v38, %s5403_s30  ;;  %v3410_v38 = vmul.f32 %v7040_v15, %v3182_v7  ;;  %v3427_v55 = vmul.f32 %v7048_v19, %v7100_v44 }
 0x34d   : > { %v7104_v46 = vpop.permute.xlu0 %3233 }
 0x34e   : > { %3684 = vrot.lane.b32.xlu0 %v3406_v10, %s5403_s30  ;;  %v3409_v10 = vmul.f32 %v7048_v19, %v3178_v31  ;;  %v3437_v20 = vmul.f32 %v7048_v19, %v7104_v46 }
 0x34f   : > { %v7108_v35 = vpop.permute.xlu1 %3221 }
 0x350   : > { %3682 = vrot.lane.b32.xlu1 %v3405_v13, %s5403_s30  ;;  %v3412_v13 = vmul.f32 %v7040_v15, %v3186_v47  ;;  %v3430_v9 = vmul.f32 %v7040_v15, %v7108_v35  ;;  %v3431_v63 = vmul.f32 %v7048_v19, %v7108_v35  ;;  %v3436_v35 = vmul.f32 %v7040_v15, %v7104_v46 }
 0x351   : > { %v7112_v58 = vpop.permute.xlu0 %3241 }
 0x352   : > { %3688 = vrot.lane.b32.xlu0 %v3408_v26, %s5403_s30  ;;  %v3411_v26 = vmul.f32 %v7048_v19, %v3182_v7  ;;  %v3441_v40 = vmul.f32 %v7048_v19, %v7112_v58 }
 0x353   : > { %v7116_v41 = vpop.permute.xlu1 %3229 }
 0x354   : > { %3686 = vrot.lane.b32.xlu1 %v3407_v4, %s5403_s30  ;;  %v3414_v4 = vmul.f32 %v7040_v15, %v3190_v2  ;;  %v3435_v53 = vmul.f32 %v7048_v19, %v7116_v41 }
 0x355   : > { %v7120_v52 = vpop.permute.xlu0 %3249 }
 0x356   : > { %3692 = vrot.lane.b32.xlu0 %v3410_v38, %s5403_s30  ;;  %v3413_v38 = vmul.f32 %v7048_v19, %v3186_v47  ;;  %v3445_v21 = vmul.f32 %v7048_v19, %v7120_v52 }
 0x357   : > { %v7124_v49 = vpop.permute.xlu1 %3237 }
 0x358   : > { %3690 = vrot.lane.b32.xlu1 %v3409_v10, %s5403_s30  ;;  %v3416_v10 = vmul.f32 %v7040_v15, %v7070_v11  ;;  %v3439_v14 = vmul.f32 %v7048_v19, %v7124_v49 }
 0x359   : > { %v7128_v12 = vpop.permute.xlu0 %3257 }
 0x35a   : > { %3696 = vrot.lane.b32.xlu0 %v3412_v13, %s5403_s30  ;;  %v3415_v13 = vmul.f32 %v7048_v19, %v3190_v2  ;;  %v3420_v2 = vmul.f32 %v7040_v15, %v7076_v17  ;;  %v3426_v17 = vmul.f32 %v7040_v15, %v7100_v44  ;;  %v3432_v44 = vmul.f32 %v7040_v15, %v7096_v60 }
 0x35b   : > { %v7132_v0 = vpop.permute.xlu1 %3245  ;;  %v3438_v60 = vmul.f32 %v7040_v15, %v7124_v49  ;;  %v3444_v49 = vmul.f32 %v7040_v15, %v7120_v52 }
 0x35c   : > { %3694 = vrot.lane.b32.xlu1 %v3411_v26, %s5403_s30  ;;  %v3442_v46 = vmul.f32 %v7040_v15, %v7132_v0  ;;  %v3443_v6 = vmul.f32 %v7048_v19, %v7132_v0  ;;  %v3448_v0 = vmul.f32 %v7040_v15, %v7128_v12 }
 0x35d   : > { %v7136_v31 = vpop.permute.xlu0 %3265 }
 0x35e   : > { %3700 = vrot.lane.b32.xlu0 %v3414_v4, %s5403_s30  ;;  %v3417_v4 = vmul.f32 %v7048_v19, %v7070_v11  ;;  %v3422_v11 = vmul.f32 %v7040_v15, %v7092_v42  ;;  %v3428_v42 = vmul.f32 %v7040_v15, %v7088_v57  ;;  %v3434_v57 = vmul.f32 %v7040_v15, %v7116_v41 }
 0x35f   : > { %v7140_v24 = vpop.permute.xlu1 %3253  ;;  %v3440_v41 = vmul.f32 %v7040_v15, %v7112_v58 }
 0x360   : > { %3698 = vrot.lane.b32.xlu1 %v3413_v38, %s5403_s30  ;;  %v3446_v58 = vmul.f32 %v7040_v15, %v7140_v24 }
 0x361   : > { %v7145_v7 = vpop.permute.xlu0 %3273 }
 0x362   : > { %3704 = vrot.lane.b32.xlu0 %v3416_v10, %s5403_s30 }
 0x363   : > { %v7149_v26 = vpop.permute.xlu1 %3261 }
 0x364   : > { %3702 = vrot.lane.b32.xlu1 %v3415_v13, %s5403_s30 }
 0x365   : > { %v7153_v47 = vpop.permute.xlu0 %3281 }
 0x366   : > { %3708 = vrot.lane.b32.xlu0 %v3418_v33, %s5403_s30 }
 0x367   : > { %v7158_v38 = vpop.permute.xlu1 %3269 }
 0x368   : > { %3706 = vrot.lane.b32.xlu1 %v3417_v4, %s5403_s30 }
 0x369   : > { %v7163_v10 = vpop.permute.xlu0 %3289 }
 0x36a   : > { %3712 = vrot.lane.b32.xlu0 %v3420_v2, %s5403_s30 }
 0x36b   : > { %v7167_v13 = vpop.permute.xlu1 %3277 }
 0x36c   : > { %3710 = vrot.lane.b32.xlu1 %v3419_v30, %s5403_s30 }
 0x36d   : > { %v7172_v33 = vpop.permute.xlu0 %3297 }
 0x36e   : > { %3716 = vrot.lane.b32.xlu0 %v3422_v11, %s5403_s30 }
 0x36f   : > { %v7177_v4 = vpop.permute.xlu1 %3285 }
 0x370   : > { %3714 = vrot.lane.b32.xlu1 %v3421_v62, %s5403_s30 }
 0x371   : > { %v7182_v2 = vpop.permute.xlu0 %3305 }
 0x372   : > { %3720 = vrot.lane.b32.xlu0 %v3424_v5, %s5403_s30 }
 0x373   : > { %v7187_v30 = vpop.permute.xlu1 %3293 }
 0x374   : > { %3718 = vrot.lane.b32.xlu1 %v3423_v16, %s5403_s30 }
 0x375   : > { %v7192_v11 = vpop.permute.xlu0 %3313 }
 0x376   : > { %3724 = vrot.lane.b32.xlu0 %v3426_v17, %s5403_s30 }
 0x377   : > { %v7197_v62 = vpop.permute.xlu1 %3301 }
 0x378   : > { %3722 = vrot.lane.b32.xlu1 %v3425_v28, %s5403_s30 }
 0x379   : > { %v7202_v5 = vpop.permute.xlu0 %3321 }
 0x37a   : > { %3728 = vrot.lane.b32.xlu0 %v3428_v42, %s5403_s30 }
 0x37b   : > { %v7207_v16 = vpop.permute.xlu1 %3309 }
 0x37c   : > { %3726 = vrot.lane.b32.xlu1 %v3427_v55, %s5403_s30 }
 0x37d   : > { %v7212_v17 = vpop.permute.xlu0 %3329 }
 0x37e   : > { %3732 = vrot.lane.b32.xlu0 %v3430_v9, %s5403_s30 }
 0x37f   : > { %v7217_v28 = vpop.permute.xlu1 %3317 }
 0x380   : > { %3730 = vrot.lane.b32.xlu1 %v3429_v51, %s5403_s30 }
 0x381   : > { %v7222_v42 = vpop.permute.xlu0 %3337 }
 0x382   : > { %3736 = vrot.lane.b32.xlu0 %v3432_v44, %s5403_s30 }
 0x383   : > { %v7227_v55 = vpop.permute.xlu1 %3325 }
 0x384   : > { %3734 = vrot.lane.b32.xlu1 %v3431_v63, %s5403_s30 }
 0x385   : > { %v7232_v9 = vpop.permute.xlu0 %3345 }
 0x386   : > { %3740 = vrot.lane.b32.xlu0 %v3434_v57, %s5403_s30 }
 0x387   : > { %v7237_v51 = vpop.permute.xlu1 %3333 }
 0x388   : > { %3738 = vrot.lane.b32.xlu1 %v3433_v8, %s5403_s30 }
 0x389   : > { %v7242_v44 = vpop.permute.xlu0 %3353 }
 0x38a   : > { %3744 = vrot.lane.b32.xlu0 %v3436_v35, %s5403_s30 }
 0x38b   : > { %v7247_v63 = vpop.permute.xlu1 %3341 }
 0x38c   : > { %3742 = vrot.lane.b32.xlu1 %v3435_v53, %s5403_s30 }
 0x38d   : > { %v7252_v57 = vpop.permute.xlu0 %3361 }
 0x38e   : > { %3748 = vrot.lane.b32.xlu0 %v3438_v60, %s5403_s30 }
 0x38f   : > { %v7257_v8 = vpop.permute.xlu1 %3349 }
 0x390   : > { %3746 = vrot.lane.b32.xlu1 %v3437_v20, %s5403_s30 }
 0x391   : > { %v7262_v35 = vpop.permute.xlu0 %3369 }
 0x392   : > { %3752 = vrot.lane.b32.xlu0 %v3440_v41, %s5403_s30 }
 0x393   : > { %v7267_v53 = vpop.permute.xlu1 %3357 }
 0x394   : > { %3750 = vrot.lane.b32.xlu1 %v3439_v14, %s5403_s30 }
 0x395   : > { %v7272_v60 = vpop.permute.xlu0 %3377 }
 0x396   : > { %3756 = vrot.lane.b32.xlu0 %v3442_v46, %s5403_s30 }
 0x397   : > { %v7277_v20 = vpop.permute.xlu1 %3365 }
 0x398   : > { %3754 = vrot.lane.b32.xlu1 %v3441_v40, %s5403_s30 }
 0x399   : > { %v7282_v41 = vpop.permute.xlu0 %3640 }
 0x39a   : > { %9496 = vst [vmem:[#allocation304_spill] sm:$0xff] %v7282_v41  ;;  %3760 = vrot.lane.b32.xlu0 %v3444_v49, %s5403_s30  ;;  %v5404_v41 = vmov 3  }
 0x39b   : > { %v7287_v14 = vpop.permute.xlu1 %3373  ;;  %5296 = vset.pattern.permute.xlu0 %v5404_v41  ;;  %5297 = vset.pattern.permute.xlu1 %v5404_v41 }
 0x39c   : > { %3758 = vrot.lane.b32.xlu1 %v3443_v6, %s5403_s30  ;;  %v3447_v6 = vmul.f32 %v7048_v19, %v7140_v24  ;;  %v3452_v24 = vmul.f32 %v7040_v15, %v7136_v31 }
 0x39d   : > { %v7292_v46 = vpop.permute.xlu0 %3644 }
 0x39e   : > { %9497 = vst [vmem:[#allocation305_spill] sm:$0xff] %v7292_v46  ;;  %3764 = vrot.lane.b32.xlu0 %v3446_v58, %s5403_s30  ;;  %v3450_v58 = vmul.f32 %v7040_v15, %v7149_v26 }
 0x39f   : > { %v7297_v40 = vpop.permute.xlu1 %3381 }
 0x3a0   : > { %3762 = vrot.lane.b32.xlu1 %v3445_v21, %s5403_s30  ;;  %v3449_v21 = vmul.f32 %v7048_v19, %v7128_v12  ;;  %v3454_v12 = vmul.f32 %v7040_v15, %v7158_v38 }
 0x3a1   : > { %v7302_v49 = vpop.permute.xlu0 %3648 }
 0x3a2   : > { %9498 = vst [vmem:[#allocation306_spill] sm:$0xff] %v7302_v49  ;;  %3768 = vrot.lane.b32.xlu0 %v3448_v0, %s5403_s30  ;;  %v3451_v49 = vmul.f32 %v7048_v19, %v7149_v26  ;;  %v3456_v26 = vmul.f32 %v7040_v15, %v7145_v7 }
 0x3a3   : > { %v7307_v52 = vpop.permute.xlu1 %3642 }
 0x3a4   : > { %3766 = vrot.lane.b32.xlu1 %v3447_v6, %s5403_s30 }
 0x3a5   : > { %v7312_v46 = vpop.permute.xlu0 %3652 }
 0x3a6   : > { %9499 = vst [vmem:[#allocation307_spill] sm:$0xff] %v7312_v46  ;;  %3772 = vrot.lane.b32.xlu0 %v3450_v58, %s5403_s30  ;;  %v3453_v46 = vmul.f32 %v7048_v19, %v7136_v31  ;;  %v3458_v31 = vmul.f32 %v7040_v15, %v7167_v13 }
 0x3a7   : > { %v7317_v41 = vpop.permute.xlu1 %3646 }
 0x3a8   : > { %3770 = vrot.lane.b32.xlu1 %v3449_v21, %s5403_s30 }
 0x3a9   : > { %v7322_v0 = vpop.permute.xlu0 %3656 }
 0x3aa   : > { %9500 = vst [vmem:[#allocation308_spill] sm:$0xff] %v7322_v0  ;;  %3776 = vrot.lane.b32.xlu0 %v3452_v24, %s5403_s30  ;;  %v3455_v0 = vmul.f32 %v7048_v19, %v7158_v38  ;;  %v3460_v38 = vmul.f32 %v7040_v15, %v7153_v47 }
 0x3ab   : > { %v7327_v6 = vpop.permute.xlu1 %3650 }
 0x3ac   : > { %3774 = vrot.lane.b32.xlu1 %v3451_v49, %s5403_s30 }
 0x3ad   : > { %v7332_v58 = vpop.permute.xlu0 %3660 }
 0x3ae   : > { %9501 = vst [vmem:[#allocation309_spill] sm:$0xff] %v7332_v58  ;;  %3780 = vrot.lane.b32.xlu0 %v3454_v12, %s5403_s30  ;;  %v3457_v58 = vmul.f32 %v7048_v19, %v7145_v7  ;;  %v3462_v7 = vmul.f32 %v7040_v15, %v7177_v4 }
 0x3af   : > { %v7337_v21 = vpop.permute.xlu1 %3654 }
 0x3b0   : > { %3778 = vrot.lane.b32.xlu1 %v3453_v46, %s5403_s30 }
 0x3b1   : > { %v7342_v24 = vpop.permute.xlu0 %3664 }
 0x3b2   : > { %9502 = vst [vmem:[#allocation310_spill] sm:$0xff] %v7342_v24  ;;  %3784 = vrot.lane.b32.xlu0 %v3456_v26, %s5403_s30  ;;  %v3459_v24 = vmul.f32 %v7048_v19, %v7167_v13  ;;  %v3464_v13 = vmul.f32 %v7040_v15, %v7163_v10 }
 0x3b3   : > { %v7347_v49 = vpop.permute.xlu1 %3658 }
 0x3b4   : > { %3782 = vrot.lane.b32.xlu1 %v3455_v0, %s5403_s30 }
 0x3b5   : > { %v7352_v12 = vpop.permute.xlu0 %3668 }
 0x3b6   : > { %9503 = vst [vmem:[#allocation311_spill] sm:$0xff] %v7352_v12  ;;  %3788 = vrot.lane.b32.xlu0 %v3458_v31, %s5403_s30  ;;  %v3461_v12 = vmul.f32 %v7048_v19, %v7153_v47  ;;  %v3466_v47 = vmul.f32 %v7040_v15, %v7187_v30 }
 0x3b7   : > { %v7357_v46 = vpop.permute.xlu1 %3662 }
 0x3b8   : > { %3786 = vrot.lane.b32.xlu1 %v3457_v58, %s5403_s30 }
 0x3b9   : > { %v7362_v26 = vpop.permute.xlu0 %3672 }
 0x3ba   : > { %9504 = vst [vmem:[#allocation312_spill] sm:$0xff] %v7362_v26  ;;  %3792 = vrot.lane.b32.xlu0 %v3460_v38, %s5403_s30  ;;  %v3463_v26 = vmul.f32 %v7048_v19, %v7177_v4  ;;  %v3468_v4 = vmul.f32 %v7040_v15, %v7172_v33 }
 0x3bb   : > { %v7367_v0 = vpop.permute.xlu1 %3666 }
 0x3bc   : > { %3790 = vrot.lane.b32.xlu1 %v3459_v24, %s5403_s30 }
 0x3bd   : > { %v7372_v31 = vpop.permute.xlu0 %3676 }
 0x3be   : > { %9505 = vst [vmem:[#allocation313_spill] sm:$0xff] %v7372_v31  ;;  %3796 = vrot.lane.b32.xlu0 %v3462_v7, %s5403_s30  ;;  %v3465_v31 = vmul.f32 %v7048_v19, %v7163_v10  ;;  %v3470_v10 = vmul.f32 %v7040_v15, %v7197_v62 }
 0x3bf   : > { %v7377_v58 = vpop.permute.xlu1 %3670 }
 0x3c0   : > { %3794 = vrot.lane.b32.xlu1 %v3461_v12, %s5403_s30 }
 0x3c1   : > { %v7382_v38 = vpop.permute.xlu0 %3680 }
 0x3c2   : > { %9506 = vst [vmem:[#allocation314_spill] sm:$0xff] %v7382_v38  ;;  %3800 = vrot.lane.b32.xlu0 %v3464_v13, %s5403_s30  ;;  %v3467_v38 = vmul.f32 %v7048_v19, %v7187_v30  ;;  %v3472_v30 = vmul.f32 %v7040_v15, %v7182_v2 }
 0x3c3   : > { %v7387_v24 = vpop.permute.xlu1 %3674 }
 0x3c4   : > { %3798 = vrot.lane.b32.xlu1 %v3463_v26, %s5403_s30 }
 0x3c5   : > { %v7392_v7 = vpop.permute.xlu0 %3684 }
 0x3c6   : > { %9507 = vst [vmem:[#allocation315_spill] sm:$0xff] %v7392_v7  ;;  %3804 = vrot.lane.b32.xlu0 %v3466_v47, %s5403_s30  ;;  %v3469_v7 = vmul.f32 %v7048_v19, %v7172_v33  ;;  %v3474_v33 = vmul.f32 %v7040_v15, %v7207_v16 }
 0x3c7   : > { %v7397_v12 = vpop.permute.xlu1 %3678 }
 0x3c8   : > { %3802 = vrot.lane.b32.xlu1 %v3465_v31, %s5403_s30 }
 0x3c9   : > { %v7402_v13 = vpop.permute.xlu0 %3688 }
 0x3ca   : > { %9508 = vst [vmem:[#allocation316_spill] sm:$0xff] %v7402_v13  ;;  %3808 = vrot.lane.b32.xlu0 %v3468_v4, %s5403_s30  ;;  %v3471_v13 = vmul.f32 %v7048_v19, %v7197_v62  ;;  %v3476_v62 = vmul.f32 %v7040_v15, %v7192_v11 }
 0x3cb   : > { %v7407_v26 = vpop.permute.xlu1 %3682 }
 0x3cc   : > { %3806 = vrot.lane.b32.xlu1 %v3467_v38, %s5403_s30 }
 0x3cd   : > { %v7412_v47 = vpop.permute.xlu0 %3692 }
 0x3ce   : > { %9509 = vst [vmem:[#allocation317_spill] sm:$0xff] %v7412_v47  ;;  %3812 = vrot.lane.b32.xlu0 %v3470_v10, %s5403_s30  ;;  %v3473_v47 = vmul.f32 %v7048_v19, %v7182_v2  ;;  %v3478_v2 = vmul.f32 %v7040_v15, %v7217_v28 }
 0x3cf   : > { %v7417_v31 = vpop.permute.xlu1 %3686 }
 0x3d0   : > { %3810 = vrot.lane.b32.xlu1 %v3469_v7, %s5403_s30 }
 0x3d1   : > { %v7422_v4 = vpop.permute.xlu0 %3696 }
 0x3d2   : > { %9510 = vst [vmem:[#allocation318_spill] sm:$0xff] %v7422_v4  ;;  %3816 = vrot.lane.b32.xlu0 %v3472_v30, %s5403_s30  ;;  %v3475_v4 = vmul.f32 %v7048_v19, %v7207_v16  ;;  %v3480_v16 = vmul.f32 %v7040_v15, %v7202_v5 }
 0x3d3   : > { %v7427_v38 = vpop.permute.xlu1 %3690 }
 0x3d4   : > { %3814 = vrot.lane.b32.xlu1 %v3471_v13, %s5403_s30 }
 0x3d5   : > { %v7432_v10 = vpop.permute.xlu0 %3700 }
 0x3d6   : > { %9511 = vst [vmem:[#allocation319_spill] sm:$0xff] %v7432_v10  ;;  %3820 = vrot.lane.b32.xlu0 %v3474_v33, %s5403_s30  ;;  %v3477_v10 = vmul.f32 %v7048_v19, %v7192_v11  ;;  %v3482_v11 = vmul.f32 %v7040_v15, %v7227_v55 }
 0x3d7   : > { %v7437_v7 = vpop.permute.xlu1 %3694 }
 0x3d8   : > { %3818 = vrot.lane.b32.xlu1 %v3473_v47, %s5403_s30 }
 0x3d9   : > { %v7442_v30 = vpop.permute.xlu0 %3704 }
 0x3da   : > { %9512 = vst [vmem:[#allocation320_spill] sm:$0xff] %v7442_v30  ;;  %3824 = vrot.lane.b32.xlu0 %v3476_v62, %s5403_s30  ;;  %v3479_v30 = vmul.f32 %v7048_v19, %v7217_v28  ;;  %v3484_v28 = vmul.f32 %v7040_v15, %v7212_v17 }
 0x3db   : > { %v7447_v13 = vpop.permute.xlu1 %3698 }
 0x3dc   : > { %3822 = vrot.lane.b32.xlu1 %v3475_v4, %s5403_s30 }
 0x3dd   : > { %v7452_v33 = vpop.permute.xlu0 %3708 }
 0x3de   : > { %9513 = vst [vmem:[#allocation321_spill] sm:$0xff] %v7452_v33  ;;  %3828 = vrot.lane.b32.xlu0 %v3478_v2, %s5403_s30  ;;  %v3481_v33 = vmul.f32 %v7048_v19, %v7202_v5  ;;  %v3486_v5 = vmul.f32 %v7040_v15, %v7237_v51 }
 0x3df   : > { %v7457_v47 = vpop.permute.xlu1 %3702 }
 0x3e0   : > { %3826 = vrot.lane.b32.xlu1 %v3477_v10, %s5403_s30 }
 0x3e1   : > { %v7462_v62 = vpop.permute.xlu0 %3712 }
 0x3e2   : > { %9514 = vst [vmem:[#allocation322_spill] sm:$0xff] %v7462_v62  ;;  %3832 = vrot.lane.b32.xlu0 %v3480_v16, %s5403_s30  ;;  %v3483_v62 = vmul.f32 %v7048_v19, %v7227_v55  ;;  %v3488_v55 = vmul.f32 %v7040_v15, %v7222_v42 }
 0x3e3   : > { %v7467_v4 = vpop.permute.xlu1 %3706 }
 0x3e4   : > { %3830 = vrot.lane.b32.xlu1 %v3479_v30, %s5403_s30 }
 0x3e5   : > { %v7472_v2 = vpop.permute.xlu0 %3716 }
 0x3e6   : > { %9515 = vst [vmem:[#allocation323_spill] sm:$0xff] %v7472_v2  ;;  %3836 = vrot.lane.b32.xlu0 %v3482_v11, %s5403_s30  ;;  %v3485_v2 = vmul.f32 %v7048_v19, %v7212_v17  ;;  %v3490_v17 = vmul.f32 %v7040_v15, %v7247_v63 }
 0x3e7   : > { %v7477_v10 = vpop.permute.xlu1 %3710 }
 0x3e8   : > { %3834 = vrot.lane.b32.xlu1 %v3481_v33, %s5403_s30 }
 0x3e9   : > { %v7482_v16 = vpop.permute.xlu0 %3720 }
 0x3ea   : > { %9516 = vst [vmem:[#allocation324_spill] sm:$0xff] %v7482_v16  ;;  %3840 = vrot.lane.b32.xlu0 %v3484_v28, %s5403_s30  ;;  %v3487_v16 = vmul.f32 %v7048_v19, %v7237_v51  ;;  %v3492_v51 = vmul.f32 %v7040_v15, %v7232_v9 }
 0x3eb   : > { %v7487_v30 = vpop.permute.xlu1 %3714 }
 0x3ec   : > { %3838 = vrot.lane.b32.xlu1 %v3483_v62, %s5403_s30 }
 0x3ed   : > { %v7492_v11 = vpop.permute.xlu0 %3724 }
 0x3ee   : > { %9517 = vst [vmem:[#allocation325_spill] sm:$0xff] %v7492_v11  ;;  %3844 = vrot.lane.b32.xlu0 %v3486_v5, %s5403_s30  ;;  %v3489_v11 = vmul.f32 %v7048_v19, %v7222_v42  ;;  %v3494_v42 = vmul.f32 %v7040_v15, %v7257_v8 }
 0x3ef   : > { %v7497_v33 = vpop.permute.xlu1 %3718 }
 0x3f0   : > { %3842 = vrot.lane.b32.xlu1 %v3485_v2, %s5403_s30 }
 0x3f1   : > { %v7502_v28 = vpop.permute.xlu0 %3728 }
 0x3f2   : > { %9518 = vst [vmem:[#allocation326_spill] sm:$0xff] %v7502_v28  ;;  %3848 = vrot.lane.b32.xlu0 %v3488_v55, %s5403_s30  ;;  %v3491_v28 = vmul.f32 %v7048_v19, %v7247_v63  ;;  %v3496_v63 = vmul.f32 %v7040_v15, %v7242_v44 }
 0x3f3   : > { %v7507_v62 = vpop.permute.xlu1 %3722 }
 0x3f4   : > { %3846 = vrot.lane.b32.xlu1 %v3487_v16, %s5403_s30 }
 0x3f5   : > { %v7512_v5 = vpop.permute.xlu0 %3732 }
 0x3f6   : > { %9519 = vst [vmem:[#allocation327_spill] sm:$0xff] %v7512_v5  ;;  %3852 = vrot.lane.b32.xlu0 %v3490_v17, %s5403_s30  ;;  %v3493_v5 = vmul.f32 %v7048_v19, %v7232_v9  ;;  %v3498_v9 = vmul.f32 %v7040_v15, %v7267_v53 }
 0x3f7   : > { %v7517_v2 = vpop.permute.xlu1 %3726 }
 0x3f8   : > { %3850 = vrot.lane.b32.xlu1 %v3489_v11, %s5403_s30 }
 0x3f9   : > { %v7522_v55 = vpop.permute.xlu0 %3736 }
 0x3fa   : > { %9520 = vst [vmem:[#allocation328_spill] sm:$0xff] %v7522_v55  ;;  %3856 = vrot.lane.b32.xlu0 %v3492_v51, %s5403_s30  ;;  %v3495_v55 = vmul.f32 %v7048_v19, %v7257_v8  ;;  %v3500_v8 = vmul.f32 %v7040_v15, %v7252_v57 }
 0x3fb   : > { %v7527_v16 = vpop.permute.xlu1 %3730 }
 0x3fc   : > { %9521 = vst [vmem:[#allocation329_spill] sm:$0xff] %v7527_v16  ;;  %3854 = vrot.lane.b32.xlu1 %v3491_v28, %s5403_s30 }
 0x3fd   : > { %v7532_v17 = vpop.permute.xlu0 %3740 }
 0x3fe   : > { %9522 = vst [vmem:[#allocation330_spill] sm:$0xff] %v7532_v17  ;;  %3860 = vrot.lane.b32.xlu0 %v3494_v42, %s5403_s30  ;;  %v3497_v17 = vmul.f32 %v7048_v19, %v7242_v44  ;;  %v3502_v44 = vmul.f32 %v7040_v15, %v7277_v20 }
 0x3ff   : > { %v7537_v11 = vpop.permute.xlu1 %3734 }
 0x400   : > { %9523 = vst [vmem:[#allocation331_spill] sm:$0xff] %v7537_v11  ;;  %3858 = vrot.lane.b32.xlu1 %v3493_v5, %s5403_s30 }
 0x401   : > { %v7542_v51 = vpop.permute.xlu0 %3744 }
 0x402   : > { %9524 = vst [vmem:[#allocation332_spill] sm:$0xff] %v7542_v51  ;;  %3864 = vrot.lane.b32.xlu0 %v3496_v63, %s5403_s30  ;;  %v3499_v51 = vmul.f32 %v7048_v19, %v7267_v53  ;;  %v3504_v53 = vmul.f32 %v7040_v15, %v7262_v35 }
 0x403   : > { %v7547_v28 = vpop.permute.xlu1 %3738 }
 0x404   : > { %9525 = vst [vmem:[#allocation333_spill] sm:$0xff] %v7547_v28  ;;  %3862 = vrot.lane.b32.xlu1 %v3495_v55, %s5403_s30 }
 0x405   : > { %v7552_v42 = vpop.permute.xlu0 %3748 }
 0x406   : > { %9526 = vst [vmem:[#allocation334_spill] sm:$0xff] %v7552_v42  ;;  %3868 = vrot.lane.b32.xlu0 %v3498_v9, %s5403_s30  ;;  %v3501_v42 = vmul.f32 %v7048_v19, %v7252_v57  ;;  %v3506_v57 = vmul.f32 %v7040_v15, %v7287_v14 }
 0x407   : > { %v7557_v5 = vpop.permute.xlu1 %3742 }
 0x408   : > { %9527 = vst [vmem:[#allocation335_spill] sm:$0xff] %v7557_v5  ;;  %3866 = vrot.lane.b32.xlu1 %v3497_v17, %s5403_s30 }
 0x409   : > { %v7562_v63 = vpop.permute.xlu0 %3752 }
 0x40a   : > { %9528 = vst [vmem:[#allocation336_spill] sm:$0xff] %v7562_v63  ;;  %3872 = vrot.lane.b32.xlu0 %v3500_v8, %s5403_s30  ;;  %v3503_v63 = vmul.f32 %v7048_v19, %v7277_v20  ;;  %v3508_v20 = vmul.f32 %v7040_v15, %v7272_v60 }
 0x40b   : > { %v7567_v55 = vpop.permute.xlu1 %3746 }
 0x40c   : > { %9529 = vst [vmem:[#allocation337_spill] sm:$0xff] %v7567_v55  ;;  %3870 = vrot.lane.b32.xlu1 %v3499_v51, %s5403_s30 }
 0x40d   : > { %v7572_v9 = vpop.permute.xlu0 %3756 }
 0x40e   : > { %9530 = vst [vmem:[#allocation338_spill] sm:$0xff] %v7572_v9  ;;  %3876 = vrot.lane.b32.xlu0 %v3502_v44, %s5403_s30  ;;  %v3505_v9 = vmul.f32 %v7048_v19, %v7262_v35  ;;  %v3510_v35 = vmul.f32 %v7040_v15, %v7297_v40 }
 0x40f   : > { %v7577_v17 = vpop.permute.xlu1 %3750 }
 0x410   : > { %9531 = vst [vmem:[#allocation339_spill] sm:$0xff] %v7577_v17  ;;  %3874 = vrot.lane.b32.xlu1 %v3501_v42, %s5403_s30 }
 0x411   : > { %v7582_v8 = vpop.permute.xlu0 %3760 }
 0x412   : > { %9532 = vst [vmem:[#allocation340_spill] sm:$0xff] %v7582_v8  ;;  %3880 = vrot.lane.b32.xlu0 %v3504_v53, %s5403_s30  ;;  %v3507_v8 = vmul.f32 %v7048_v19, %v7287_v14 }
 0x413   : > { %v7587_v51 = vpop.permute.xlu1 %3754 }
 0x414   : > { %9533 = vst [vmem:[#allocation341_spill] sm:$0xff] %v7587_v51  ;;  %3878 = vrot.lane.b32.xlu1 %v3503_v63, %s5403_s30 }
 0x415   : > { %v7592_v44 = vpop.permute.xlu0 %3764 }
 0x416   : > { %9534 = vst [vmem:[#allocation342_spill] sm:$0xff] %v7592_v44  ;;  %3884 = vrot.lane.b32.xlu0 %v3506_v57, %s5403_s30  ;;  %v3509_v44 = vmul.f32 %v7048_v19, %v7272_v60 }
 0x417   : > { %v7597_v42 = vpop.permute.xlu1 %3758 }
 0x418   : > { %9535 = vst [vmem:[#allocation343_spill] sm:$0xff] %v7597_v42  ;;  %3882 = vrot.lane.b32.xlu1 %v3505_v9, %s5403_s30 }
 0x419   : > { %v7602_v53 = vpop.permute.xlu0 %3768 }
 0x41a   : > { %9536 = vst [vmem:[#allocation344_spill] sm:$0xff] %v7602_v53  ;;  %3888 = vrot.lane.b32.xlu0 %v3508_v20, %s5403_s30  ;;  %v3511_v20 = vmul.f32 %v7048_v19, %v7297_v40 }
 0x41b   : > { %v7607_v63 = vpop.permute.xlu1 %3762 }
 0x41c   : > { %9537 = vst [vmem:[#allocation345_spill] sm:$0xff] %v7607_v63  ;;  %3886 = vrot.lane.b32.xlu1 %v3507_v8, %s5403_s30 }
 0x41d   : > { %v7612_v57 = vpop.permute.xlu0 %3772 }
 0x41e   : > { %9538 = vst [vmem:[#allocation346_spill] sm:$0xff] %v7612_v57  ;;  %3892 = vrot.lane.b32.xlu0 %v3510_v35, %s5403_s30 }
 0x41f   : > { %v7617_v9 = vpop.permute.xlu1 %3766 }
 0x420   : > { %9539 = vst [vmem:[#allocation347_spill] sm:$0xff] %v7617_v9  ;;  %3890 = vrot.lane.b32.xlu1 %v3509_v44, %s5403_s30 }
 0x421   : > { %v7620_v14 = vpop.permute.xlu0 %3776 }
 0x422   : > { %9540 = vst [vmem:[#allocation348_spill] sm:$0xff] %v7620_v14  ;;  %4090 = vperm.xlu0 %5296, %v5500_v18  }
 0x423   : > { %v7625_v15 = vpop.permute.xlu1 %3770 }
 0x424   : > { %9541 = vst [vmem:[#allocation349_spill] sm:$0xff] %v7625_v15  ;;  %3894 = vrot.lane.b32.xlu1 %v3511_v20, %s5403_s30  ;;  %v9563_v20 = vld [vmem:[#allocation9_spill] sm:$0xff] }
 0x425   : > { %v7628_v8 = vpop.permute.xlu0 %3780 }
 0x426   : > { %9542 = vst [vmem:[#allocation350_spill] sm:$0xff] %v7628_v8  ;;  %4102 = vperm.xlu0 %5296, %v5531_v34  }
 0x427   : > { %v7631_v60 = vpop.permute.xlu1 %3774 }
 0x428   : > { %9543 = vst [vmem:[#allocation351_spill] sm:$0xff] %v7631_v60  ;;  %4094 = vperm.xlu1 %5297, %v5518_v27  }
 0x429   : > { %v7634_v44 = vpop.permute.xlu0 %3784 }
 0x42a   : > { %9544 = vst [vmem:[#allocation352_spill] sm:$0xff] %v7634_v44  ;;  %4110 = vperm.xlu0 %5296, %v5513_v25  }
 0x42b   : > { %v7637_v35 = vpop.permute.xlu1 %3778 }
 0x42c   : > { %9545 = vst [vmem:[#allocation353_spill] sm:$0xff] %v7637_v35  ;;  %4098 = vperm.xlu1 %5297, %v5505_v22  }
 0x42d   : > { %v7640_v18 = vpop.permute.xlu0 %3788 }
 0x42e   : > { %9546 = vst [vmem:[#allocation354_spill] sm:$0xff] %v7640_v18  ;;  %4118 = vperm.xlu0 %5296, %v5540_v39  }
 0x42f   : > { %v7643_v40 = vpop.permute.xlu1 %3782 }
 0x430   : > { %9547 = vst [vmem:[#allocation355_spill] sm:$0xff] %v7643_v40  ;;  %4106 = vperm.xlu1 %5297, %v5508_v23  }
 0x431   : > { %v7646_v34 = vpop.permute.xlu0 %3792 }
 0x432   : > { %9548 = vst [vmem:[#allocation356_spill] sm:$0xff] %v7646_v34  ;;  %4126 = vperm.xlu0 %5296, %v5522_v29  }
 0x433   : > { %v7649_v27 = vpop.permute.xlu1 %3786 }
 0x434   : > { %9549 = vst [vmem:[#allocation357_spill] sm:$0xff] %v7649_v27  ;;  %4114 = vperm.xlu1 %5297, %v5526_v32  }
 0x435   : > { %v7652_v25 = vpop.permute.xlu0 %3796 }
 0x436   : > { %9550 = vst [vmem:[#allocation358_spill] sm:$0xff] %v7652_v25  ;;  %4134 = vperm.xlu0 %5296, %v5552_v45  }
 0x437   : > { %v7655_v22 = vpop.permute.xlu1 %3790 }
 0x438   : > { %9551 = vst [vmem:[#allocation359_spill] sm:$0xff] %v7655_v22  ;;  %4122 = vperm.xlu1 %5297, %v5536_v37  }
 0x439   : > { %v7658_v39 = vpop.permute.xlu0 %3800 }
 0x43a   : > { %9552 = vst [vmem:[#allocation360_spill] sm:$0xff] %v7658_v39  ;;  %4142 = vperm.xlu0 %5296, %v5562_v50  }
 0x43b   : > { %v7661_v23 = vpop.permute.xlu1 %3794 }
 0x43c   : > { %9553 = vst [vmem:[#allocation361_spill] sm:$0xff] %v7661_v23  ;;  %4130 = vperm.xlu1 %5297, %v5547_v43  }
 0x43d   : > { %v7664_v29 = vpop.permute.xlu0 %3804 }
 0x43e   : > { %9554 = vst [vmem:[#allocation362_spill] sm:$0xff] %v7664_v29  ;;  %4150 = vperm.xlu0 %5296, %v5571_v56   ;;  %v7818_v29 = vld [vmem:[%s6271_s28] sm:$0xff] }
 0x43f   : > { %v7667_v32 = vpop.permute.xlu1 %3798 }
 0x440   : > { %9555 = vst [vmem:[#allocation363_spill] sm:$0xff] %v7667_v32  ;;  %4138 = vperm.xlu1 %5297, %v5558_v48  }
 0x441   : > { %v7670_v45 = vpop.permute.xlu0 %3808 }
 0x442   : > { %9556 = vst [vmem:[#allocation364_spill] sm:$0xff] %v7670_v45  ;;  %4158 = vperm.xlu0 %5296, %v5581_v61   ;;  %v9567_v45 = vld [vmem:[#allocation11_spill] sm:$0xff] }
 0x443   : > { %v7673_v37 = vpop.permute.xlu1 %3802 }
 0x444   : > { %9557 = vst [vmem:[#allocation365_spill] sm:$0xff] %v7673_v37  ;;  %4146 = vperm.xlu1 %5297, %v5566_v54  }
 0x445   : > { %v7676_v50 = vpop.permute.xlu0 %3812 }
 0x446   : > { %9558 = vst [vmem:[#allocation366_spill] sm:$0xff] %v7676_v50  ;;  %4166 = vperm.xlu0 %5296, %v9413_v36   ;;  %v9565_v50 = vld [vmem:[#allocation6_spill] sm:$0xff] }
 0x447   : > { %v7679_v43 = vpop.permute.xlu1 %3806 }
 0x448   : > { %9559 = vst [vmem:[#allocation367_spill] sm:$0xff] %v7679_v43  ;;  %4154 = vperm.xlu1 %5297, %v5577_v59  }
 0x449   : > { %v7682_v56 = vpop.permute.xlu0 %3816 }
 0x44a   : > { %9560 = vst [vmem:[#allocation368_spill] sm:$0xff] %v7682_v56  ;;  %4174 = vperm.xlu0 %5296, %v9417_v3   ;;  %v9569_v56 = vld [vmem:[#allocation8_spill] sm:$0xff] }
 0x44b   : > { %v7685_v48 = vpop.permute.xlu1 %3810 }
 0x44c   : > { %9561 = vst [vmem:[#allocation369_spill] sm:$0xff] %v7685_v48  ;;  %4162 = vperm.xlu1 %5297, %v5588_v1   ;;  %v9571_v48 = vld [vmem:[#allocation13_spill] sm:$0xff] }
 0x44d   : > { %v7688_v61 = vpop.permute.xlu0 %3820 }
 0x44e   : > { %9562 = vst [vmem:[#allocation370_spill] sm:$0xff] %v7688_v61  ;;  %4182 = vperm.xlu0 %5296, %v9563_v20   ;;  %v9573_v61 = vld [vmem:[#allocation10_spill] sm:$0xff] }
 0x44f   : > { %v7691_v54 = vpop.permute.xlu1 %3814 }
 0x450   : > { %9564 = vst [vmem:[#allocation9_spill] sm:$0xff] %v7691_v54  ;;  %4170 = vperm.xlu1 %5297, %v9565_v50   ;;  %v9575_v54 = vld [vmem:[#allocation15_spill] sm:$0xff] }
 0x451   : > { %v7694_v36 = vpop.permute.xlu0 %3824 }
 0x452   : > { %9566 = vst [vmem:[#allocation6_spill] sm:$0xff] %v7694_v36  ;;  %4190 = vperm.xlu0 %5296, %v9567_v45   ;;  %v9577_v36 = vld [vmem:[#allocation12_spill] sm:$0xff] }
 0x453   : > { %v7697_v59 = vpop.permute.xlu1 %3818 }
 0x454   : > { %9568 = vst [vmem:[#allocation11_spill] sm:$0xff] %v7697_v59  ;;  %4178 = vperm.xlu1 %5297, %v9569_v56   ;;  %v9579_v59 = vld [vmem:[#allocation17_spill] sm:$0xff] }
 0x455   : > { %v7700_v3 = vpop.permute.xlu0 %3828 }
 0x456   : > { %9570 = vst [vmem:[#allocation8_spill] sm:$0xff] %v7700_v3  ;;  %4198 = vperm.xlu0 %5296, %v9571_v48   ;;  %v9581_v3 = vld [vmem:[#allocation14_spill] sm:$0xff] }
 0x457   : > { %v7703_v1 = vpop.permute.xlu1 %3822 }
 0x458   : > { %9572 = vst [vmem:[#allocation13_spill] sm:$0xff] %v7703_v1  ;;  %4186 = vperm.xlu1 %5297, %v9573_v61   ;;  %v9583_v1 = vld [vmem:[#allocation19_spill] sm:$0xff] }
 0x459   : > { %v7706_v20 = vpop.permute.xlu0 %3832 }
 0x45a   : > { %9574 = vst [vmem:[#allocation10_spill] sm:$0xff] %v7706_v20  ;;  %4206 = vperm.xlu0 %5296, %v9575_v54   ;;  %v9585_v20 = vld [vmem:[#allocation16_spill] sm:$0xff] }
 0x45b   : > { %v7709_v50 = vpop.permute.xlu1 %3826 }
 0x45c   : > { %9576 = vst [vmem:[#allocation15_spill] sm:$0xff] %v7709_v50  ;;  %4194 = vperm.xlu1 %5297, %v9577_v36   ;;  %v9587_v50 = vld [vmem:[#allocation21_spill] sm:$0xff] }
 0x45d   : > { %v7712_v45 = vpop.permute.xlu0 %3836 }
 0x45e   : > { %9578 = vst [vmem:[#allocation12_spill] sm:$0xff] %v7712_v45  ;;  %4214 = vperm.xlu0 %5296, %v9579_v59   ;;  %v9589_v45 = vld [vmem:[#allocation18_spill] sm:$0xff] }
 0x45f   : > { %v7715_v56 = vpop.permute.xlu1 %3830 }
 0x460   : > { %9580 = vst [vmem:[#allocation17_spill] sm:$0xff] %v7715_v56  ;;  %4202 = vperm.xlu1 %5297, %v9581_v3   ;;  %v9591_v56 = vld [vmem:[#allocation23_spill] sm:$0xff] }
 0x461   : > { %v7718_v48 = vpop.permute.xlu0 %3840 }
 0x462   : > { %9582 = vst [vmem:[#allocation14_spill] sm:$0xff] %v7718_v48  ;;  %4222 = vperm.xlu0 %5296, %v9583_v1   ;;  %v9593_v48 = vld [vmem:[#allocation20_spill] sm:$0xff] }
 0x463   : > { %v7721_v61 = vpop.permute.xlu1 %3834 }
 0x464   : > { %9584 = vst [vmem:[#allocation19_spill] sm:$0xff] %v7721_v61  ;;  %4210 = vperm.xlu1 %5297, %v9585_v20   ;;  %v9595_v61 = vld [vmem:[#allocation25_spill] sm:$0xff] }
 0x465   : > { %v7724_v54 = vpop.permute.xlu0 %3844 }
 0x466   : > { %9586 = vst [vmem:[#allocation16_spill] sm:$0xff] %v7724_v54  ;;  %4230 = vperm.xlu0 %5296, %v9587_v50   ;;  %v9597_v54 = vld [vmem:[#allocation22_spill] sm:$0xff] }
 0x467   : > { %v7727_v36 = vpop.permute.xlu1 %3838 }
 0x468   : > { %9588 = vst [vmem:[#allocation21_spill] sm:$0xff] %v7727_v36  ;;  %4218 = vperm.xlu1 %5297, %v9589_v45   ;;  %v9599_v36 = vld [vmem:[#allocation27_spill] sm:$0xff] }
 0x469   : > { %v7730_v59 = vpop.permute.xlu0 %3848 }
 0x46a   : > { %9590 = vst [vmem:[#allocation18_spill] sm:$0xff] %v7730_v59  ;;  %4238 = vperm.xlu0 %5296, %v9591_v56   ;;  %v9601_v59 = vld [vmem:[#allocation24_spill] sm:$0xff] }
 0x46b   : > { %v7733_v3 = vpop.permute.xlu1 %3842 }
 0x46c   : > { %9592 = vst [vmem:[#allocation23_spill] sm:$0xff] %v7733_v3  ;;  %4226 = vperm.xlu1 %5297, %v9593_v48   ;;  %v9603_v3 = vld [vmem:[#allocation29_spill] sm:$0xff] }
 0x46d   : > { %v7736_v1 = vpop.permute.xlu0 %3852 }
 0x46e   : > { %9594 = vst [vmem:[#allocation20_spill] sm:$0xff] %v7736_v1  ;;  %4246 = vperm.xlu0 %5296, %v9595_v61   ;;  %v9605_v1 = vld [vmem:[#allocation26_spill] sm:$0xff] }
 0x46f   : > { %v7739_v20 = vpop.permute.xlu1 %3846 }
 0x470   : > { %9596 = vst [vmem:[#allocation25_spill] sm:$0xff] %v7739_v20  ;;  %4234 = vperm.xlu1 %5297, %v9597_v54   ;;  %v9607_v20 = vld [vmem:[#allocation31_spill] sm:$0xff] }
 0x471   : > { %v7742_v50 = vpop.permute.xlu0 %3856 }
 0x472   : > { %9598 = vst [vmem:[#allocation22_spill] sm:$0xff] %v7742_v50  ;;  %4254 = vperm.xlu0 %5296, %v9599_v36   ;;  %v9609_v50 = vld [vmem:[#allocation28_spill] sm:$0xff] }
 0x473   : > { %v7745_v45 = vpop.permute.xlu1 %3850 }
 0x474   : > { %9600 = vst [vmem:[#allocation27_spill] sm:$0xff] %v7745_v45  ;;  %4242 = vperm.xlu1 %5297, %v9601_v59   ;;  %v9611_v45 = vld [vmem:[#allocation33_spill] sm:$0xff] }
 0x475   : > { %v7748_v56 = vpop.permute.xlu0 %3860 }
 0x476   : > { %9602 = vst [vmem:[#allocation24_spill] sm:$0xff] %v7748_v56  ;;  %4262 = vperm.xlu0 %5296, %v9603_v3   ;;  %v9613_v56 = vld [vmem:[#allocation30_spill] sm:$0xff] }
 0x477   : > { %v7751_v48 = vpop.permute.xlu1 %3854 }
 0x478   : > { %9604 = vst [vmem:[#allocation29_spill] sm:$0xff] %v7751_v48  ;;  %4250 = vperm.xlu1 %5297, %v9605_v1   ;;  %v9615_v48 = vld [vmem:[#allocation35_spill] sm:$0xff] }
 0x479   : > { %v7754_v61 = vpop.permute.xlu0 %3864 }
 0x47a   : > { %9606 = vst [vmem:[#allocation26_spill] sm:$0xff] %v7754_v61  ;;  %4270 = vperm.xlu0 %5296, %v9607_v20   ;;  %v9617_v61 = vld [vmem:[#allocation32_spill] sm:$0xff] }
 0x47b   : > { %v7757_v54 = vpop.permute.xlu1 %3858 }
 0x47c   : > { %9608 = vst [vmem:[#allocation31_spill] sm:$0xff] %v7757_v54  ;;  %4258 = vperm.xlu1 %5297, %v9609_v50   ;;  %v9619_v54 = vld [vmem:[#allocation37_spill] sm:$0xff] }
 0x47d   : > { %v7760_v36 = vpop.permute.xlu0 %3868 }
 0x47e   : > { %9610 = vst [vmem:[#allocation28_spill] sm:$0xff] %v7760_v36  ;;  %4278 = vperm.xlu0 %5296, %v9611_v45   ;;  %v9621_v36 = vld [vmem:[#allocation34_spill] sm:$0xff] }
 0x47f   : > { %v7763_v59 = vpop.permute.xlu1 %3862 }
 0x480   : > { %9612 = vst [vmem:[#allocation33_spill] sm:$0xff] %v7763_v59  ;;  %4266 = vperm.xlu1 %5297, %v9613_v56   ;;  %v9623_v59 = vld [vmem:[#allocation39_spill] sm:$0xff] }
 0x481   : > { %v7766_v3 = vpop.permute.xlu0 %3872 }
 0x482   : > { %9614 = vst [vmem:[#allocation30_spill] sm:$0xff] %v7766_v3  ;;  %4286 = vperm.xlu0 %5296, %v9615_v48   ;;  %v9625_v3 = vld [vmem:[#allocation36_spill] sm:$0xff] }
 0x483   : > { %v7769_v1 = vpop.permute.xlu1 %3866 }
 0x484   : > { %9616 = vst [vmem:[#allocation35_spill] sm:$0xff] %v7769_v1  ;;  %4274 = vperm.xlu1 %5297, %v9617_v61   ;;  %v9627_v1 = vld [vmem:[#allocation41_spill] sm:$0xff] }
 0x485   : > { %v7772_v20 = vpop.permute.xlu0 %3876 }
 0x486   : > { %9618 = vst [vmem:[#allocation32_spill] sm:$0xff] %v7772_v20  ;;  %4294 = vperm.xlu0 %5296, %v9619_v54   ;;  %v9629_v20 = vld [vmem:[#allocation38_spill] sm:$0xff]  ;;  %v9630_v54 = vld [vmem:[#allocation43_spill] sm:$0xff] }
 0x487   : > { %v7775_v50 = vpop.permute.xlu1 %3870 }
 0x488   : > { %9620 = vst [vmem:[#allocation37_spill] sm:$0xff] %v7775_v50  ;;  %4282 = vperm.xlu1 %5297, %v9621_v36  }
 0x489   : > { %v7778_v45 = vpop.permute.xlu0 %3880 }
 0x48a   : > { %9622 = vst [vmem:[#allocation34_spill] sm:$0xff] %v7778_v45  ;;  %4302 = vperm.xlu0 %5296, %v9623_v59   ;;  %v9633_v45 = vld [vmem:[#allocation40_spill] sm:$0xff]  ;;  %v9634_v59 = vld [vmem:[#allocation45_spill] sm:$0xff] }
 0x48b   : > { %v7781_v56 = vpop.permute.xlu1 %3874 }
 0x48c   : > { %9624 = vst [vmem:[#allocation39_spill] sm:$0xff] %v7781_v56  ;;  %4290 = vperm.xlu1 %5297, %v9625_v3   ;;  %v9643_v56 = vld [vmem:[#allocation46_spill] sm:$0xff] }
 0x48d   : > { %v7784_v48 = vpop.permute.xlu0 %3884 }
 0x48e   : > { %9626 = vst [vmem:[#allocation36_spill] sm:$0xff] %v7784_v48  ;;  %4310 = vperm.xlu0 %5296, %v9627_v1   ;;  %v9636_v48 = vld [vmem:[#allocation42_spill] sm:$0xff] }
 0x48f   : > { %v7787_v61 = vpop.permute.xlu1 %3878 }
 0x490   : > { %9628 = vst [vmem:[#allocation41_spill] sm:$0xff] %v7787_v61  ;;  %4298 = vperm.xlu1 %5297, %v9629_v20   ;;  %v9638_v61 = vld [vmem:[#allocation47_spill] sm:$0xff] }
 0x491   : > { %v7791_v50 = vpop.permute.xlu0 %3888 }
 0x492   : > { %4318 = vperm.xlu0 %5296, %v9630_v54   ;;  %9631 = vst [vmem:[#allocation38_spill] sm:$0xff] %v7791_v50  ;;  %v9640_v54 = vld [vmem:[#allocation44_spill] sm:$0xff] }
 0x493   : > { %v7793_v36 = vpop.permute.xlu1 %3882 }
 0x494   : > { %9632 = vst [vmem:[#allocation43_spill] sm:$0xff] %v7793_v36  ;;  %4306 = vperm.xlu1 %5297, %v9633_v45   ;;  %v9641_v45 = vld [vmem:[#allocation49_spill] sm:$0xff] }
 0x495   : > { %v7800_v1 = vpop.permute.xlu0 %3892 }
 0x496   : > { %4326 = vperm.xlu0 %5296, %v9634_v59   ;;  %9637 = vst [vmem:[#allocation45_spill] sm:$0xff] %v7800_v1 }
 0x497   : > { %v7797_v3 = vpop.permute.xlu1 %3886 }
 0x498   : > { %9635 = vst [vmem:[#allocation40_spill] sm:$0xff] %v7797_v3  ;;  %4314 = vperm.xlu1 %5297, %v9636_v48  }
 0x49a   : > { %4334 = vperm.xlu0 %5296, %v9638_v61   ;;  %v7813_v61 = vld [vmem:[%s6271_s28 + $0x8] sm:$0xff] }
 0x49b   : > { %v7803_v20 = vpop.permute.xlu1 %3890 }
 0x49c   : > { %9639 = vst [vmem:[#allocation42_spill] sm:$0xff] %v7803_v20  ;;  %4322 = vperm.xlu1 %5297, %v9640_v54   ;;  %v9644_v20 = vld [vmem:[#allocation48_spill] sm:$0xff] }
 0x49d   : > { %v4091_v50 = vpop.permute.xlu0 %4090 }
 0x49e   : > { %v4346_v36 = vmul.f32 %v7048_v19, %v4091_v50  ;;  %4342 = vperm.xlu0 %5296, %v9641_v45   ;;  %v4345_v19 = vmul.f32 %v7818_v29, %v4091_v50 }
 0x49f   : > { %v7808_v59 = vpop.permute.xlu1 %3894 }
 0x4a0   : > { %9642 = vst [vmem:[#allocation47_spill] sm:$0xff] %v7808_v59  ;;  %4330 = vperm.xlu1 %5297, %v9643_v56  }
 0x4a1   : > { %v4103_v3 = vpop.permute.xlu0 %4102 }
 0x4a2   : > { %4603 = vrot.lane.b32.xlu0 %v4346_v36, %s5405_s4 }
 0x4a3   : > { %v4095_v48 = vpop.permute.xlu1 %4094 }
 0x4a4   : > { %v4348_v1 = vmul.f32 %v7813_v61, %v4095_v48  ;;  %4338 = vperm.xlu1 %5297, %v9644_v20   ;;  %v4347_v59 = vmul.f32 %v7818_v29, %v4095_v48  ;;  %v4352_v20 = vmul.f32 %v7813_v61, %v4103_v3  ;;  %v4351_v48 = vmul.f32 %v7818_v29, %v4103_v3 }
 0x4a5   : > { %v4111_v54 = vpop.permute.xlu0 %4110 }
 0x4a6   : > { %4607 = vrot.lane.b32.xlu0 %v4348_v1, %s5405_s4  ;;  %v4356_v25 = vmul.f32 %v7813_v61, %v4111_v54  ;;  %v4355_v3 = vmul.f32 %v7818_v29, %v4111_v54 }
 0x4a7   : > { %v4099_v45 = vpop.permute.xlu1 %4098 }
 0x4a8   : > { %v4350_v56 = vmul.f32 %v7813_v61, %v4099_v45  ;;  %4601 = vrot.lane.b32.xlu1 %v4345_v19, %s5405_s4  ;;  %v4349_v50 = vmul.f32 %v7818_v29, %v4099_v45 }
 0x4a9   : > { %v4119_v36 = vpop.permute.xlu0 %4118 }
 0x4aa   : > { %4611 = vrot.lane.b32.xlu0 %v4350_v56, %s5405_s4  ;;  %v4360_v34 = vmul.f32 %v7813_v61, %v4119_v36 }
 0x4ab   : > { %v4107_v43 = vpop.permute.xlu1 %4106 }
 0x4ac   : > { %4605 = vrot.lane.b32.xlu1 %v4347_v59, %s5405_s4  ;;  %v4354_v37 = vmul.f32 %v7813_v61, %v4107_v43  ;;  %v4353_v45 = vmul.f32 %v7818_v29, %v4107_v43 }
 0x4ad   : > { %v4127_v39 = vpop.permute.xlu0 %4126 }
 0x4ae   : > { %4615 = vrot.lane.b32.xlu0 %v4352_v20, %s5405_s4 }
 0x4af   : > { %v4115_v1 = vpop.permute.xlu1 %4114 }
 0x4b0   : > { %4609 = vrot.lane.b32.xlu1 %v4349_v50, %s5405_s4  ;;  %v4358_v32 = vmul.f32 %v7813_v61, %v4115_v1  ;;  %v4357_v43 = vmul.f32 %v7818_v29, %v4115_v1 }
 0x4b1   : > { %v4135_v19 = vpop.permute.xlu0 %4134 }
 0x4b2   : > { %4619 = vrot.lane.b32.xlu0 %v4354_v37, %s5405_s4 }
 0x4b3   : > { %v4123_v56 = vpop.permute.xlu1 %4122 }
 0x4b4   : > { %4613 = vrot.lane.b32.xlu1 %v4351_v48, %s5405_s4  ;;  %v4362_v23 = vmul.f32 %v7813_v61, %v4123_v56 }
 0x4b5   : > { %v4143_v59 = vpop.permute.xlu0 %4142 }
 0x4b6   : > { %4623 = vrot.lane.b32.xlu0 %v4356_v25, %s5405_s4 }
 0x4b7   : > { %v4131_v20 = vpop.permute.xlu1 %4130 }
 0x4b8   : > { %4617 = vrot.lane.b32.xlu1 %v4353_v45, %s5405_s4 }
 0x4b9   : > { %v4151_v50 = vpop.permute.xlu0 %4150 }
 0x4ba   : > { %4627 = vrot.lane.b32.xlu0 %v4358_v32, %s5405_s4  ;;  %v4359_v32 = vmul.f32 %v7818_v29, %v4119_v36 }
 0x4bb   : > { %v4139_v37 = vpop.permute.xlu1 %4138 }
 0x4bc   : > { %4621 = vrot.lane.b32.xlu1 %v4355_v3, %s5405_s4  ;;  %v4364_v3 = vmul.f32 %v7813_v61, %v4127_v39 }
 0x4bd   : > { %v7844_v48 = vpop.permute.xlu0 %4158 }
 0x4be   : > { %4631 = vrot.lane.b32.xlu0 %v4360_v34, %s5405_s4  ;;  %v4361_v34 = vmul.f32 %v7818_v29, %v4123_v56 }
 0x4bf   : > { %v4147_v25 = vpop.permute.xlu1 %4146 }
 0x4c0   : > { %4625 = vrot.lane.b32.xlu1 %v4357_v43, %s5405_s4  ;;  %v4366_v43 = vmul.f32 %v7813_v61, %v4131_v20 }
 0x4c1   : > { %v7850_v45 = vpop.permute.xlu0 %4166 }
 0x4c2   : > { %4635 = vrot.lane.b32.xlu0 %v4362_v23, %s5405_s4  ;;  %v4363_v23 = vmul.f32 %v7818_v29, %v4127_v39  ;;  %v4383_v53 = vmul.f32 %v7818_v29, %v7850_v45 }
 0x4c3   : > { %v4155_v54 = vpop.permute.xlu1 %4154 }
 0x4c4   : > { %4629 = vrot.lane.b32.xlu1 %v4359_v32, %s5405_s4  ;;  %v4368_v32 = vmul.f32 %v7813_v61, %v4135_v19 }
 0x4c5   : > { %v7856_v18 = vpop.permute.xlu0 %4174 }
 0x4c6   : > { %4639 = vrot.lane.b32.xlu0 %v4364_v3, %s5405_s4  ;;  %v4365_v3 = vmul.f32 %v7818_v29, %v4131_v20  ;;  %v4387_v9 = vmul.f32 %v7818_v29, %v7856_v18 }
 0x4c7   : > { %v4163_v1 = vpop.permute.xlu1 %4162 }
 0x4c8   : > { %4633 = vrot.lane.b32.xlu1 %v4361_v34, %s5405_s4  ;;  %v4370_v34 = vmul.f32 %v7813_v61, %v4139_v37  ;;  %v4382_v57 = vmul.f32 %v7813_v61, %v4163_v1  ;;  %v4381_v60 = vmul.f32 %v7818_v29, %v4163_v1  ;;  %v4388_v1 = vmul.f32 %v7813_v61, %v7856_v18 }
 0x4c9   : > { %v7862_v22 = vpop.permute.xlu0 %4182 }
 0x4ca   : > { %4643 = vrot.lane.b32.xlu0 %v4366_v43, %s5405_s4  ;;  %v4367_v43 = vmul.f32 %v7818_v29, %v4135_v19  ;;  %v4391_v42 = vmul.f32 %v7818_v29, %v7862_v22 }
 0x4cb   : > { %v7866_v36 = vpop.permute.xlu1 %4170 }
 0x4cc   : > { %4637 = vrot.lane.b32.xlu1 %v4363_v23, %s5405_s4  ;;  %v4372_v23 = vmul.f32 %v7813_v61, %v4143_v59  ;;  %v4385_v15 = vmul.f32 %v7818_v29, %v7866_v36 }
 0x4cd   : > { %v7870_v56 = vpop.permute.xlu0 %4190 }
 0x4ce   : > { %4647 = vrot.lane.b32.xlu0 %v4368_v32, %s5405_s4  ;;  %v4369_v32 = vmul.f32 %v7818_v29, %v4139_v37  ;;  %v4395_v17 = vmul.f32 %v7818_v29, %v7870_v56 }
 0x4cf   : > { %v7874_v44 = vpop.permute.xlu1 %4178 }
 0x4d0   : > { %4641 = vrot.lane.b32.xlu1 %v4365_v3, %s5405_s4  ;;  %v4374_v3 = vmul.f32 %v7813_v61, %v4147_v25  ;;  %v4389_v63 = vmul.f32 %v7818_v29, %v7874_v44 }
 0x4d1   : > { %v7878_v39 = vpop.permute.xlu0 %4198 }
 0x4d2   : > { %4651 = vrot.lane.b32.xlu0 %v4370_v34, %s5405_s4  ;;  %v4371_v34 = vmul.f32 %v7818_v29, %v4143_v59  ;;  %v4399_v5 = vmul.f32 %v7818_v29, %v7878_v39 }
 0x4d3   : > { %v7882_v27 = vpop.permute.xlu1 %4186 }
 0x4d4   : > { %4645 = vrot.lane.b32.xlu1 %v4367_v43, %s5405_s4  ;;  %v4376_v43 = vmul.f32 %v7813_v61, %v4151_v50  ;;  %v4394_v18 = vmul.f32 %v7813_v61, %v7882_v27  ;;  %v4393_v51 = vmul.f32 %v7818_v29, %v7882_v27  ;;  %v4400_v27 = vmul.f32 %v7813_v61, %v7878_v39 }
 0x4d5   : > { %v7886_v20 = vpop.permute.xlu0 %4206 }
 0x4d6   : > { %4655 = vrot.lane.b32.xlu0 %v4372_v23, %s5405_s4  ;;  %v4373_v23 = vmul.f32 %v7818_v29, %v4147_v25 }
 0x4d7   : > { %v7890_v8 = vpop.permute.xlu1 %4194 }
 0x4d8   : > { %4649 = vrot.lane.b32.xlu1 %v4369_v32, %s5405_s4  ;;  %v4378_v32 = vmul.f32 %v7813_v61, %v4155_v54  ;;  %v4397_v55 = vmul.f32 %v7818_v29, %v7890_v8 }
 0x4d9   : > { %v7894_v19 = vpop.permute.xlu0 %4214 }
 0x4da   : > { %4659 = vrot.lane.b32.xlu0 %v4374_v3, %s5405_s4  ;;  %v4375_v3 = vmul.f32 %v7818_v29, %v4151_v50 }
 0x4db   : > { %v7898_v40 = vpop.permute.xlu1 %4202 }
 0x4dc   : > { %4653 = vrot.lane.b32.xlu1 %v4371_v34, %s5405_s4  ;;  %v4380_v34 = vmul.f32 %v7813_v61, %v7844_v48 }
 0x4dd   : > { %v7902_v37 = vpop.permute.xlu0 %4222 }
 0x4de   : > { %4663 = vrot.lane.b32.xlu0 %v4376_v43, %s5405_s4  ;;  %v4377_v43 = vmul.f32 %v7818_v29, %v4155_v54  ;;  %v4384_v54 = vmul.f32 %v7813_v61, %v7850_v45  ;;  %v4390_v45 = vmul.f32 %v7813_v61, %v7874_v44  ;;  %v4396_v44 = vmul.f32 %v7813_v61, %v7870_v56 }
 0x4df   : > { %v7906_v14 = vpop.permute.xlu1 %4210  ;;  %v4402_v56 = vmul.f32 %v7813_v61, %v7898_v40 }
 0x4e0   : > { %4657 = vrot.lane.b32.xlu1 %v4373_v23, %s5405_s4  ;;  %v4406_v39 = vmul.f32 %v7813_v61, %v7906_v14 }
 0x4e1   : > { %v7910_v59 = vpop.permute.xlu0 %4230 }
 0x4e2   : > { %4667 = vrot.lane.b32.xlu0 %v4378_v32, %s5405_s4  ;;  %v4379_v32 = vmul.f32 %v7818_v29, %v7844_v48  ;;  %v4386_v48 = vmul.f32 %v7813_v61, %v7866_v36  ;;  %v4392_v36 = vmul.f32 %v7813_v61, %v7862_v22  ;;  %v4398_v22 = vmul.f32 %v7813_v61, %v7890_v8 }
 0x4e3   : > { %v7914_v35 = vpop.permute.xlu1 %4218  ;;  %v4404_v8 = vmul.f32 %v7813_v61, %v7886_v20 }
 0x4e4   : > { %4661 = vrot.lane.b32.xlu1 %v4375_v3, %s5405_s4 }
 0x4e5   : > { %v7919_v25 = vpop.permute.xlu0 %4238 }
 0x4e6   : > { %4671 = vrot.lane.b32.xlu0 %v4380_v34, %s5405_s4 }
 0x4e7   : > { %v7923_v23 = vpop.permute.xlu1 %4226 }
 0x4e8   : > { %4665 = vrot.lane.b32.xlu1 %v4377_v43, %s5405_s4 }
 0x4e9   : > { %v7927_v50 = vpop.permute.xlu0 %4246 }
 0x4ea   : > { %4675 = vrot.lane.b32.xlu0 %v4382_v57, %s5405_s4 }
 0x4eb   : > { %v7932_v3 = vpop.permute.xlu1 %4234 }
 0x4ec   : > { %4669 = vrot.lane.b32.xlu1 %v4379_v32, %s5405_s4 }
 0x4ed   : > { %v7937_v34 = vpop.permute.xlu0 %4254 }
 0x4ee   : > { %4679 = vrot.lane.b32.xlu0 %v4384_v54, %s5405_s4 }
 0x4ef   : > { %v7941_v43 = vpop.permute.xlu1 %4242 }
 0x4f0   : > { %4673 = vrot.lane.b32.xlu1 %v4381_v60, %s5405_s4 }
 0x4f1   : > { %v7946_v57 = vpop.permute.xlu0 %4262 }
 0x4f2   : > { %4683 = vrot.lane.b32.xlu0 %v4386_v48, %s5405_s4 }
 0x4f3   : > { %v7951_v32 = vpop.permute.xlu1 %4250 }
 0x4f4   : > { %4677 = vrot.lane.b32.xlu1 %v4383_v53, %s5405_s4 }
 0x4f5   : > { %v7956_v54 = vpop.permute.xlu0 %4270 }
 0x4f6   : > { %4687 = vrot.lane.b32.xlu0 %v4388_v1, %s5405_s4 }
 0x4f7   : > { %v7961_v60 = vpop.permute.xlu1 %4258 }
 0x4f8   : > { %4681 = vrot.lane.b32.xlu1 %v4385_v15, %s5405_s4 }
 0x4f9   : > { %v7966_v48 = vpop.permute.xlu0 %4278 }
 0x4fa   : > { %4691 = vrot.lane.b32.xlu0 %v4390_v45, %s5405_s4 }
 0x4fb   : > { %v7971_v53 = vpop.permute.xlu1 %4266 }
 0x4fc   : > { %4685 = vrot.lane.b32.xlu1 %v4387_v9, %s5405_s4 }
 0x4fd   : > { %v7976_v1 = vpop.permute.xlu0 %4286 }
 0x4fe   : > { %4695 = vrot.lane.b32.xlu0 %v4392_v36, %s5405_s4 }
 0x4ff   : > { %v7981_v15 = vpop.permute.xlu1 %4274 }
 0x500   : > { %4689 = vrot.lane.b32.xlu1 %v4389_v63, %s5405_s4 }
 0x501   : > { %v7986_v45 = vpop.permute.xlu0 %4294 }
 0x502   : > { %4699 = vrot.lane.b32.xlu0 %v4394_v18, %s5405_s4 }
 0x503   : > { %v7991_v9 = vpop.permute.xlu1 %4282 }
 0x504   : > { %4693 = vrot.lane.b32.xlu1 %v4391_v42, %s5405_s4 }
 0x505   : > { %v7996_v36 = vpop.permute.xlu0 %4302 }
 0x506   : > { %9645 = vst [vmem:[#allocation44_spill] sm:$0xff] %v7996_v36  ;;  %4703 = vrot.lane.b32.xlu0 %v4396_v44, %s5405_s4 }
 0x507   : > { %v8001_v63 = vpop.permute.xlu1 %4290 }
 0x508   : > { %4697 = vrot.lane.b32.xlu1 %v4393_v51, %s5405_s4 }
 0x509   : > { %v8006_v18 = vpop.permute.xlu0 %4310 }
 0x50a   : > { %9646 = vst [vmem:[#allocation49_spill] sm:$0xff] %v8006_v18  ;;  %4707 = vrot.lane.b32.xlu0 %v4398_v22, %s5405_s4  ;;  %v4410_v18 = vmul.f32 %v7813_v61, %v7914_v35 }
 0x50b   : > { %v8011_v42 = vpop.permute.xlu1 %4298 }
 0x50c   : > { %4701 = vrot.lane.b32.xlu1 %v4395_v17, %s5405_s4 }
 0x50d   : > { %v8016_v44 = vpop.permute.xlu0 %4318 }
 0x50e   : > { %9647 = vst [vmem:[#allocation46_spill] sm:$0xff] %v8016_v44  ;;  %4711 = vrot.lane.b32.xlu0 %v4400_v27, %s5405_s4  ;;  %v4401_v44 = vmul.f32 %v7818_v29, %v7898_v40  ;;  %v4408_v40 = vmul.f32 %v7813_v61, %v7894_v19 }
 0x50f   : > { %v8021_v51 = vpop.permute.xlu1 %4306 }
 0x510   : > { %9648 = vst [vmem:[#allocation48_spill] sm:$0xff] %v8021_v51  ;;  %4705 = vrot.lane.b32.xlu1 %v4397_v55, %s5405_s4 }
 0x511   : > { %v8026_v22 = vpop.permute.xlu0 %4326 }
 0x512   : > { %9649 = vst [vmem:[#allocation371_spill] sm:$0xff] %v8026_v22  ;;  %4715 = vrot.lane.b32.xlu0 %v4402_v56, %s5405_s4 }
 0x513   : > { %v8031_v17 = vpop.permute.xlu1 %4314 }
 0x514   : > { %9650 = vst [vmem:[#allocation372_spill] sm:$0xff] %v8031_v17  ;;  %4709 = vrot.lane.b32.xlu1 %v4399_v5, %s5405_s4  ;;  %v4403_v5 = vmul.f32 %v7818_v29, %v7886_v20 }
 0x515   : > { %v8036_v27 = vpop.permute.xlu0 %4334 }
 0x516   : > { %9651 = vst [vmem:[#allocation373_spill] sm:$0xff] %v8036_v27  ;;  %4719 = vrot.lane.b32.xlu0 %v4404_v8, %s5405_s4  ;;  %v9655_v8 = vld [vmem:[#allocation50_spill] sm:$0xff] }
 0x517   : > { %v8041_v55 = vpop.permute.xlu1 %4322  ;;  %v1127_v22 = vmul.f32 %v7818_v29, %v9655_v8 }
 0x518   : > { %9652 = vst [vmem:[#allocation374_spill] sm:$0xff] %v8041_v55  ;;  %4713 = vrot.lane.b32.xlu1 %v4401_v44, %s5405_s4  ;;  %v9657_v55 = vld [vmem:[#allocation179_spill] sm:$0xff] }
 0x519   : > { %v8046_v56 = vpop.permute.xlu0 %4342 }
 0x51a   : > { %9653 = vst [vmem:[#allocation375_spill] sm:$0xff] %v8046_v56  ;;  %4723 = vrot.lane.b32.xlu0 %v4406_v39, %s5405_s4  ;;  %v9656_v56 = vld [vmem:[#allocation178_spill] sm:$0xff]  ;;  %v4405_v39 = vmul.f32 %v7818_v29, %v7906_v14 }
 0x51b   : > { %v8051_v27 = vpop.permute.xlu1 %4330  ;;  %v2936_v20 = vsel %vm2935_vm0, %v9657_v55, %v9656_v56  ;;  %v9661_v55 = vld [vmem:[#allocation54_spill] sm:$0xff] }
 0x51c   : > { %9654 = vst [vmem:[#allocation376_spill] sm:$0xff] %v8051_v27  ;;  %4717 = vrot.lane.b32.xlu1 %v4403_v5, %s5405_s4  ;;  %v9658_v27 = vld [vmem:[#allocation114_spill] sm:$0xff]  ;;  %v9660_v5 = vld [vmem:[#allocation304_spill] sm:$0xff]  ;;  %v1128_v56 = vmul.f32 %v7818_v29, %v9661_v55  ;;  %v9665_v55 = vld [vmem:[#allocation305_spill] sm:$0xff] }
 0x51d   : > { %v4604_v44 = vpop.permute.xlu0 %4603  ;;  %v2103_v17 = vadd.f32 %v9658_v27, %v1127_v22  ;;  %v3897_v8 = vsel %vm3896_vm1, %v9660_v5, %v7307_v52  ;;  %v9662_v22 = vld [vmem:[#allocation180_spill] sm:$0xff]  ;;  %v9663_v27 = vld [vmem:[#allocation181_spill] sm:$0xff]  ;;  %v4407_v52 = vmul.f32 %v7818_v29, %v7894_v19  ;;  %v9664_v5 = vld [vmem:[#allocation115_spill] sm:$0xff] }
 0x51e   : > { %4727 = vrot.lane.b32.xlu0 %v4408_v40, %s5405_s4  ;;  %v2937_v40 = vsel %vm2935_vm0, %v9663_v27, %v9662_v22  ;;  %v9666_v22 = vld [vmem:[#allocation51_spill] sm:$0xff] }
 0x51f   : > { %v8066_v28 = vpop.permute.xlu1 %4338  ;;  %v3064_v14 = vadd.f32 %v2936_v20, %v2103_v17  ;;  %v3898_v17 = vsel %vm3896_vm1, %v9665_v55, %v7317_v41  ;;  %v4412_v20 = vmul.f32 %v7813_v61, %v7902_v37  ;;  %v1129_v19 = vmul.f32 %v7818_v29, %v9666_v22 }
 0x520   : > { %9659 = vst [vmem:[#allocation50_spill] sm:$0xff] %v8066_v28  ;;  %4721 = vrot.lane.b32.xlu1 %v4405_v39, %s5405_s4  ;;  %v2104_v28 = vadd.f32 %v9664_v5, %v1128_v56  ;;  %v9667_v56 = vld [vmem:[#allocation182_spill] sm:$0xff]  ;;  %v4409_v41 = vmul.f32 %v7818_v29, %v7914_v35  ;;  %v9669_v5 = vld [vmem:[#allocation116_spill] sm:$0xff] }
 0x521   : > { %v4608_v11 = vpop.permute.xlu0 %4607  ;;  %v4025_v39 = vadd.f32 %v3897_v8, %v3064_v14  ;;  %v9668_v8 = vld [vmem:[#allocation183_spill] sm:$0xff]  ;;  %v2105_v55 = vadd.f32 %v9669_v5, %v1129_v19  ;;  %v9672_v19 = vld [vmem:[#allocation184_spill] sm:$0xff] }
 0x522   : > { %4731 = vrot.lane.b32.xlu0 %v4410_v18, %s5405_s4  ;;  %v3065_v27 = vadd.f32 %v2937_v40, %v2104_v28  ;;  %v2938_v14 = vsel %vm2935_vm0, %v9668_v8, %v9667_v56  ;;  %v4414_v40 = vmul.f32 %v7813_v61, %v7923_v23  ;;  %v9674_v56 = vld [vmem:[#allocation117_spill] sm:$0xff]  ;;  %v9675_v5 = vld [vmem:[#allocation307_spill] sm:$0xff] }
 0x523   : > { %v4602_v51 = vpop.permute.xlu1 %4601 }
 0x524   : > { %v4858_v16 = vsel %vm4857_vm2, %v4602_v51, %v4604_v44  ;;  %4725 = vrot.lane.b32.xlu1 %v4407_v52, %s5405_s4  ;;  %v4026_v51 = vadd.f32 %v3898_v17, %v3065_v27  ;;  %v9671_v52 = vld [vmem:[#allocation57_spill] sm:$0xff]  ;;  %v3066_v17 = vadd.f32 %v2938_v14, %v2105_v55  ;;  %v3900_v14 = vsel %vm3896_vm1, %v9675_v5, %v7337_v21 }
 0x525   : > { %v4986_v18 = vadd.f32 %v4858_v16, %v4025_v39  ;;  %v4612_v36 = vpop.permute.xlu0 %4611  ;;  %v9670_v16 = vld [vmem:[#allocation306_spill] sm:$0xff]  ;;  %v1130_v39 = vmul.f32 %v7818_v29, %v9671_v52  ;;  %v9673_v27 = vld [vmem:[#allocation185_spill] sm:$0xff]  ;;  %v4416_v55 = vmul.f32 %v7813_v61, %v7910_v59  ;;  %v9678_v52 = vld [vmem:[#allocation187_spill] sm:$0xff]  ;;  %v4413_v21 = vmul.f32 %v7818_v29, %v7923_v23 }
 0x526   : > { %4735 = vrot.lane.b32.xlu0 %v4412_v20, %s5405_s4  ;;  %v3899_v44 = vsel %vm3896_vm1, %v9670_v16, %v7327_v6  ;;  %v4411_v6 = vmul.f32 %v7818_v29, %v7902_v37  ;;  %v9676_v37 = vld [vmem:[#allocation52_spill] sm:$0xff]  ;;  %v9681_v23 = vld [vmem:[#allocation53_spill] sm:$0xff] }
 0x527   : > { %5050 = vst [vmem:[%s8101_s7] sm:$0xff] %v4986_v18  ;;  %v4606_v28 = vpop.permute.xlu1 %4605  ;;  %v2939_v18 = vsel %vm2935_vm0, %v9673_v27, %v9672_v19  ;;  %v2106_v8 = vadd.f32 %v9674_v56, %v1130_v39  ;;  %v9680_v27 = vld [vmem:[#allocation308_spill] sm:$0xff] }
 0x528   : > { %v4859_v35 = vsel %vm4857_vm2, %v4606_v28, %v4608_v11  ;;  %4729 = vrot.lane.b32.xlu1 %v4409_v41, %s5405_s4  ;;  %v4027_v11 = vadd.f32 %v3899_v44, %v3066_v17  ;;  %v1131_v28 = vmul.f32 %v7818_v29, %v9676_v37  ;;  %v9679_v17 = vld [vmem:[#allocation118_spill] sm:$0xff]  ;;  %v9684_v37 = vld [vmem:[#allocation119_spill] sm:$0xff] }
 0x529   : > { %v4987_v20 = vadd.f32 %v4859_v35, %v4026_v51  ;;  %v4616_v22 = vpop.permute.xlu0 %4615  ;;  %v3067_v16 = vadd.f32 %v2939_v18, %v2106_v8  ;;  %v9677_v35 = vld [vmem:[#allocation186_spill] sm:$0xff]  ;;  %v3901_v18 = vsel %vm3896_vm1, %v9680_v27, %v7347_v49  ;;  %v1132_v8 = vmul.f32 %v7818_v29, %v9681_v23  ;;  %v9688_v27 = vld [vmem:[#allocation191_spill] sm:$0xff] }
 0x52a   : > { %4739 = vrot.lane.b32.xlu0 %v4414_v40, %s5405_s4  ;;  %v2940_v39 = vsel %vm2935_vm0, %v9678_v52, %v9677_v35  ;;  %v4415_v49 = vmul.f32 %v7818_v29, %v7910_v59  ;;  %v4420_v52 = vmul.f32 %v7813_v61, %v7919_v25  ;;  %v9686_v59 = vld [vmem:[#allocation56_spill] sm:$0xff] }
 0x52b   : > { %5051 = vst [vmem:[%s8101_s7 + $0x8] sm:$0xff] %v4987_v20  ;;  %v4610_v41 = vpop.permute.xlu1 %4609  ;;  %v2107_v20 = vadd.f32 %v9679_v17, %v1131_v28  ;;  %v2108_v28 = vadd.f32 %v9684_v37, %v1132_v8  ;;  %v9690_v8 = vld [vmem:[#allocation310_spill] sm:$0xff] }
 0x52c   : > { %v4860_v51 = vsel %vm4857_vm2, %v4610_v41, %v4612_v36  ;;  %4733 = vrot.lane.b32.xlu1 %v4411_v6, %s5405_s4  ;;  %v4028_v36 = vadd.f32 %v3900_v14, %v3067_v16  ;;  %v4418_v6 = vmul.f32 %v7813_v61, %v7932_v3  ;;  %v9682_v14 = vld [vmem:[#allocation188_spill] sm:$0xff] }
 0x52d   : > { %v4988_v40 = vadd.f32 %v4860_v51, %v4027_v11  ;;  %v4620_v44 = vpop.permute.xlu0 %4619  ;;  %v3068_v11 = vadd.f32 %v2940_v39, %v2107_v20 }
 0x52e   : > { %4743 = vrot.lane.b32.xlu0 %v4416_v55, %s5405_s4  ;;  %v9683_v55 = vld [vmem:[#allocation189_spill] sm:$0xff] }
 0x52f   : > { %5052 = vst [vmem:[%s8101_s7 + $0x10] sm:$0xff] %v4988_v40  ;;  %v4614_v19 = vpop.permute.xlu1 %4613  ;;  %v2941_v51 = vsel %vm2935_vm0, %v9683_v55, %v9682_v14  ;;  %v9685_v40 = vld [vmem:[#allocation309_spill] sm:$0xff] }
 0x530   : > { %v4861_v56 = vsel %vm4857_vm2, %v4614_v19, %v4616_v22  ;;  %4737 = vrot.lane.b32.xlu1 %v4413_v21, %s5405_s4  ;;  %v4029_v22 = vadd.f32 %v3901_v18, %v3068_v11  ;;  %v3902_v35 = vsel %vm3896_vm1, %v9685_v40, %v7357_v46  ;;  %v1133_v21 = vmul.f32 %v7818_v29, %v9686_v59  ;;  %v9687_v19 = vld [vmem:[#allocation190_spill] sm:$0xff]  ;;  %v9694_v40 = vld [vmem:[#allocation121_spill] sm:$0xff] }
 0x531   : > { %v4989_v41 = vadd.f32 %v4861_v56, %v4028_v36  ;;  %v4624_v5 = vpop.permute.xlu0 %4623  ;;  %v3069_v17 = vadd.f32 %v2941_v51, %v2108_v28  ;;  %v2942_v18 = vsel %vm2935_vm0, %v9688_v27, %v9687_v19  ;;  %v4417_v46 = vmul.f32 %v7818_v29, %v7932_v3  ;;  %v9691_v3 = vld [vmem:[#allocation59_spill] sm:$0xff]  ;;  %v9692_v28 = vld [vmem:[#allocation192_spill] sm:$0xff] }
 0x532   : > { %4747 = vrot.lane.b32.xlu0 %v4418_v6, %s5405_s4  ;;  %v9689_v6 = vld [vmem:[#allocation120_spill] sm:$0xff]  ;;  %v3903_v11 = vsel %vm3896_vm1, %v9690_v8, %v7367_v0  ;;  %v1134_v55 = vmul.f32 %v7818_v29, %v9691_v3  ;;  %v4419_v0 = vmul.f32 %v7818_v29, %v7919_v25  ;;  %v9696_v25 = vld [vmem:[#allocation58_spill] sm:$0xff] }
 0x533   : > { %5053 = vst [vmem:[%s8101_s7 + $0x18] sm:$0xff] %v4989_v41  ;;  %v4618_v16 = vpop.permute.xlu1 %4617  ;;  %v2109_v56 = vadd.f32 %v9689_v6, %v1133_v21  ;;  %v4422_v41 = vmul.f32 %v7813_v61, %v7941_v43  ;;  %v4424_v21 = vmul.f32 %v7813_v61, %v7927_v50  ;;  %v9698_v6 = vld [vmem:[#allocation195_spill] sm:$0xff] }
 0x534   : > { %v4862_v39 = vsel %vm4857_vm2, %v4618_v16, %v4620_v44  ;;  %4741 = vrot.lane.b32.xlu1 %v4415_v49, %s5405_s4  ;;  %v4030_v44 = vadd.f32 %v3902_v35, %v3069_v17  ;;  %v2110_v35 = vadd.f32 %v9694_v40, %v1134_v55  ;;  %v9704_v40 = vld [vmem:[#allocation123_spill] sm:$0xff] }
 0x535   : > { %v4990_v20 = vadd.f32 %v4862_v39, %v4029_v22  ;;  %v4628_v36 = vpop.permute.xlu0 %4627  ;;  %v3070_v51 = vadd.f32 %v2942_v18, %v2109_v56  ;;  %v9693_v22 = vld [vmem:[#allocation193_spill] sm:$0xff]  ;;  %v9695_v39 = vld [vmem:[#allocation311_spill] sm:$0xff] }
 0x536   : > { %4751 = vrot.lane.b32.xlu0 %v4420_v52, %s5405_s4  ;;  %v2943_v16 = vsel %vm2935_vm0, %v9693_v22, %v9692_v28  ;;  %v3904_v59 = vsel %vm3896_vm1, %v9695_v39, %v7377_v58  ;;  %v4421_v58 = vmul.f32 %v7818_v29, %v7941_v43  ;;  %v9701_v43 = vld [vmem:[#allocation55_spill] sm:$0xff]  ;;  %v9702_v22 = vld [vmem:[#allocation196_spill] sm:$0xff] }
 0x537   : > { %5054 = vst [vmem:[%s8101_s7 + $0x20] sm:$0xff] %v4990_v20  ;;  %v4622_v23 = vpop.permute.xlu1 %4621  ;;  %v1135_v20 = vmul.f32 %v7818_v29, %v9696_v25  ;;  %v3071_v19 = vadd.f32 %v2943_v16, %v2110_v35  ;;  %v1136_v55 = vmul.f32 %v7818_v29, %v9701_v43  ;;  %v9703_v16 = vld [vmem:[#allocation197_spill] sm:$0xff] }
 0x538   : > { %v4863_v14 = vsel %vm4857_vm2, %v4622_v23, %v4624_v5  ;;  %4745 = vrot.lane.b32.xlu1 %v4417_v46, %s5405_s4  ;;  %v4031_v5 = vadd.f32 %v3903_v11, %v3070_v51  ;;  %v9697_v46 = vld [vmem:[#allocation194_spill] sm:$0xff]  ;;  %v9700_v11 = vld [vmem:[#allocation312_spill] sm:$0xff] }
 0x539   : > { %v4991_v49 = vadd.f32 %v4863_v14, %v4030_v44  ;;  %v4632_v37 = vpop.permute.xlu0 %4631  ;;  %v2944_v56 = vsel %vm2935_vm0, %v9698_v6, %v9697_v46  ;;  %v9699_v44 = vld [vmem:[#allocation122_spill] sm:$0xff]  ;;  %v4426_v14 = vmul.f32 %v7813_v61, %v7951_v32  ;;  %v2112_v35 = vadd.f32 %v9704_v40, %v1136_v55  ;;  %v9708_v46 = vld [vmem:[#allocation199_spill] sm:$0xff]  ;;  %v9712_v55 = vld [vmem:[#allocation200_spill] sm:$0xff] }
 0x53a   : > { %4755 = vrot.lane.b32.xlu0 %v4422_v41, %s5405_s4  ;;  %v2111_v23 = vadd.f32 %v9699_v44, %v1135_v20  ;;  %v3905_v41 = vsel %vm3896_vm1, %v9700_v11, %v7387_v24  ;;  %v4423_v24 = vmul.f32 %v7818_v29, %v7927_v50  ;;  %v9706_v50 = vld [vmem:[#allocation60_spill] sm:$0xff] }
 0x53b   : > { %5055 = vst [vmem:[%s8101_s7 + $0x28] sm:$0xff] %v4991_v49  ;;  %v4626_v52 = vpop.permute.xlu1 %4625 }
 0x53c   : > { %v4864_v17 = vsel %vm4857_vm2, %v4626_v52, %v4628_v36  ;;  %4749 = vrot.lane.b32.xlu1 %v4419_v0, %s5405_s4  ;;  %v4032_v36 = vadd.f32 %v3904_v59, %v3071_v19  ;;  %v3072_v51 = vadd.f32 %v2944_v56, %v2111_v23  ;;  %v2945_v0 = vsel %vm2935_vm0, %v9703_v16, %v9702_v22  ;;  %v9705_v52 = vld [vmem:[#allocation313_spill] sm:$0xff]  ;;  %v9709_v56 = vld [vmem:[#allocation124_spill] sm:$0xff]  ;;  %v9710_v23 = vld [vmem:[#allocation314_spill] sm:$0xff] }
 0x53d   : > { %v4992_v27 = vadd.f32 %v4864_v17, %v4031_v5  ;;  %v4636_v18 = vpop.permute.xlu0 %4635  ;;  %v3906_v39 = vsel %vm3896_vm1, %v9705_v52, %v7397_v12  ;;  %v4428_v59 = vmul.f32 %v7813_v61, %v7937_v34  ;;  %v1137_v17 = vmul.f32 %v7818_v29, %v9706_v50  ;;  %v9714_v22 = vld [vmem:[#allocation125_spill] sm:$0xff]  ;;  %v9718_v50 = vld [vmem:[#allocation203_spill] sm:$0xff] }
 0x53e   : > { %4759 = vrot.lane.b32.xlu0 %v4424_v21, %s5405_s4  ;;  %v3073_v25 = vadd.f32 %v2945_v0, %v2112_v35  ;;  %v4425_v12 = vmul.f32 %v7818_v29, %v7951_v32  ;;  %v9711_v32 = vld [vmem:[#allocation61_spill] sm:$0xff]  ;;  %v4432_v35 = vmul.f32 %v7813_v61, %v7946_v57 }
 0x53f   : > { %5056 = vst [vmem:[%s8101_s7 + $0x30] sm:$0xff] %v4992_v27  ;;  %v4630_v8 = vpop.permute.xlu1 %4629  ;;  %v9707_v27 = vld [vmem:[#allocation198_spill] sm:$0xff] }
 0x540   : > { %v4865_v3 = vsel %vm4857_vm2, %v4630_v8, %v4632_v37  ;;  %4753 = vrot.lane.b32.xlu1 %v4421_v58, %s5405_s4  ;;  %v4033_v37 = vadd.f32 %v3905_v41, %v3072_v51  ;;  %v2946_v6 = vsel %vm2935_vm0, %v9708_v46, %v9707_v27  ;;  %v2113_v58 = vadd.f32 %v9709_v56, %v1137_v17  ;;  %v9713_v51 = vld [vmem:[#allocation201_spill] sm:$0xff]  ;;  %v9720_v46 = vld [vmem:[#allocation316_spill] sm:$0xff] }
 0x541   : > { %v4993_v49 = vadd.f32 %v4865_v3, %v4032_v36  ;;  %v4640_v28 = vpop.permute.xlu0 %4639  ;;  %v3907_v36 = vsel %vm3896_vm1, %v9710_v23, %v7407_v26  ;;  %v4430_v8 = vmul.f32 %v7813_v61, %v7961_v60  ;;  %v1138_v41 = vmul.f32 %v7818_v29, %v9711_v32  ;;  %v9724_v32 = vld [vmem:[#allocation127_spill] sm:$0xff] }
 0x542   : > { %4763 = vrot.lane.b32.xlu0 %v4426_v14, %s5405_s4  ;;  %v3074_v14 = vadd.f32 %v2946_v6, %v2113_v58  ;;  %v4427_v26 = vmul.f32 %v7818_v29, %v7937_v34  ;;  %v9716_v34 = vld [vmem:[#allocation62_spill] sm:$0xff]  ;;  %v3909_v6 = vsel %vm3896_vm1, %v9720_v46, %v7427_v38  ;;  %v4431_v38 = vmul.f32 %v7818_v29, %v7946_v57  ;;  %v9726_v57 = vld [vmem:[#allocation64_spill] sm:$0xff]  ;;  %v9734_v46 = vld [vmem:[#allocation129_spill] sm:$0xff] }
 0x543   : > { %5057 = vst [vmem:[%s8101_s7 + $0x38] sm:$0xff] %v4993_v49  ;;  %v4634_v5 = vpop.permute.xlu1 %4633  ;;  %v2947_v49 = vsel %vm2935_vm0, %v9713_v51, %v9712_v55  ;;  %v2114_v16 = vadd.f32 %v9714_v22, %v1138_v41  ;;  %v4436_v51 = vmul.f32 %v7813_v61, %v7956_v54 }
 0x544   : > { %v4866_v21 = vsel %vm4857_vm2, %v4634_v5, %v4636_v18  ;;  %4757 = vrot.lane.b32.xlu1 %v4423_v24, %s5405_s4  ;;  %v4034_v18 = vadd.f32 %v3906_v39, %v3073_v25  ;;  %v9715_v24 = vld [vmem:[#allocation315_spill] sm:$0xff]  ;;  %v1139_v5 = vmul.f32 %v7818_v29, %v9716_v34  ;;  %v9719_v25 = vld [vmem:[#allocation126_spill] sm:$0xff] }
 0x545   : > { %v4994_v20 = vadd.f32 %v4866_v21, %v4033_v37  ;;  %v4644_v19 = vpop.permute.xlu0 %4643  ;;  %v3908_v40 = vsel %vm3896_vm1, %v9715_v24, %v7417_v31  ;;  %v3075_v52 = vadd.f32 %v2947_v49, %v2114_v16  ;;  %v9717_v21 = vld [vmem:[#allocation202_spill] sm:$0xff]  ;;  %v4429_v31 = vmul.f32 %v7818_v29, %v7961_v60  ;;  %v9721_v60 = vld [vmem:[#allocation63_spill] sm:$0xff] }
 0x546   : > { %4767 = vrot.lane.b32.xlu0 %v4428_v59, %s5405_s4  ;;  %v2948_v17 = vsel %vm2935_vm0, %v9718_v50, %v9717_v21  ;;  %v1140_v58 = vmul.f32 %v7818_v29, %v9721_v60  ;;  %v9728_v24 = vld [vmem:[#allocation207_spill] sm:$0xff] }
 0x547   : > { %5058 = vst [vmem:[%s8101_s7 + $0x40] sm:$0xff] %v4994_v20  ;;  %v4638_v44 = vpop.permute.xlu1 %4637  ;;  %v2115_v20 = vadd.f32 %v9719_v25, %v1139_v5  ;;  %v9735_v60 = vld [vmem:[#allocation319_spill] sm:$0xff] }
 0x548   : > { %v4867_v11 = vsel %vm4857_vm2, %v4638_v44, %v4640_v28  ;;  %4761 = vrot.lane.b32.xlu1 %v4425_v12, %s5405_s4  ;;  %v4035_v28 = vadd.f32 %v3907_v36, %v3074_v14  ;;  %v4434_v12 = vmul.f32 %v7813_v61, %v7971_v53  ;;  %v9722_v36 = vld [vmem:[#allocation204_spill] sm:$0xff]  ;;  %v2116_v41 = vadd.f32 %v9724_v32, %v1140_v58  ;;  %v9738_v32 = vld [vmem:[#allocation211_spill] sm:$0xff] }
 0x549   : > { %v4995_v3 = vadd.f32 %v4867_v11, %v4034_v18  ;;  %v4648_v43 = vpop.permute.xlu0 %4647  ;;  %v3076_v18 = vadd.f32 %v2948_v17, %v2115_v20  ;;  %v9732_v20 = vld [vmem:[#allocation208_spill] sm:$0xff]  ;;  %v3912_v58 = vsel %vm3896_vm1, %v9735_v60, %v7457_v47  ;;  %v4437_v47 = vmul.f32 %v7818_v29, %v7981_v15 }
 0x54a   : > { %4771 = vrot.lane.b32.xlu0 %v4430_v8, %s5405_s4  ;;  %v9723_v8 = vld [vmem:[#allocation205_spill] sm:$0xff]  ;;  %v4446_v60 = vmul.f32 %v7813_v61, %v8001_v63 }
 0x54b   : > { %5059 = vst [vmem:[%s8101_s7 + $0x48] sm:$0xff] %v4995_v3  ;;  %v4642_v0 = vpop.permute.xlu1 %4641  ;;  %v2949_v11 = vsel %vm2935_vm0, %v9723_v8, %v9722_v36  ;;  %v4037_v14 = vadd.f32 %v3909_v6, %v3076_v18  ;;  %v4440_v18 = vmul.f32 %v7813_v61, %v7966_v48 }
 0x54c   : > { %v4868_v37 = vsel %vm4857_vm2, %v4642_v0, %v4644_v19  ;;  %4765 = vrot.lane.b32.xlu1 %v4427_v26, %s5405_s4  ;;  %v4036_v19 = vadd.f32 %v3908_v40, %v3075_v52  ;;  %v1141_v26 = vmul.f32 %v7818_v29, %v9726_v57  ;;  %v3077_v22 = vadd.f32 %v2949_v11, %v2116_v41  ;;  %v9727_v0 = vld [vmem:[#allocation206_spill] sm:$0xff] }
 0x54d   : > { %v4996_v39 = vadd.f32 %v4868_v37, %v4035_v28  ;;  %v4652_v59 = vpop.permute.xlu0 %4651  ;;  %v2950_v40 = vsel %vm2935_vm0, %v9728_v24, %v9727_v0  ;;  %v9730_v52 = vld [vmem:[#allocation318_spill] sm:$0xff]  ;;  %v4442_v57 = vmul.f32 %v7813_v61, %v7991_v9  ;;  %v9742_v24 = vld [vmem:[#allocation212_spill] sm:$0xff] }
 0x54e   : > { %4775 = vrot.lane.b32.xlu0 %v4432_v35, %s5405_s4  ;;  %v9729_v35 = vld [vmem:[#allocation128_spill] sm:$0xff] }
 0x54f   : > { %5060 = vst [vmem:[%s8101_s7 + $0x50] sm:$0xff] %v4996_v39  ;;  %v4646_v27 = vpop.permute.xlu1 %4645  ;;  %v2117_v37 = vadd.f32 %v9729_v35, %v1141_v26  ;;  %v3911_v39 = vsel %vm3896_vm1, %v9730_v52, %v7447_v13  ;;  %v4435_v13 = vmul.f32 %v7818_v29, %v7956_v54  ;;  %v9736_v54 = vld [vmem:[#allocation66_spill] sm:$0xff]  ;;  %v9744_v35 = vld [vmem:[#allocation131_spill] sm:$0xff]  ;;  %v9745_v52 = vld [vmem:[#allocation321_spill] sm:$0xff] }
 0x550   : > { %v4869_v56 = vsel %vm4857_vm2, %v4646_v27, %v4648_v43  ;;  %4769 = vrot.lane.b32.xlu1 %v4429_v31, %s5405_s4  ;;  %v9725_v43 = vld [vmem:[#allocation317_spill] sm:$0xff] }
 0x551   : > { %v4997_v44 = vadd.f32 %v4869_v56, %v4036_v19  ;;  %v4656_v23 = vpop.permute.xlu0 %4655  ;;  %v3910_v55 = vsel %vm3896_vm1, %v9725_v43, %v7437_v7  ;;  %v4433_v7 = vmul.f32 %v7818_v29, %v7971_v53  ;;  %v9731_v53 = vld [vmem:[#allocation65_spill] sm:$0xff]  ;;  %v3078_v17 = vadd.f32 %v2950_v40, %v2117_v37 }
 0x552   : > { %4779 = vrot.lane.b32.xlu0 %v4434_v12, %s5405_s4  ;;  %v4038_v34 = vadd.f32 %v3910_v55, %v3077_v22  ;;  %v1142_v50 = vmul.f32 %v7818_v29, %v9731_v53  ;;  %v9733_v19 = vld [vmem:[#allocation209_spill] sm:$0xff] }
 0x553   : > { %5061 = vst [vmem:[%s8101_s7 + $0x58] sm:$0xff] %v4997_v44  ;;  %v4650_v3 = vpop.permute.xlu1 %4649  ;;  %v2951_v27 = vsel %vm2935_vm0, %v9733_v19, %v9732_v20  ;;  %v4039_v12 = vadd.f32 %v3911_v39, %v3078_v17  ;;  %v9743_v40 = vld [vmem:[#allocation213_spill] sm:$0xff]  ;;  %v3914_v39 = vsel %vm3896_vm1, %v9745_v52, %v7477_v10  ;;  %v9748_v20 = vld [vmem:[#allocation215_spill] sm:$0xff]  ;;  %v4441_v10 = vmul.f32 %v7818_v29, %v7991_v9 }
 0x554   : > { %v4870_v49 = vsel %vm4857_vm2, %v4650_v3, %v4652_v59  ;;  %4773 = vrot.lane.b32.xlu1 %v4431_v38, %s5405_s4  ;;  %v4438_v59 = vmul.f32 %v7813_v61, %v7981_v15  ;;  %v2118_v6 = vadd.f32 %v9734_v46, %v1142_v50  ;;  %v9737_v38 = vld [vmem:[#allocation210_spill] sm:$0xff]  ;;  %v9741_v15 = vld [vmem:[#allocation67_spill] sm:$0xff]  ;;  %v9751_v9 = vld [vmem:[#allocation69_spill] sm:$0xff] }
 0x555   : > { %v4998_v16 = vadd.f32 %v4870_v49, %v4037_v14  ;;  %v4660_v28 = vpop.permute.xlu0 %4659  ;;  %v2952_v41 = vsel %vm2935_vm0, %v9738_v32, %v9737_v38  ;;  %v9739_v14 = vld [vmem:[#allocation130_spill] sm:$0xff]  ;;  %v1144_v22 = vmul.f32 %v7818_v29, %v9741_v15  ;;  %v9754_v38 = vld [vmem:[#allocation133_spill] sm:$0xff] }
 0x556   : > { %4783 = vrot.lane.b32.xlu0 %v4436_v51, %s5405_s4  ;;  %v3079_v36 = vadd.f32 %v2951_v27, %v2118_v6  ;;  %v9740_v51 = vld [vmem:[#allocation320_spill] sm:$0xff]  ;;  %v9757_v15 = vld [vmem:[#allocation218_spill] sm:$0xff] }
 0x557   : > { %5062 = vst [vmem:[%s8101_s7 + $0x60] sm:$0xff] %v4998_v16  ;;  %v4654_v5 = vpop.permute.xlu1 %4653  ;;  %v3913_v49 = vsel %vm3896_vm1, %v9740_v51, %v7467_v4  ;;  %v4439_v4 = vmul.f32 %v7818_v29, %v7966_v48  ;;  %v2120_v37 = vadd.f32 %v9744_v35, %v1144_v22  ;;  %v9746_v48 = vld [vmem:[#allocation68_spill] sm:$0xff]  ;;  %v9758_v22 = vld [vmem:[#allocation219_spill] sm:$0xff]  ;;  %v4450_v35 = vmul.f32 %v7813_v61, %v8011_v42 }
 0x558   : > { %v4871_v21 = vsel %vm4857_vm2, %v4654_v5, %v4656_v23  ;;  %4777 = vrot.lane.b32.xlu1 %v4433_v7, %s5405_s4  ;;  %v1143_v23 = vmul.f32 %v7818_v29, %v9736_v54  ;;  %v4040_v43 = vadd.f32 %v3912_v58, %v3079_v36  ;;  %v2953_v7 = vsel %vm2935_vm0, %v9743_v40, %v9742_v24  ;;  %v9749_v27 = vld [vmem:[#allocation132_spill] sm:$0xff] }
 0x559   : > { %v4999_v31 = vadd.f32 %v4871_v21, %v4038_v34  ;;  %v4664_v25 = vpop.permute.xlu0 %4663  ;;  %v1145_v53 = vmul.f32 %v7818_v29, %v9746_v48  ;;  %v3081_v50 = vadd.f32 %v2953_v7, %v2120_v37  ;;  %v9752_v36 = vld [vmem:[#allocation216_spill] sm:$0xff] }
 0x55a   : > { %4787 = vrot.lane.b32.xlu0 %v4438_v59, %s5405_s4  ;;  %v2119_v3 = vadd.f32 %v9739_v14, %v1143_v23  ;;  %v4444_v59 = vmul.f32 %v7813_v61, %v7976_v1  ;;  %v9755_v14 = vld [vmem:[#allocation323_spill] sm:$0xff]  ;;  %v9760_v7 = vld [vmem:[#allocation324_spill] sm:$0xff] }
 0x55b   : > { %5063 = vst [vmem:[%s8101_s7 + $0x68] sm:$0xff] %v4999_v31  ;;  %v4658_v56 = vpop.permute.xlu1 %4657  ;;  %v4042_v46 = vadd.f32 %v3914_v39, %v3081_v50 }
 0x55c   : > { %v4872_v44 = vsel %vm4857_vm2, %v4658_v56, %v4660_v28  ;;  %4781 = vrot.lane.b32.xlu1 %v4435_v13, %s5405_s4  ;;  %v3080_v16 = vadd.f32 %v2952_v41, %v2119_v3  ;;  %v2121_v13 = vadd.f32 %v9749_v27, %v1145_v53  ;;  %v3916_v3 = vsel %vm3896_vm1, %v9755_v14, %v7497_v33  ;;  %v9764_v53 = vld [vmem:[#allocation135_spill] sm:$0xff] }
 0x55d   : > { %v5000_v8 = vadd.f32 %v4872_v44, %v4039_v12  ;;  %v4668_v11 = vpop.permute.xlu0 %4667  ;;  %v9750_v12 = vld [vmem:[#allocation322_spill] sm:$0xff]  ;;  %v4445_v33 = vmul.f32 %v7818_v29, %v8001_v63  ;;  %v9761_v63 = vld [vmem:[#allocation71_spill] sm:$0xff] }
 0x55e   : > { %4791 = vrot.lane.b32.xlu0 %v4440_v18, %s5405_s4  ;;  %v4041_v34 = vadd.f32 %v3913_v49, %v3080_v16  ;;  %v3915_v56 = vsel %vm3896_vm1, %v9750_v12, %v7487_v30  ;;  %v1146_v18 = vmul.f32 %v7818_v29, %v9751_v9  ;;  %v4443_v30 = vmul.f32 %v7818_v29, %v7976_v1  ;;  %v9756_v1 = vld [vmem:[#allocation70_spill] sm:$0xff]  ;;  %v8440_v9 = vld [vmem:[%s6271_s28] sm:$0xff] }
 0x55f   : > { %5064 = vst [vmem:[%s8101_s7 + $0x70] sm:$0xff] %v5000_v8  ;;  %v4662_v55 = vpop.permute.xlu1 %4661  ;;  %v9753_v8 = vld [vmem:[#allocation217_spill] sm:$0xff]  ;;  %v1147_v51 = vmul.f32 %v7818_v29, %v9756_v1  ;;  %v2956_v16 = vsel %vm2935_vm0, %v9758_v22, %v9757_v15  ;;  %v9778_v15 = vld [vmem:[#allocation331_spill] sm:$0xff] }
 0x560   : > { %v4873_v26 = vsel %vm4857_vm2, %v4662_v55, %v4664_v25  ;;  %4785 = vrot.lane.b32.xlu1 %v4437_v47, %s5405_s4  ;;  %v9747_v25 = vld [vmem:[#allocation214_spill] sm:$0xff]  ;;  %v2122_v32 = vadd.f32 %v9754_v38, %v1146_v18  ;;  %v9779_v22 = vld [vmem:[#allocation327_spill] sm:$0xff] }
 0x561   : > { %v5001_v28 = vadd.f32 %v4873_v26, %v4040_v43  ;;  %v4672_v0 = vpop.permute.xlu0 %4671  ;;  %v2954_v19 = vsel %vm2935_vm0, %v9748_v20, %v9747_v25  ;;  %v4448_v43 = vmul.f32 %v7813_v61, %v7986_v45  ;;  %v9765_v25 = vld [vmem:[#allocation325_spill] sm:$0xff] }
 0x562   : > { %4795 = vrot.lane.b32.xlu0 %v4442_v57, %s5405_s4  ;;  %v3082_v44 = vadd.f32 %v2954_v19, %v2121_v13  ;;  %v3918_v20 = vsel %vm3896_vm1, %v9765_v25, %v7517_v2  ;;  %v9766_v19 = vld [vmem:[#allocation44_spill] sm:$0xff]  ;;  %v4449_v2 = vmul.f32 %v8440_v9, %v8011_v42  ;;  %v9774_v42 = vld [vmem:[#allocation73_spill] sm:$0xff]  ;;  %v9788_v25 = vld [vmem:[#allocation75_spill] sm:$0xff] }
 0x563   : > { %5065 = vst [vmem:[%s8101_s7 + $0x78] sm:$0xff] %v5001_v28  ;;  %v4666_v5 = vpop.permute.xlu1 %4665  ;;  %v9759_v28 = vld [vmem:[#allocation134_spill] sm:$0xff]  ;;  %v4451_v1 = vmul.f32 %v8440_v9, %v9766_v19 }
 0x564   : > { %v4874_v21 = vsel %vm4857_vm2, %v4666_v5, %v4668_v11  ;;  %4789 = vrot.lane.b32.xlu1 %v4439_v4, %s5405_s4  ;;  %v2955_v11 = vsel %vm2935_vm0, %v9753_v8, %v9752_v36  ;;  %v4043_v41 = vadd.f32 %v3915_v56, %v3082_v44  ;;  %v3917_v4 = vsel %vm3896_vm1, %v9760_v7, %v7507_v62  ;;  %v9768_v56 = vld [vmem:[#allocation222_spill] sm:$0xff] }
 0x565   : > { %v5002_v17 = vadd.f32 %v4874_v21, %v4041_v34  ;;  %v4676_v31 = vpop.permute.xlu0 %4675  ;;  %v3083_v49 = vadd.f32 %v2955_v11, %v2122_v32  ;;  %v1148_v34 = vmul.f32 %v7818_v29, %v9761_v63  ;;  %v9763_v21 = vld [vmem:[#allocation221_spill] sm:$0xff]  ;;  %v4447_v62 = vmul.f32 %v7818_v29, %v7986_v45  ;;  %v9767_v45 = vld [vmem:[#allocation72_spill] sm:$0xff]  ;;  %v8451_v8 = vld [vmem:[%s6271_s28 + $0x8] sm:$0xff] }
 0x566   : > { %4799 = vrot.lane.b32.xlu0 %v4444_v59, %s5405_s4  ;;  %v9762_v59 = vld [vmem:[#allocation220_spill] sm:$0xff]  ;;  %v1149_v13 = vmul.f32 %v7818_v29, %v9767_v45  ;;  %v1150_v32 = vmul.f32 %v8440_v9, %v9774_v42  ;;  %v9783_v63 = vld [vmem:[#allocation227_spill] sm:$0xff]  ;;  %v9796_v42 = vld [vmem:[#allocation230_spill] sm:$0xff] }
 0x567   : > { %5066 = vst [vmem:[%s8101_s7 + $0x80] sm:$0xff] %v5002_v17  ;;  %v4670_v6 = vpop.permute.xlu1 %4669  ;;  %v4044_v24 = vadd.f32 %v3916_v3, %v3083_v49  ;;  %v2957_v48 = vsel %vm2935_vm0, %v9763_v21, %v9762_v59  ;;  %v2124_v50 = vadd.f32 %v9764_v53, %v1148_v34  ;;  %v9773_v11 = vld [vmem:[#allocation48_spill] sm:$0xff] }
 0x568   : > { %v4875_v58 = vsel %vm4857_vm2, %v4670_v6, %v4672_v0  ;;  %4793 = vrot.lane.b32.xlu1 %v4441_v10, %s5405_s4  ;;  %v2123_v0 = vadd.f32 %v9759_v28, %v1147_v51  ;;  %v4452_v10 = vmul.f32 %v7813_v61, %v9766_v19  ;;  %v9770_v61 = vld [vmem:[#allocation136_spill] sm:$0xff]  ;;  %v9777_v51 = vld [vmem:[#allocation137_spill] sm:$0xff] }
 0x569   : > { %v5003_v54 = vadd.f32 %v4875_v58, %v4042_v46  ;;  %v4680_v23 = vpop.permute.xlu0 %4679  ;;  %v3085_v46 = vadd.f32 %v2957_v48, %v2124_v50  ;;  %v2125_v18 = vadd.f32 %v9770_v61, %v1149_v13  ;;  %v9775_v3 = vld [vmem:[#allocation224_spill] sm:$0xff]  ;;  %v2126_v49 = vadd.f32 %v9777_v51, %v1150_v32  ;;  %v9785_v48 = vld [vmem:[#allocation333_spill] sm:$0xff]  ;;  %v9793_v61 = vld [vmem:[#allocation330_spill] sm:$0xff] }
 0x56a   : > { %4803 = vrot.lane.b32.xlu0 %v4446_v60, %s5405_s4  ;;  %v3084_v5 = vadd.f32 %v2956_v16, %v2123_v0  ;;  %v9769_v60 = vld [vmem:[#allocation223_spill] sm:$0xff]  ;;  %v3920_v16 = vsel %vm3896_vm1, %v9779_v22, %v9778_v15  ;;  %v9787_v50 = vld [vmem:[#allocation372_spill] sm:$0xff]  ;;  %v9790_v13 = vld [vmem:[#allocation229_spill] sm:$0xff] }
 0x56b   : > { %5067 = vst [vmem:[%s8101_s7 + $0x88] sm:$0xff] %v5003_v54  ;;  %v4674_v47 = vpop.permute.xlu1 %4673  ;;  %v2958_v58 = vsel %vm2935_vm0, %v9769_v60, %v9768_v56  ;;  %v4046_v44 = vadd.f32 %v3918_v20, %v3085_v46  ;;  %v9771_v54 = vld [vmem:[#allocation329_spill] sm:$0xff]  ;;  %v1152_v20 = vmul.f32 %v8440_v9, %v9788_v25  ;;  %v9789_v45 = vld [vmem:[#allocation228_spill] sm:$0xff]  ;;  %v9797_v32 = vld [vmem:[#allocation231_spill] sm:$0xff] }
 0x56c   : > { %v4876_v55 = vsel %vm4857_vm2, %v4674_v47, %v4676_v31  ;;  %4797 = vrot.lane.b32.xlu1 %v4443_v30, %s5405_s4  ;;  %v4045_v17 = vadd.f32 %v3917_v4, %v3084_v5  ;;  %v4454_v30 = vmul.f32 %v8451_v8, %v9773_v11  ;;  %v4453_v5 = vmul.f32 %v8440_v9, %v9773_v11  ;;  %v9800_v51 = vld [vmem:[#allocation332_spill] sm:$0xff]  ;;  %v9802_v22 = vld [vmem:[#allocation77_spill] sm:$0xff]  ;;  %v9810_v25 = vld [vmem:[#allocation234_spill] sm:$0xff] }
 0x56d   : > { %v5004_v57 = vadd.f32 %v4876_v55, %v4043_v41  ;;  %v4684_v26 = vpop.permute.xlu0 %4683  ;;  %v3086_v41 = vadd.f32 %v2958_v58, %v2125_v18  ;;  %v2961_v46 = vsel %vm2935_vm0, %v9790_v13, %v9789_v45 }
 0x56e   : > { %4807 = vrot.lane.b32.xlu0 %v4448_v43, %s5405_s4  ;;  %v9776_v43 = vld [vmem:[#allocation225_spill] sm:$0xff] }
 0x56f   : > { %5068 = vst [vmem:[%s8101_s7 + $0x90] sm:$0xff] %v5004_v57  ;;  %v4678_v40 = vpop.permute.xlu1 %4677  ;;  %v2959_v55 = vsel %vm2935_vm0, %v9776_v43, %v9775_v3 }
 0x570   : > { %v4877_v37 = vsel %vm4857_vm2, %v4678_v40, %v4680_v23  ;;  %4801 = vrot.lane.b32.xlu1 %v4445_v33, %s5405_s4  ;;  %v9772_v23 = vld [vmem:[#allocation326_spill] sm:$0xff]  ;;  %v9780_v33 = vld [vmem:[#allocation49_spill] sm:$0xff]  ;;  %v3087_v7 = vadd.f32 %v2959_v55, %v2126_v49 }
 0x571   : > { %v5005_v52 = vadd.f32 %v4877_v37, %v4044_v24  ;;  %v4688_v39 = vpop.permute.xlu0 %4687  ;;  %v3919_v36 = vsel %vm3896_vm1, %v9772_v23, %v9771_v54  ;;  %v4456_v28 = vmul.f32 %v8451_v8, %v9780_v33  ;;  %v9781_v24 = vld [vmem:[#allocation74_spill] sm:$0xff]  ;;  %v9795_v23 = vld [vmem:[#allocation76_spill] sm:$0xff] }
 0x572   : > { %4811 = vrot.lane.b32.xlu0 %v4450_v35, %s5405_s4  ;;  %v4047_v57 = vadd.f32 %v3919_v36, %v3086_v41  ;;  %v1151_v40 = vmul.f32 %v8440_v9, %v9781_v24  ;;  %v9782_v37 = vld [vmem:[#allocation226_spill] sm:$0xff]  ;;  %v4048_v59 = vadd.f32 %v3920_v16, %v3087_v7  ;;  %v1153_v36 = vmul.f32 %v8440_v9, %v9795_v23  ;;  %v9803_v24 = vld [vmem:[#allocation232_spill] sm:$0xff] }
 0x573   : > { %5069 = vst [vmem:[%s8101_s7 + $0x98] sm:$0xff] %v5005_v52  ;;  %v4682_v31 = vpop.permute.xlu1 %4681  ;;  %v2960_v34 = vsel %vm2935_vm0, %v9783_v63, %v9782_v37  ;;  %v9784_v52 = vld [vmem:[#allocation138_spill] sm:$0xff]  ;;  %v2962_v41 = vsel %vm2935_vm0, %v9797_v32, %v9796_v42  ;;  %v1154_v16 = vmul.f32 %v8440_v9, %v9802_v22  ;;  %v9817_v23 = vld [vmem:[#allocation236_spill] sm:$0xff] }
 0x574   : > { %v4878_v27 = vsel %vm4857_vm2, %v4682_v31, %v4684_v26  ;;  %4805 = vrot.lane.b32.xlu1 %v4447_v62, %s5405_s4  ;;  %v9786_v62 = vld [vmem:[#allocation328_spill] sm:$0xff]  ;;  %v9824_v22 = vld [vmem:[#allocation238_spill] sm:$0xff] }
 0x575   : > { %v5006_v6 = vadd.f32 %v4878_v27, %v4045_v17  ;;  %v4692_v12 = vpop.permute.xlu0 %4691  ;;  %v3921_v53 = vsel %vm3896_vm1, %v9786_v62, %v9785_v48  ;;  %v4458_v17 = vmul.f32 %v8451_v8, %v9787_v50  ;;  %v9809_v62 = vld [vmem:[#allocation78_spill] sm:$0xff] }
 0x576   : > { %4815 = vrot.lane.b32.xlu0 %v4452_v10, %s5405_s4 }
 0x577   : > { %5070 = vst [vmem:[%s8101_s7 + $0xa0] sm:$0xff] %v5006_v6  ;;  %v4686_v29 = vpop.permute.xlu1 %4685  ;;  %v4455_v6 = vmul.f32 %v8440_v9, %v9780_v33 }
 0x578   : > { %v4879_v38 = vsel %vm4857_vm2, %v4686_v29, %v4688_v39  ;;  %4809 = vrot.lane.b32.xlu1 %v4449_v2, %s5405_s4  ;;  %v2127_v39 = vadd.f32 %v9784_v52, %v1151_v40  ;;  %v9792_v2 = vld [vmem:[#allocation335_spill] sm:$0xff]  ;;  %v9804_v40 = vld [vmem:[#allocation233_spill] sm:$0xff]  ;;  %v9807_v52 = vld [vmem:[#allocation334_spill] sm:$0xff] }
 0x579   : > { %v5007_v47 = vadd.f32 %v4879_v38, %v4046_v44  ;;  %v4696_v14 = vpop.permute.xlu0 %4695  ;;  %v3922_v18 = vsel %vm3896_vm1, %v9793_v61, %v9792_v2  ;;  %v9794_v44 = vld [vmem:[#allocation46_spill] sm:$0xff]  ;;  %v2963_v7 = vsel %vm2935_vm0, %v9804_v40, %v9803_v24  ;;  %v9816_v61 = vld [vmem:[#allocation79_spill] sm:$0xff] }
 0x57a   : > { %4819 = vrot.lane.b32.xlu0 %v4454_v30, %s5405_s4  ;;  %v3088_v19 = vadd.f32 %v2960_v34, %v2127_v39  ;;  %v4460_v29 = vmul.f32 %v8451_v8, %v9794_v44 }
 0x57b   : > { %5071 = vst [vmem:[%s8101_s7 + $0xa8] sm:$0xff] %v5007_v47  ;;  %v4690_v26 = vpop.permute.xlu1 %4689  ;;  %v4457_v47 = vmul.f32 %v8440_v9, %v9787_v50 }
 0x57c   : > { %v4880_v0 = vsel %vm4857_vm2, %v4690_v26, %v4692_v12  ;;  %4813 = vrot.lane.b32.xlu1 %v4451_v1, %s5405_s4  ;;  %v9791_v12 = vld [vmem:[#allocation139_spill] sm:$0xff]  ;;  %v4049_v60 = vadd.f32 %v3921_v53, %v3088_v19  ;;  %v9799_v1 = vld [vmem:[#allocation337_spill] sm:$0xff]  ;;  %v1155_v53 = vmul.f32 %v8440_v9, %v9809_v62  ;;  %v9831_v62 = vld [vmem:[#allocation240_spill] sm:$0xff] }
 0x57d   : > { %v5008_v4 = vadd.f32 %v4880_v0, %v4047_v57  ;;  %v4700_v35 = vpop.permute.xlu0 %4699  ;;  %v2128_v56 = vadd.f32 %v9791_v12, %v1152_v20  ;;  %v3923_v49 = vsel %vm3896_vm1, %v9800_v51, %v9799_v1  ;;  %v9801_v57 = vld [vmem:[#allocation374_spill] sm:$0xff]  ;;  %v9811_v20 = vld [vmem:[#allocation235_spill] sm:$0xff]  ;;  %v9814_v12 = vld [vmem:[#allocation336_spill] sm:$0xff] }
 0x57e   : > { %4823 = vrot.lane.b32.xlu0 %v4456_v28, %s5405_s4  ;;  %v4462_v26 = vmul.f32 %v8451_v8, %v9801_v57  ;;  %v2964_v19 = vsel %vm2935_vm0, %v9811_v20, %v9810_v25  ;;  %v9823_v51 = vld [vmem:[#allocation80_spill] sm:$0xff] }
 0x57f   : > { %5072 = vst [vmem:[%s8101_s7 + $0xb0] sm:$0xff] %v5008_v4  ;;  %v4694_v21 = vpop.permute.xlu1 %4693  ;;  %v3089_v11 = vadd.f32 %v2961_v46, %v2128_v56  ;;  %v4459_v4 = vmul.f32 %v8440_v9, %v9794_v44 }
 0x580   : > { %v4881_v31 = vsel %vm4857_vm2, %v4694_v21, %v4696_v14  ;;  %4817 = vrot.lane.b32.xlu1 %v4453_v5, %s5405_s4  ;;  %v9798_v14 = vld [vmem:[#allocation140_spill] sm:$0xff]  ;;  %v9806_v5 = vld [vmem:[#allocation339_spill] sm:$0xff] }
 0x581   : > { %v5009_v10 = vadd.f32 %v4881_v31, %v4048_v59  ;;  %v4704_v27 = vpop.permute.xlu0 %4703  ;;  %v2129_v3 = vadd.f32 %v9798_v14, %v1153_v36  ;;  %v4050_v43 = vadd.f32 %v3922_v18, %v3089_v11  ;;  %v3924_v39 = vsel %vm3896_vm1, %v9807_v52, %v9806_v5  ;;  %v9808_v59 = vld [vmem:[#allocation371_spill] sm:$0xff]  ;;  %v9818_v36 = vld [vmem:[#allocation237_spill] sm:$0xff]  ;;  %v9821_v14 = vld [vmem:[#allocation338_spill] sm:$0xff] }
 0x582   : > { %4827 = vrot.lane.b32.xlu0 %v4458_v17, %s5405_s4  ;;  %v4464_v21 = vmul.f32 %v8451_v8, %v9808_v59  ;;  %v1156_v18 = vmul.f32 %v8440_v9, %v9816_v61  ;;  %v2965_v11 = vsel %vm2935_vm0, %v9818_v36, %v9817_v23  ;;  %v9830_v52 = vld [vmem:[#allocation81_spill] sm:$0xff]  ;;  %v9838_v61 = vld [vmem:[#allocation242_spill] sm:$0xff] }
 0x583   : > { %5073 = vst [vmem:[%s8101_s7 + $0xb8] sm:$0xff] %v5009_v10  ;;  %v4698_v58 = vpop.permute.xlu1 %4697  ;;  %v3090_v33 = vadd.f32 %v2962_v41, %v2129_v3  ;;  %v4461_v10 = vmul.f32 %v8440_v9, %v9801_v57 }
 0x584   : > { %v4882_v54 = vsel %vm4857_vm2, %v4698_v58, %v4700_v35  ;;  %4821 = vrot.lane.b32.xlu1 %v4455_v6, %s5405_s4  ;;  %v9805_v35 = vld [vmem:[#allocation141_spill] sm:$0xff] }
 0x585   : > { %v5010_v30 = vadd.f32 %v4882_v54, %v4049_v60  ;;  %v4708_v38 = vpop.permute.xlu0 %4707  ;;  %v2130_v37 = vadd.f32 %v9805_v35, %v1154_v16  ;;  %v4051_v63 = vadd.f32 %v3923_v49, %v3090_v33  ;;  %v9813_v6 = vld [vmem:[#allocation341_spill] sm:$0xff]  ;;  %v9815_v60 = vld [vmem:[#allocation376_spill] sm:$0xff]  ;;  %v1157_v49 = vmul.f32 %v8440_v9, %v9823_v51  ;;  %v9825_v16 = vld [vmem:[#allocation239_spill] sm:$0xff] }
 0x586   : > { %4831 = vrot.lane.b32.xlu0 %v4460_v29, %s5405_s4  ;;  %v3925_v56 = vsel %vm3896_vm1, %v9814_v12, %v9813_v6  ;;  %v4466_v58 = vmul.f32 %v8451_v8, %v9815_v60  ;;  %v2966_v33 = vsel %vm2935_vm0, %v9825_v16, %v9824_v22  ;;  %v9828_v35 = vld [vmem:[#allocation340_spill] sm:$0xff]  ;;  %v9837_v12 = vld [vmem:[#allocation82_spill] sm:$0xff]  ;;  %v9847_v22 = vld [vmem:[#allocation351_spill] sm:$0xff] }
 0x587   : > { %5074 = vst [vmem:[%s8101_s7 + $0xc0] sm:$0xff] %v5010_v30  ;;  %v4702_v55 = vpop.permute.xlu1 %4701  ;;  %v3091_v50 = vadd.f32 %v2963_v7, %v2130_v37  ;;  %v4463_v30 = vmul.f32 %v8440_v9, %v9808_v59  ;;  %v9848_v16 = vld [vmem:[#allocation346_spill] sm:$0xff] }
 0x588   : > { %v4883_v15 = vsel %vm4857_vm2, %v4702_v55, %v4704_v27  ;;  %4825 = vrot.lane.b32.xlu1 %v4457_v47, %s5405_s4  ;;  %v9812_v27 = vld [vmem:[#allocation142_spill] sm:$0xff]  ;;  %v9820_v47 = vld [vmem:[#allocation343_spill] sm:$0xff] }
 0x589   : > { %v5011_v28 = vadd.f32 %v4883_v15, %v4050_v43  ;;  %v4712_v0 = vpop.permute.xlu0 %4711  ;;  %v2131_v45 = vadd.f32 %v9812_v27, %v1155_v53  ;;  %v4052_v13 = vadd.f32 %v3924_v39, %v3091_v50  ;;  %v3926_v3 = vsel %vm3896_vm1, %v9821_v14, %v9820_v47  ;;  %v9822_v43 = vld [vmem:[#allocation373_spill] sm:$0xff]  ;;  %v9835_v27 = vld [vmem:[#allocation342_spill] sm:$0xff] }
 0x58a   : > { %4835 = vrot.lane.b32.xlu0 %v4462_v26, %s5405_s4  ;;  %v4468_v55 = vmul.f32 %v8451_v8, %v9822_v43  ;;  %v1158_v39 = vmul.f32 %v8440_v9, %v9830_v52  ;;  %v9832_v53 = vld [vmem:[#allocation241_spill] sm:$0xff] }
 0x58b   : > { %5075 = vst [vmem:[%s8101_s7 + $0xc8] sm:$0xff] %v5011_v28  ;;  %v4706_v34 = vpop.permute.xlu1 %4705  ;;  %v3092_v44 = vadd.f32 %v2964_v19, %v2131_v45  ;;  %v4465_v28 = vmul.f32 %v8440_v9, %v9815_v60  ;;  %v2967_v50 = vsel %vm2935_vm0, %v9832_v53, %v9831_v62  ;;  %v9855_v53 = vld [vmem:[#allocation85_spill] sm:$0xff] }
 0x58c   : > { %v4884_v48 = vsel %vm4857_vm2, %v4706_v34, %v4708_v38  ;;  %4829 = vrot.lane.b32.xlu1 %v4459_v4, %s5405_s4  ;;  %v9819_v38 = vld [vmem:[#allocation143_spill] sm:$0xff]  ;;  %v9827_v4 = vld [vmem:[#allocation345_spill] sm:$0xff] }
 0x58d   : > { %v5012_v17 = vadd.f32 %v4884_v48, %v4051_v63  ;;  %v4716_v31 = vpop.permute.xlu0 %4715  ;;  %v2132_v42 = vadd.f32 %v9819_v38, %v1156_v18  ;;  %v4053_v32 = vadd.f32 %v3925_v56, %v3092_v44  ;;  %v3927_v37 = vsel %vm3896_vm1, %v9828_v35, %v9827_v4  ;;  %v9829_v63 = vld [vmem:[#allocation50_spill] sm:$0xff]  ;;  %v9839_v18 = vld [vmem:[#allocation243_spill] sm:$0xff] }
 0x58e   : > { %4839 = vrot.lane.b32.xlu0 %v4464_v21, %s5405_s4  ;;  %v4470_v34 = vmul.f32 %v8451_v8, %v9829_v63  ;;  %v1159_v56 = vmul.f32 %v8440_v9, %v9837_v12  ;;  %v2968_v44 = vsel %vm2935_vm0, %v9839_v18, %v9838_v61  ;;  %v9850_v35 = vld [vmem:[#allocation246_spill] sm:$0xff] }
 0x58f   : > { %5076 = vst [vmem:[%s8101_s7 + $0xd0] sm:$0xff] %v5012_v17  ;;  %v4710_v46 = vpop.permute.xlu1 %4709  ;;  %v3093_v57 = vadd.f32 %v2965_v11, %v2132_v42  ;;  %v4467_v17 = vmul.f32 %v8440_v9, %v9822_v43  ;;  %v9841_v11 = vld [vmem:[#allocation349_spill] sm:$0xff]  ;;  %v9844_v43 = vld [vmem:[#allocation244_spill] sm:$0xff]  ;;  %v9860_v12 = vld [vmem:[#allocation350_spill] sm:$0xff] }
 0x590   : > { %v4885_v2 = vsel %vm4857_vm2, %v4710_v46, %v4712_v0  ;;  %4833 = vrot.lane.b32.xlu1 %v4461_v10, %s5405_s4  ;;  %v9826_v0 = vld [vmem:[#allocation144_spill] sm:$0xff]  ;;  %v9834_v10 = vld [vmem:[#allocation347_spill] sm:$0xff] }
 0x591   : > { %v5013_v29 = vadd.f32 %v4885_v2, %v4052_v13  ;;  %v4720_v54 = vpop.permute.xlu0 %4719  ;;  %v2133_v24 = vadd.f32 %v9826_v0, %v1157_v49  ;;  %v4054_v40 = vadd.f32 %v3926_v3, %v3093_v57  ;;  %v3928_v45 = vsel %vm3896_vm1, %v9835_v27, %v9834_v10  ;;  %v9836_v13 = vld [vmem:[#allocation375_spill] sm:$0xff]  ;;  %v9849_v0 = vld [vmem:[#allocation84_spill] sm:$0xff]  ;;  %v9858_v27 = vld [vmem:[#allocation149_spill] sm:$0xff] }
 0x592   : > { %4843 = vrot.lane.b32.xlu0 %v4466_v58, %s5405_s4  ;;  %v4472_v46 = vmul.f32 %v8451_v8, %v9836_v13  ;;  %v9840_v8 = vld [vmem:[#allocation146_spill] sm:$0xff]  ;;  %v4471_v51 = vmul.f32 %v8440_v9, %v9836_v13  ;;  %v9846_v49 = vld [vmem:[#allocation147_spill] sm:$0xff] }
 0x593   : > { %5077 = vst [vmem:[%s8101_s7 + $0xd8] sm:$0xff] %v5013_v29  ;;  %v4714_v41 = vpop.permute.xlu1 %4713  ;;  %v3094_v59 = vadd.f32 %v2966_v33, %v2133_v24  ;;  %v4469_v29 = vmul.f32 %v8440_v9, %v9829_v63  ;;  %v3930_v33 = vsel %vm3896_vm1, %v9848_v16, %v9847_v22  ;;  %v1161_v24 = vmul.f32 %v8440_v9, %v9849_v0  ;;  %v9871_v16 = vld [vmem:[#allocation359_spill] sm:$0xff] }
 0x594   : > { %v4886_v1 = vsel %vm4857_vm2, %v4714_v41, %v4716_v31  ;;  %4837 = vrot.lane.b32.xlu1 %v4463_v30, %s5405_s4  ;;  %v9833_v31 = vld [vmem:[#allocation145_spill] sm:$0xff]  ;;  %v9842_v30 = vld [vmem:[#allocation344_spill] sm:$0xff] }
 0x595   : > { %v5014_v26 = vadd.f32 %v4886_v1, %v4053_v32  ;;  %v4724_v15 = vpop.permute.xlu0 %4723  ;;  %v2134_v25 = vadd.f32 %v9833_v31, %v1158_v39  ;;  %v4055_v20 = vadd.f32 %v3927_v37, %v3094_v59  ;;  %v3929_v38 = vsel %vm3896_vm1, %v9842_v30, %v9841_v11  ;;  %v9843_v32 = vld [vmem:[#allocation83_spill] sm:$0xff]  ;;  %v9853_v59 = vld [vmem:[#allocation353_spill] sm:$0xff] }
 0x596   : > { %4847 = vrot.lane.b32.xlu0 %v4468_v55, %s5405_s4  ;;  %v1160_v41 = vmul.f32 %v8440_v9, %v9843_v32  ;;  %v9845_v55 = vld [vmem:[#allocation245_spill] sm:$0xff]  ;;  %v9851_v37 = vld [vmem:[#allocation247_spill] sm:$0xff] }
 0x597   : > { %5078 = vst [vmem:[%s8101_s7 + $0xe0] sm:$0xff] %v5014_v26  ;;  %v4718_v7 = vpop.permute.xlu1 %4717  ;;  %v3095_v60 = vadd.f32 %v2967_v50, %v2134_v25  ;;  %v2969_v1 = vsel %vm2935_vm0, %v9845_v55, %v9844_v43  ;;  %v2970_v63 = vsel %vm2935_vm0, %v9851_v37, %v9850_v35  ;;  %v1162_v50 = vmul.f32 %v8440_v9, %v9855_v53  ;;  %v9874_v37 = vld [vmem:[#allocation254_spill] sm:$0xff] }
 0x598   : > { %v4887_v5 = vsel %vm4857_vm2, %v4718_v7, %v4720_v54  ;;  %4841 = vrot.lane.b32.xlu1 %v4465_v28, %s5405_s4  ;;  %v2135_v54 = vadd.f32 %v9840_v8, %v1159_v56  ;;  %v2136_v57 = vadd.f32 %v9846_v49, %v1160_v41  ;;  %v9863_v8 = vld [vmem:[#allocation251_spill] sm:$0xff] }
 0x599   : > { %v5015_v21 = vadd.f32 %v4887_v5, %v4054_v40  ;;  %v4728_v48 = vpop.permute.xlu0 %4727  ;;  %v4056_v23 = vadd.f32 %v3928_v45, %v3095_v60  ;;  %v2138_v45 = vadd.f32 %v9858_v27, %v1162_v50  ;;  %v9879_v50 = vld [vmem:[#allocation89_spill] sm:$0xff] }
 0x59a   : > { %4851 = vrot.lane.b32.xlu0 %v4470_v34, %s5405_s4  ;;  %v3096_v47 = vadd.f32 %v2968_v44, %v2135_v54  ;;  %v3097_v40 = vadd.f32 %v2969_v1, %v2136_v57  ;;  %v9852_v34 = vld [vmem:[#allocation148_spill] sm:$0xff]  ;;  %v9870_v57 = vld [vmem:[#allocation151_spill] sm:$0xff] }
 0x59b   : > { %5079 = vst [vmem:[%s8101_s7 + $0xe8] sm:$0xff] %v5015_v21  ;;  %v4722_v19 = vpop.permute.xlu1 %4721  ;;  %v2137_v5 = vadd.f32 %v9852_v34, %v1161_v24  ;;  %v9854_v21 = vld [vmem:[#allocation348_spill] sm:$0xff] }
 0x59c   : > { %v4888_v6 = vsel %vm4857_vm2, %v4722_v19, %v4724_v15  ;;  %4845 = vrot.lane.b32.xlu1 %v4467_v17, %s5405_s4  ;;  %v4057_v26 = vadd.f32 %v3929_v38, %v3096_v47  ;;  %v4058_v52 = vadd.f32 %v3930_v33, %v3097_v40  ;;  %v9857_v19 = vld [vmem:[#allocation249_spill] sm:$0xff]  ;;  %v9867_v47 = vld [vmem:[#allocation87_spill] sm:$0xff]  ;;  %v9868_v1 = vld [vmem:[#allocation252_spill] sm:$0xff] }
 0x59d   : > { %v5016_v58 = vadd.f32 %v4888_v6, %v4055_v20  ;;  %v4732_v2 = vpop.permute.xlu0 %4731  ;;  %v3098_v17 = vadd.f32 %v2970_v63, %v2137_v5  ;;  %v9856_v20 = vld [vmem:[#allocation248_spill] sm:$0xff]  ;;  %v9859_v6 = vld [vmem:[#allocation355_spill] sm:$0xff]  ;;  %v9865_v38 = vld [vmem:[#allocation357_spill] sm:$0xff] }
 0x59e   : > { %4855 = vrot.lane.b32.xlu0 %v4472_v46, %s5405_s4  ;;  %v2971_v10 = vsel %vm2935_vm0, %v9857_v19, %v9856_v20  ;;  %v3932_v56 = vsel %vm3896_vm1, %v9860_v12, %v9859_v6  ;;  %v9872_v33 = vld [vmem:[#allocation354_spill] sm:$0xff]  ;;  %v9873_v24 = vld [vmem:[#allocation88_spill] sm:$0xff]  ;;  %v9875_v63 = vld [vmem:[#allocation255_spill] sm:$0xff] }
 0x59f   : > { %5080 = vst [vmem:[%s8101_s7 + $0xf0] sm:$0xff] %v5016_v58  ;;  %v4726_v36 = vpop.permute.xlu1 %4725  ;;  %v9861_v58 = vld [vmem:[#allocation86_spill] sm:$0xff]  ;;  %v3099_v61 = vadd.f32 %v2971_v10, %v2138_v45  ;;  %v1165_v40 = vmul.f32 %v8440_v9, %v9873_v24  ;;  %v2974_v34 = vsel %vm2935_vm0, %v9875_v63, %v9874_v37  ;;  %v9876_v5 = vld [vmem:[#allocation152_spill] sm:$0xff]  ;;  %v9881_v10 = vld [vmem:[#allocation257_spill] sm:$0xff] }
 0x5a0   : > { %v4889_v42 = vsel %vm4857_vm2, %v4726_v36, %v4728_v48  ;;  %4849 = vrot.lane.b32.xlu1 %v4469_v29, %s5405_s4  ;;  %v3931_v48 = vsel %vm3896_vm1, %v9854_v21, %v9853_v59  ;;  %v9862_v29 = vld [vmem:[#allocation250_spill] sm:$0xff]  ;;  %v9877_v21 = vld [vmem:[#allocation361_spill] sm:$0xff]  ;;  %v9880_v19 = vld [vmem:[#allocation256_spill] sm:$0xff] }
 0x5a1   : > { %v5017_v14 = vadd.f32 %v4889_v42, %v4056_v23  ;;  %v4736_v3 = vpop.permute.xlu0 %4735  ;;  %v4059_v13 = vadd.f32 %v3931_v48, %v3098_v17  ;;  %v2972_v54 = vsel %vm2935_vm0, %v9863_v8, %v9862_v29  ;;  %v9864_v23 = vld [vmem:[#allocation150_spill] sm:$0xff]  ;;  %v4060_v11 = vadd.f32 %v3932_v56, %v3099_v61  ;;  %v9866_v42 = vld [vmem:[#allocation352_spill] sm:$0xff]  ;;  %v9882_v45 = vld [vmem:[#allocation153_spill] sm:$0xff] }
 0x5a2   : > { %v3933_v32 = vsel %vm3896_vm1, %v9866_v42, %v9865_v38  ;;  %v9878_v48 = vld [vmem:[#allocation356_spill] sm:$0xff]  ;;  %v1166_v17 = vmul.f32 %v8440_v9, %v9879_v50  ;;  %v2975_v27 = vsel %vm2935_vm0, %v9881_v10, %v9880_v19  ;;  %v9883_v12 = vld [vmem:[#allocation363_spill] sm:$0xff]  ;;  %v9884_v56 = vld [vmem:[#allocation358_spill] sm:$0xff] }
 0x5a3   : > { %5081 = vst [vmem:[%s8101_s7 + $0xf8] sm:$0xff] %v5017_v14  ;;  %v4730_v15 = vpop.permute.xlu1 %4729  ;;  %v1164_v14 = vmul.f32 %v8440_v9, %v9867_v47  ;;  %v9886_v8 = vld [vmem:[#allocation258_spill] sm:$0xff]  ;;  %v9889_v42 = vld [vmem:[#allocation365_spill] sm:$0xff]  ;;  %v9904_v10 = vld [vmem:[#allocation264_spill] sm:$0xff] }
 0x5a4   : > { %v4890_v28 = vsel %vm4857_vm2, %v4730_v15, %v4732_v2  ;;  %4853 = vrot.lane.b32.xlu1 %v4471_v51, %s5405_s4  ;;  %v1163_v2 = vmul.f32 %v8440_v9, %v9861_v58  ;;  %v9869_v51 = vld [vmem:[#allocation253_spill] sm:$0xff]  ;;  %v9898_v63 = vld [vmem:[#allocation262_spill] sm:$0xff] }
 0x5a5   : > { %v5018_v7 = vadd.f32 %v4890_v28, %v4057_v26  ;;  %v4740_v4 = vpop.permute.xlu0 %4739  ;;  %v2973_v49 = vsel %vm2935_vm0, %v9869_v51, %v9868_v1  ;;  %v2140_v26 = vadd.f32 %v9870_v57, %v1164_v14  ;;  %v3934_v28 = vsel %vm3896_vm1, %v9872_v33, %v9871_v16  ;;  %v9891_v14 = vld [vmem:[#allocation91_spill] sm:$0xff]  ;;  %v9892_v51 = vld [vmem:[#allocation260_spill] sm:$0xff] }
 0x5a6   : > { %v2139_v36 = vadd.f32 %v9864_v23, %v1163_v2  ;;  %v9885_v2 = vld [vmem:[#allocation90_spill] sm:$0xff]  ;;  %v9895_v33 = vld [vmem:[#allocation367_spill] sm:$0xff] }
 0x5a7   : > { %5082 = vst [vmem:[%s8101_s7 + $0x100] sm:$0xff] %v5018_v7  ;;  %v4734_v39 = vpop.permute.xlu1 %4733  ;;  %v3101_v7 = vadd.f32 %v2973_v49, %v2140_v26  ;;  %v1167_v61 = vmul.f32 %v8440_v9, %v9885_v2  ;;  %v9893_v49 = vld [vmem:[#allocation261_spill] sm:$0xff]  ;;  %v9894_v26 = vld [vmem:[#allocation155_spill] sm:$0xff] }
 0x5a8   : > { %v4891_v62 = vsel %vm4857_vm2, %v4734_v39, %v4736_v3  ;;  %v3100_v3 = vadd.f32 %v2972_v54, %v2139_v36  ;;  %v9887_v54 = vld [vmem:[#allocation259_spill] sm:$0xff]  ;;  %v9888_v36 = vld [vmem:[#allocation154_spill] sm:$0xff]  ;;  %v2977_v57 = vsel %vm2935_vm0, %v9893_v49, %v9892_v51 }
 0x5a9   : > { %v5019_v31 = vadd.f32 %v4891_v62, %v4058_v52  ;;  %v4744_v25 = vpop.permute.xlu0 %4743  ;;  %v2141_v52 = vadd.f32 %v9876_v5, %v1165_v40  ;;  %v4062_v39 = vadd.f32 %v3934_v28, %v3101_v7  ;;  %v3935_v62 = vsel %vm3896_vm1, %v9878_v48, %v9877_v21  ;;  %v9896_v28 = vld [vmem:[#allocation362_spill] sm:$0xff]  ;;  %v9897_v40 = vld [vmem:[#allocation92_spill] sm:$0xff]  ;;  %v9901_v48 = vld [vmem:[#allocation369_spill] sm:$0xff] }
 0x5aa   : > { %v4061_v15 = vadd.f32 %v3933_v32, %v3100_v3  ;;  %v2976_v23 = vsel %vm2935_vm0, %v9887_v54, %v9886_v8  ;;  %v9890_v32 = vld [vmem:[#allocation360_spill] sm:$0xff]  ;;  %v1168_v3 = vmul.f32 %v8440_v9, %v9891_v14  ;;  %v1169_v7 = vmul.f32 %v8440_v9, %v9897_v40  ;;  %v9910_v54 = vld [vmem:[#allocation5_spill] sm:$0xff]  ;;  %v9916_v49 = vld [vmem:[#allocation7_spill] sm:$0xff] }
 0x5ab   : > { %5083 = vst [vmem:[%s8101_s7 + $0x108] sm:$0xff] %v5019_v31  ;;  %v4738_v46 = vpop.permute.xlu1 %4737  ;;  %v3102_v31 = vadd.f32 %v2974_v34, %v2141_v52  ;;  %v9899_v34 = vld [vmem:[#allocation263_spill] sm:$0xff]  ;;  %v9900_v52 = vld [vmem:[#allocation156_spill] sm:$0xff] }
 0x5ac   : > { %v4892_v60 = vsel %vm4857_vm2, %v4738_v46, %v4740_v4  ;;  %v2978_v5 = vsel %vm2935_vm0, %v9899_v34, %v9898_v63  ;;  %v9922_v34 = vld [vmem:[#allocation268_spill] sm:$0xff] }
 0x5ad   : > { %v5020_v18 = vadd.f32 %v4892_v60, %v4059_v13  ;;  %v4748_v44 = vpop.permute.xlu0 %4747  ;;  %v2142_v13 = vadd.f32 %v9882_v45, %v1166_v17  ;;  %v4063_v46 = vadd.f32 %v3935_v62, %v3102_v31  ;;  %v3936_v60 = vsel %vm3896_vm1, %v9884_v56, %v9883_v12  ;;  %v9902_v62 = vld [vmem:[#allocation364_spill] sm:$0xff]  ;;  %v9903_v17 = vld [vmem:[#allocation93_spill] sm:$0xff] }
 0x5ae   : > { %v1170_v31 = vmul.f32 %v8440_v9, %v9903_v17  ;;  %v9907_v56 = vld [vmem:[#allocation9_spill] sm:$0xff] }
 0x5af   : > { %5084 = vst [vmem:[%s8101_s7 + $0x110] sm:$0xff] %v5020_v18  ;;  %v4742_v30 = vpop.permute.xlu1 %4741  ;;  %v3103_v18 = vadd.f32 %v2975_v27, %v2142_v13  ;;  %v9905_v27 = vld [vmem:[#allocation265_spill] sm:$0xff] }
 0x5b0   : > { %v4893_v41 = vsel %vm4857_vm2, %v4742_v30, %v4744_v25  ;;  %v2979_v45 = vsel %vm2935_vm0, %v9905_v27, %v9904_v10  ;;  %v9906_v13 = vld [vmem:[#allocation157_spill] sm:$0xff]  ;;  %v9928_v27 = vld [vmem:[#allocation270_spill] sm:$0xff] }
 0x5b1   : > { %v5021_v43 = vadd.f32 %v4893_v41, %v4060_v11  ;;  %v4752_v55 = vpop.permute.xlu0 %4751  ;;  %v2143_v11 = vadd.f32 %v9888_v36, %v1167_v61  ;;  %v4064_v30 = vadd.f32 %v3936_v60, %v3103_v18  ;;  %v3937_v41 = vsel %vm3896_vm1, %v9890_v32, %v9889_v42  ;;  %v9908_v60 = vld [vmem:[#allocation366_spill] sm:$0xff]  ;;  %v9913_v32 = vld [vmem:[#allocation11_spill] sm:$0xff] }
 0x5b2   : > { %v9909_v61 = vld [vmem:[#allocation94_spill] sm:$0xff] }
 0x5b3   : > { %5085 = vst [vmem:[%s8101_s7 + $0x118] sm:$0xff] %v5021_v43  ;;  %v4746_v22 = vpop.permute.xlu1 %4745  ;;  %v3104_v43 = vadd.f32 %v2976_v23, %v2143_v11  ;;  %v1171_v18 = vmul.f32 %v8440_v9, %v9909_v61  ;;  %v9911_v23 = vld [vmem:[#allocation266_spill] sm:$0xff] }
 0x5b4   : > { %v4894_v0 = vsel %vm4857_vm2, %v4746_v22, %v4748_v44  ;;  %v2980_v36 = vsel %vm2935_vm0, %v9911_v23, %v9910_v54  ;;  %v9912_v11 = vld [vmem:[#allocation158_spill] sm:$0xff]  ;;  %v9934_v23 = vld [vmem:[#allocation272_spill] sm:$0xff] }
 0x5b5   : > { %v5022_v4 = vadd.f32 %v4894_v0, %v4061_v15  ;;  %v4756_v35 = vpop.permute.xlu0 %4755  ;;  %v2144_v15 = vadd.f32 %v9894_v26, %v1168_v3  ;;  %v4065_v22 = vadd.f32 %v3937_v41, %v3104_v43  ;;  %v3938_v0 = vsel %vm3896_vm1, %v9896_v28, %v9895_v33  ;;  %v9914_v41 = vld [vmem:[#allocation368_spill] sm:$0xff]  ;;  %v9915_v3 = vld [vmem:[#allocation95_spill] sm:$0xff]  ;;  %v9919_v28 = vld [vmem:[#allocation13_spill] sm:$0xff] }
 0x5b6   : > { %v1172_v43 = vmul.f32 %v8440_v9, %v9915_v3 }
 0x5b7   : > { %5086 = vst [vmem:[%s8101_s7 + $0x120] sm:$0xff] %v5022_v4  ;;  %v4750_v59 = vpop.permute.xlu1 %4749  ;;  %v3105_v4 = vadd.f32 %v2977_v57, %v2144_v15  ;;  %v9917_v57 = vld [vmem:[#allocation267_spill] sm:$0xff] }
 0x5b8   : > { %v4895_v53 = vsel %vm4857_vm2, %v4750_v59, %v4752_v55  ;;  %v2981_v26 = vsel %vm2935_vm0, %v9917_v57, %v9916_v49  ;;  %v9918_v15 = vld [vmem:[#allocation159_spill] sm:$0xff]  ;;  %v9940_v57 = vld [vmem:[#allocation274_spill] sm:$0xff] }
 0x5b9   : > { %v5023_v25 = vadd.f32 %v4895_v53, %v4062_v39  ;;  %v4760_v20 = vpop.permute.xlu0 %4759  ;;  %v2145_v39 = vadd.f32 %v9900_v52, %v1169_v7  ;;  %v4066_v59 = vadd.f32 %v3938_v0, %v3105_v4  ;;  %v3939_v53 = vsel %vm3896_vm1, %v9902_v62, %v9901_v48  ;;  %v9920_v0 = vld [vmem:[#allocation370_spill] sm:$0xff]  ;;  %v9921_v7 = vld [vmem:[#allocation96_spill] sm:$0xff]  ;;  %v9925_v62 = vld [vmem:[#allocation15_spill] sm:$0xff] }
 0x5ba   : > { %v1173_v4 = vmul.f32 %v8440_v9, %v9921_v7 }
 0x5bb   : > { %5087 = vst [vmem:[%s8101_s7 + $0x128] sm:$0xff] %v5023_v25  ;;  %v4754_v6 = vpop.permute.xlu1 %4753  ;;  %v3106_v25 = vadd.f32 %v2978_v5, %v2145_v39  ;;  %v9923_v5 = vld [vmem:[#allocation269_spill] sm:$0xff]  ;;  %v9924_v39 = vld [vmem:[#allocation160_spill] sm:$0xff] }
 0x5bc   : > { %v4896_v58 = vsel %vm4857_vm2, %v4754_v6, %v4756_v35  ;;  %v2982_v52 = vsel %vm2935_vm0, %v9923_v5, %v9922_v34  ;;  %v9946_v5 = vld [vmem:[#allocation276_spill] sm:$0xff] }
 0x5bd   : > { %v5024_v44 = vadd.f32 %v4896_v58, %v4063_v46  ;;  %v4764_v29 = vpop.permute.xlu0 %4763  ;;  %v2146_v46 = vadd.f32 %v9906_v13, %v1170_v31  ;;  %v4067_v6 = vadd.f32 %v3939_v53, %v3106_v25  ;;  %v3940_v58 = vsel %vm3896_vm1, %v9908_v60, %v9907_v56  ;;  %v9926_v53 = vld [vmem:[#allocation6_spill] sm:$0xff]  ;;  %v9927_v31 = vld [vmem:[#allocation97_spill] sm:$0xff] }
 0x5be   : > { %v1174_v25 = vmul.f32 %v8440_v9, %v9927_v31  ;;  %v9931_v60 = vld [vmem:[#allocation17_spill] sm:$0xff] }
 0x5bf   : > { %5088 = vst [vmem:[%s8101_s7 + $0x130] sm:$0xff] %v5024_v44  ;;  %v4758_v38 = vpop.permute.xlu1 %4757  ;;  %v3107_v44 = vadd.f32 %v2979_v45, %v2146_v46  ;;  %v9929_v45 = vld [vmem:[#allocation271_spill] sm:$0xff]  ;;  %v9930_v46 = vld [vmem:[#allocation161_spill] sm:$0xff] }
 0x5c0   : > { %v4897_v47 = vsel %vm4857_vm2, %v4758_v38, %v4760_v20  ;;  %v2983_v13 = vsel %vm2935_vm0, %v9929_v45, %v9928_v27  ;;  %v9952_v45 = vld [vmem:[#allocation278_spill] sm:$0xff] }
 0x5c1   : > { %v5025_v55 = vadd.f32 %v4897_v47, %v4064_v30  ;;  %v4768_v1 = vpop.permute.xlu0 %4767  ;;  %v2147_v30 = vadd.f32 %v9912_v11, %v1171_v18  ;;  %v4068_v38 = vadd.f32 %v3940_v58, %v3107_v44  ;;  %v3941_v47 = vsel %vm3896_vm1, %v9914_v41, %v9913_v32  ;;  %v9932_v58 = vld [vmem:[#allocation8_spill] sm:$0xff]  ;;  %v9933_v18 = vld [vmem:[#allocation98_spill] sm:$0xff]  ;;  %v9937_v41 = vld [vmem:[#allocation19_spill] sm:$0xff] }
 0x5c2   : > { %v1175_v44 = vmul.f32 %v8440_v9, %v9933_v18 }
 0x5c3   : > { %5089 = vst [vmem:[%s8101_s7 + $0x138] sm:$0xff] %v5025_v55  ;;  %v4762_v16 = vpop.permute.xlu1 %4761  ;;  %v3108_v55 = vadd.f32 %v2980_v36, %v2147_v30  ;;  %v9935_v36 = vld [vmem:[#allocation273_spill] sm:$0xff]  ;;  %v9936_v30 = vld [vmem:[#allocation162_spill] sm:$0xff] }
 0x5c4   : > { %v4898_v24 = vsel %vm4857_vm2, %v4762_v16, %v4764_v29  ;;  %v2984_v11 = vsel %vm2935_vm0, %v9935_v36, %v9934_v23  ;;  %v9958_v36 = vld [vmem:[#allocation280_spill] sm:$0xff] }
 0x5c5   : > { %v5026_v35 = vadd.f32 %v4898_v24, %v4065_v22  ;;  %v4772_v37 = vpop.permute.xlu0 %4771  ;;  %v2148_v22 = vadd.f32 %v9918_v15, %v1172_v43  ;;  %v4069_v16 = vadd.f32 %v3941_v47, %v3108_v55  ;;  %v3942_v24 = vsel %vm3896_vm1, %v9920_v0, %v9919_v28  ;;  %v9938_v47 = vld [vmem:[#allocation10_spill] sm:$0xff]  ;;  %v9939_v43 = vld [vmem:[#allocation99_spill] sm:$0xff]  ;;  %v9943_v0 = vld [vmem:[#allocation21_spill] sm:$0xff] }
 0x5c6   : > { %v1176_v55 = vmul.f32 %v8440_v9, %v9939_v43 }
 0x5c7   : > { %5090 = vst [vmem:[%s8101_s7 + $0x140] sm:$0xff] %v5026_v35  ;;  %v4766_v21 = vpop.permute.xlu1 %4765  ;;  %v3109_v35 = vadd.f32 %v2981_v26, %v2148_v22  ;;  %v9941_v26 = vld [vmem:[#allocation275_spill] sm:$0xff] }
 0x5c8   : > { %v4899_v50 = vsel %vm4857_vm2, %v4766_v21, %v4768_v1  ;;  %v2985_v15 = vsel %vm2935_vm0, %v9941_v26, %v9940_v57  ;;  %v9942_v22 = vld [vmem:[#allocation163_spill] sm:$0xff]  ;;  %v9964_v26 = vld [vmem:[#allocation282_spill] sm:$0xff] }
 0x5c9   : > { %v5027_v20 = vadd.f32 %v4899_v50, %v4066_v59  ;;  %v4776_v19 = vpop.permute.xlu0 %4775  ;;  %v2149_v59 = vadd.f32 %v9924_v39, %v1173_v4  ;;  %v4070_v21 = vadd.f32 %v3942_v24, %v3109_v35  ;;  %v3943_v50 = vsel %vm3896_vm1, %v9926_v53, %v9925_v62  ;;  %v9944_v24 = vld [vmem:[#allocation12_spill] sm:$0xff]  ;;  %v9949_v53 = vld [vmem:[#allocation23_spill] sm:$0xff] }
 0x5ca   : > { %v9945_v4 = vld [vmem:[#allocation100_spill] sm:$0xff] }
 0x5cb   : > { %5091 = vst [vmem:[%s8101_s7 + $0x148] sm:$0xff] %v5027_v20  ;;  %v4770_v12 = vpop.permute.xlu1 %4769  ;;  %v3110_v20 = vadd.f32 %v2982_v52, %v2149_v59  ;;  %v1177_v35 = vmul.f32 %v8440_v9, %v9945_v4  ;;  %v9947_v52 = vld [vmem:[#allocation277_spill] sm:$0xff]  ;;  %v9948_v59 = vld [vmem:[#allocation164_spill] sm:$0xff] }
 0x5cc   : > { %v4900_v2 = vsel %vm4857_vm2, %v4770_v12, %v4772_v37  ;;  %v2986_v39 = vsel %vm2935_vm0, %v9947_v52, %v9946_v5  ;;  %v9970_v52 = vld [vmem:[#allocation284_spill] sm:$0xff] }
 0x5cd   : > { %v5028_v29 = vadd.f32 %v4900_v2, %v4067_v6  ;;  %v4780_v8 = vpop.permute.xlu0 %4779  ;;  %v2150_v6 = vadd.f32 %v9930_v46, %v1174_v25  ;;  %v4071_v12 = vadd.f32 %v3943_v50, %v3110_v20  ;;  %v3944_v2 = vsel %vm3896_vm1, %v9932_v58, %v9931_v60  ;;  %v9950_v50 = vld [vmem:[#allocation14_spill] sm:$0xff]  ;;  %v9951_v25 = vld [vmem:[#allocation101_spill] sm:$0xff] }
 0x5ce   : > { %v1178_v20 = vmul.f32 %v8440_v9, %v9951_v25  ;;  %v9955_v58 = vld [vmem:[#allocation25_spill] sm:$0xff] }
 0x5cf   : > { %5092 = vst [vmem:[%s8101_s7 + $0x150] sm:$0xff] %v5028_v29  ;;  %v4774_v42 = vpop.permute.xlu1 %4773  ;;  %v3111_v29 = vadd.f32 %v2983_v13, %v2150_v6  ;;  %v9953_v13 = vld [vmem:[#allocation279_spill] sm:$0xff]  ;;  %v9954_v6 = vld [vmem:[#allocation165_spill] sm:$0xff] }
 0x5d0   : > { %v4901_v14 = vsel %vm4857_vm2, %v4774_v42, %v4776_v19  ;;  %v2987_v46 = vsel %vm2935_vm0, %v9953_v13, %v9952_v45  ;;  %v9976_v13 = vld [vmem:[#allocation286_spill] sm:$0xff] }
 0x5d1   : > { %v5029_v1 = vadd.f32 %v4901_v14, %v4068_v38  ;;  %v4784_v51 = vpop.permute.xlu0 %4783  ;;  %v2151_v38 = vadd.f32 %v9936_v30, %v1175_v44  ;;  %v4072_v42 = vadd.f32 %v3944_v2, %v3111_v29  ;;  %v3945_v14 = vsel %vm3896_vm1, %v9938_v47, %v9937_v41  ;;  %v9956_v2 = vld [vmem:[#allocation16_spill] sm:$0xff]  ;;  %v9957_v44 = vld [vmem:[#allocation102_spill] sm:$0xff]  ;;  %v9961_v47 = vld [vmem:[#allocation27_spill] sm:$0xff] }
 0x5d2   : > { %v1179_v29 = vmul.f32 %v8440_v9, %v9957_v44 }
 0x5d3   : > { %5093 = vst [vmem:[%s8101_s7 + $0x158] sm:$0xff] %v5029_v1  ;;  %v4778_v33 = vpop.permute.xlu1 %4777  ;;  %v3112_v1 = vadd.f32 %v2984_v11, %v2151_v38  ;;  %v9959_v11 = vld [vmem:[#allocation281_spill] sm:$0xff]  ;;  %v9960_v38 = vld [vmem:[#allocation166_spill] sm:$0xff] }
 0x5d4   : > { %v4902_v40 = vsel %vm4857_vm2, %v4778_v33, %v4780_v8  ;;  %v2988_v30 = vsel %vm2935_vm0, %v9959_v11, %v9958_v36  ;;  %v9982_v11 = vld [vmem:[#allocation288_spill] sm:$0xff] }
 0x5d5   : > { %v5030_v37 = vadd.f32 %v4902_v40, %v4069_v16  ;;  %v4788_v63 = vpop.permute.xlu0 %4787  ;;  %v2152_v16 = vadd.f32 %v9942_v22, %v1176_v55  ;;  %v4073_v33 = vadd.f32 %v3945_v14, %v3112_v1  ;;  %v3946_v40 = vsel %vm3896_vm1, %v9944_v24, %v9943_v0  ;;  %v9962_v14 = vld [vmem:[#allocation18_spill] sm:$0xff]  ;;  %v9963_v55 = vld [vmem:[#allocation103_spill] sm:$0xff]  ;;  %v9967_v24 = vld [vmem:[#allocation29_spill] sm:$0xff] }
 0x5d6   : > { %v1180_v1 = vmul.f32 %v8440_v9, %v9963_v55 }
 0x5d7   : > { %5094 = vst [vmem:[%s8101_s7 + $0x160] sm:$0xff] %v5030_v37  ;;  %v4782_v48 = vpop.permute.xlu1 %4781  ;;  %v3113_v37 = vadd.f32 %v2985_v15, %v2152_v16  ;;  %v9965_v15 = vld [vmem:[#allocation283_spill] sm:$0xff] }
 0x5d8   : > { %v4903_v17 = vsel %vm4857_vm2, %v4782_v48, %v4784_v51  ;;  %v2989_v22 = vsel %vm2935_vm0, %v9965_v15, %v9964_v26  ;;  %v9966_v16 = vld [vmem:[#allocation167_spill] sm:$0xff]  ;;  %v9988_v15 = vld [vmem:[#allocation290_spill] sm:$0xff] }
 0x5d9   : > { %v5031_v19 = vadd.f32 %v4903_v17, %v4070_v21  ;;  %v4792_v10 = vpop.permute.xlu0 %4791  ;;  %v2153_v21 = vadd.f32 %v9948_v59, %v1177_v35  ;;  %v4074_v48 = vadd.f32 %v3946_v40, %v3113_v37  ;;  %v3947_v17 = vsel %vm3896_vm1, %v9950_v50, %v9949_v53  ;;  %v9968_v40 = vld [vmem:[#allocation20_spill] sm:$0xff]  ;;  %v9973_v50 = vld [vmem:[#allocation31_spill] sm:$0xff] }
 0x5da   : > { %v9969_v35 = vld [vmem:[#allocation104_spill] sm:$0xff] }
 0x5db   : > { %5095 = vst [vmem:[%s8101_s7 + $0x168] sm:$0xff] %v5031_v19  ;;  %v4786_v56 = vpop.permute.xlu1 %4785  ;;  %v3114_v19 = vadd.f32 %v2986_v39, %v2153_v21  ;;  %v1181_v37 = vmul.f32 %v8440_v9, %v9969_v35  ;;  %v9971_v39 = vld [vmem:[#allocation285_spill] sm:$0xff]  ;;  %v9972_v21 = vld [vmem:[#allocation168_spill] sm:$0xff] }
 0x5dc   : > { %v4904_v61 = vsel %vm4857_vm2, %v4786_v56, %v4788_v63  ;;  %v2990_v59 = vsel %vm2935_vm0, %v9971_v39, %v9970_v52  ;;  %v9994_v39 = vld [vmem:[#allocation292_spill] sm:$0xff] }
 0x5dd   : > { %v5032_v8 = vadd.f32 %v4904_v61, %v4071_v12  ;;  %v4796_v54 = vpop.permute.xlu0 %4795  ;;  %v2154_v12 = vadd.f32 %v9954_v6, %v1178_v20  ;;  %v4075_v56 = vadd.f32 %v3947_v17, %v3114_v19  ;;  %v3948_v61 = vsel %vm3896_vm1, %v9956_v2, %v9955_v58  ;;  %v9974_v17 = vld [vmem:[#allocation22_spill] sm:$0xff]  ;;  %v9975_v20 = vld [vmem:[#allocation105_spill] sm:$0xff] }
 0x5de   : > { %v1182_v19 = vmul.f32 %v8440_v9, %v9975_v20  ;;  %v9979_v2 = vld [vmem:[#allocation33_spill] sm:$0xff] }
 0x5df   : > { %5096 = vst [vmem:[%s8101_s7 + $0x170] sm:$0xff] %v5032_v8  ;;  %v4790_v32 = vpop.permute.xlu1 %4789  ;;  %v3115_v8 = vadd.f32 %v2987_v46, %v2154_v12  ;;  %v9977_v46 = vld [vmem:[#allocation287_spill] sm:$0xff]  ;;  %v9978_v12 = vld [vmem:[#allocation169_spill] sm:$0xff] }
 0x5e0   : > { %v4905_v3 = vsel %vm4857_vm2, %v4790_v32, %v4792_v10  ;;  %v2991_v6 = vsel %vm2935_vm0, %v9977_v46, %v9976_v13  ;;  %v10000_v46 = vld [vmem:[#allocation294_spill] sm:$0xff] }
 0x5e1   : > { %v5033_v51 = vadd.f32 %v4905_v3, %v4072_v42  ;;  %v4800_v49 = vpop.permute.xlu0 %4799  ;;  %v2155_v42 = vadd.f32 %v9960_v38, %v1179_v29  ;;  %v4076_v32 = vadd.f32 %v3948_v61, %v3115_v8  ;;  %v3949_v3 = vsel %vm3896_vm1, %v9962_v14, %v9961_v47  ;;  %v9980_v61 = vld [vmem:[#allocation24_spill] sm:$0xff]  ;;  %v9981_v29 = vld [vmem:[#allocation106_spill] sm:$0xff]  ;;  %v9985_v14 = vld [vmem:[#allocation35_spill] sm:$0xff] }
 0x5e2   : > { %v1183_v8 = vmul.f32 %v8440_v9, %v9981_v29 }
 0x5e3   : > { %5097 = vst [vmem:[%s8101_s7 + $0x178] sm:$0xff] %v5033_v51  ;;  %v4794_v28 = vpop.permute.xlu1 %4793  ;;  %v3116_v51 = vadd.f32 %v2988_v30, %v2155_v42  ;;  %v9983_v30 = vld [vmem:[#allocation289_spill] sm:$0xff]  ;;  %v9984_v42 = vld [vmem:[#allocation170_spill] sm:$0xff] }
 0x5e4   : > { %v4906_v7 = vsel %vm4857_vm2, %v4794_v28, %v4796_v54  ;;  %v2992_v38 = vsel %vm2935_vm0, %v9983_v30, %v9982_v11  ;;  %v10006_v30 = vld [vmem:[#allocation296_spill] sm:$0xff] }
 0x5e5   : > { %v5034_v63 = vadd.f32 %v4906_v7, %v4073_v33  ;;  %v4804_v34 = vpop.permute.xlu0 %4803  ;;  %v2156_v33 = vadd.f32 %v9966_v16, %v1180_v1  ;;  %v4077_v28 = vadd.f32 %v3949_v3, %v3116_v51  ;;  %v3950_v7 = vsel %vm3896_vm1, %v9968_v40, %v9967_v24  ;;  %v9986_v3 = vld [vmem:[#allocation26_spill] sm:$0xff]  ;;  %v9987_v1 = vld [vmem:[#allocation107_spill] sm:$0xff]  ;;  %v9991_v40 = vld [vmem:[#allocation37_spill] sm:$0xff] }
 0x5e6   : > { %v1184_v51 = vmul.f32 %v8440_v9, %v9987_v1 }
 0x5e7   : > { %5098 = vst [vmem:[%s8101_s7 + $0x180] sm:$0xff] %v5034_v63  ;;  %v4798_v62 = vpop.permute.xlu1 %4797  ;;  %v3117_v63 = vadd.f32 %v2989_v22, %v2156_v33  ;;  %v9989_v22 = vld [vmem:[#allocation291_spill] sm:$0xff] }
 0x5e8   : > { %v4907_v31 = vsel %vm4857_vm2, %v4798_v62, %v4800_v49  ;;  %v2993_v16 = vsel %vm2935_vm0, %v9989_v22, %v9988_v15  ;;  %v9990_v33 = vld [vmem:[#allocation171_spill] sm:$0xff]  ;;  %v10012_v15 = vld [vmem:[#allocation298_spill] sm:$0xff] }
 0x5e9   : > { %v5035_v10 = vadd.f32 %v4907_v31, %v4074_v48  ;;  %v4808_v27 = vpop.permute.xlu0 %4807  ;;  %v2157_v48 = vadd.f32 %v9972_v21, %v1181_v37  ;;  %v4078_v62 = vadd.f32 %v3950_v7, %v3117_v63  ;;  %v3951_v31 = vsel %vm3896_vm1, %v9974_v17, %v9973_v50  ;;  %v9992_v7 = vld [vmem:[#allocation28_spill] sm:$0xff]  ;;  %v9997_v17 = vld [vmem:[#allocation39_spill] sm:$0xff] }
 0x5ea   : > { %v9993_v37 = vld [vmem:[#allocation108_spill] sm:$0xff]  ;;  %v10013_v22 = vld [vmem:[#allocation299_spill] sm:$0xff] }
 0x5eb   : > { %5099 = vst [vmem:[%s8101_s7 + $0x188] sm:$0xff] %v5035_v10  ;;  %v4802_v60 = vpop.permute.xlu1 %4801  ;;  %v3118_v10 = vadd.f32 %v2990_v59, %v2157_v48  ;;  %v1185_v63 = vmul.f32 %v8440_v9, %v9993_v37  ;;  %v9995_v59 = vld [vmem:[#allocation293_spill] sm:$0xff]  ;;  %v9996_v48 = vld [vmem:[#allocation172_spill] sm:$0xff] }
 0x5ec   : > { %v4908_v18 = vsel %vm4857_vm2, %v4802_v60, %v4804_v34  ;;  %v2994_v21 = vsel %vm2935_vm0, %v9995_v59, %v9994_v39  ;;  %v10018_v39 = vld [vmem:[#allocation300_spill] sm:$0xff]  ;;  %v10019_v59 = vld [vmem:[#allocation301_spill] sm:$0xff] }
 0x5ed   : > { %v5036_v54 = vadd.f32 %v4908_v18, %v4075_v56  ;;  %v4812_v23 = vpop.permute.xlu0 %4811  ;;  %v2158_v56 = vadd.f32 %v9978_v12, %v1182_v19  ;;  %v4079_v60 = vadd.f32 %v3951_v31, %v3118_v10  ;;  %v3952_v18 = vsel %vm3896_vm1, %v9980_v61, %v9979_v2  ;;  %v9998_v31 = vld [vmem:[#allocation30_spill] sm:$0xff]  ;;  %v9999_v19 = vld [vmem:[#allocation109_spill] sm:$0xff] }
 0x5ee   : > { %v1186_v10 = vmul.f32 %v8440_v9, %v9999_v19  ;;  %v10003_v61 = vld [vmem:[#allocation41_spill] sm:$0xff] }
 0x5ef   : > { %5100 = vst [vmem:[%s8101_s7 + $0x190] sm:$0xff] %v5036_v54  ;;  %v4806_v41 = vpop.permute.xlu1 %4805  ;;  %v3119_v54 = vadd.f32 %v2991_v6, %v2158_v56  ;;  %v10001_v6 = vld [vmem:[#allocation295_spill] sm:$0xff]  ;;  %v10002_v56 = vld [vmem:[#allocation173_spill] sm:$0xff] }
 0x5f0   : > { %v4909_v43 = vsel %vm4857_vm2, %v4806_v41, %v4808_v27  ;;  %v2995_v12 = vsel %vm2935_vm0, %v10001_v6, %v10000_v46  ;;  %v10023_v19 = vld [vmem:[#allocation113_spill] sm:$0xff]  ;;  %v10024_v46 = vld [vmem:[#allocation302_spill] sm:$0xff]  ;;  %v10025_v6 = vld [vmem:[#allocation303_spill] sm:$0xff] }
 0x5f1   : > { %v5037_v49 = vadd.f32 %v4909_v43, %v4076_v32  ;;  %v4816_v57 = vpop.permute.xlu0 %4815  ;;  %v2159_v32 = vadd.f32 %v9984_v42, %v1183_v8  ;;  %v4080_v41 = vadd.f32 %v3952_v18, %v3119_v54  ;;  %v3953_v43 = vsel %vm3896_vm1, %v9986_v3, %v9985_v14  ;;  %v10004_v18 = vld [vmem:[#allocation32_spill] sm:$0xff]  ;;  %v10005_v8 = vld [vmem:[#allocation110_spill] sm:$0xff]  ;;  %v10009_v3 = vld [vmem:[#allocation43_spill] sm:$0xff] }
 0x5f2   : > { %v1187_v54 = vmul.f32 %v8440_v9, %v10005_v8 }
 0x5f3   : > { %5101 = vst [vmem:[%s8101_s7 + $0x198] sm:$0xff] %v5037_v49  ;;  %v4810_v0 = vpop.permute.xlu1 %4809  ;;  %v3120_v49 = vadd.f32 %v2992_v38, %v2159_v32  ;;  %v10007_v38 = vld [vmem:[#allocation297_spill] sm:$0xff]  ;;  %v10008_v32 = vld [vmem:[#allocation174_spill] sm:$0xff] }
 0x5f4   : > { %v4910_v4 = vsel %vm4857_vm2, %v4810_v0, %v4812_v23  ;;  %v2996_v42 = vsel %vm2935_vm0, %v10007_v38, %v10006_v30 }
 0x5f5   : > { %v5038_v34 = vadd.f32 %v4910_v4, %v4077_v28  ;;  %v4820_v5 = vpop.permute.xlu0 %4819  ;;  %v2160_v28 = vadd.f32 %v9990_v33, %v1184_v51  ;;  %v4081_v0 = vadd.f32 %v3953_v43, %v3120_v49  ;;  %v3954_v4 = vsel %vm3896_vm1, %v9992_v7, %v9991_v40  ;;  %v10010_v43 = vld [vmem:[#allocation34_spill] sm:$0xff]  ;;  %v10011_v51 = vld [vmem:[#allocation111_spill] sm:$0xff]  ;;  %v10015_v7 = vld [vmem:[#allocation40_spill] sm:$0xff] }
 0x5f6   : > { %v1188_v49 = vmul.f32 %v8440_v9, %v10011_v51  ;;  %v10014_v33 = vld [vmem:[#allocation175_spill] sm:$0xff] }
 0x5f7   : > { %5102 = vst [vmem:[%s8101_s7 + $0x1a0] sm:$0xff] %v5038_v34  ;;  %v4814_v53 = vpop.permute.xlu1 %4813  ;;  %v3121_v34 = vadd.f32 %v2993_v16, %v2160_v28  ;;  %v2997_v16 = vsel %vm2935_vm0, %v10013_v22, %v10012_v15 }
 0x5f8   : > { %v4911_v25 = vsel %vm4857_vm2, %v4814_v53, %v4816_v57  ;;  %v2164_v28 = vadd.f32 %v10014_v33, %v1188_v49 }
 0x5f9   : > { %v5039_v27 = vadd.f32 %v4911_v25, %v4078_v62  ;;  %v4824_v45 = vpop.permute.xlu0 %4823  ;;  %v2161_v62 = vadd.f32 %v9996_v48, %v1185_v63  ;;  %v4082_v53 = vadd.f32 %v3954_v4, %v3121_v34  ;;  %v3955_v25 = vsel %vm3896_vm1, %v9998_v31, %v9997_v17  ;;  %v10016_v4 = vld [vmem:[#allocation36_spill] sm:$0xff]  ;;  %v10021_v17 = vld [vmem:[#allocation42_spill] sm:$0xff] }
 0x5fa   : > { %v10017_v63 = vld [vmem:[#allocation112_spill] sm:$0xff]  ;;  %v10022_v31 = vld [vmem:[#allocation38_spill] sm:$0xff] }
 0x5fb   : > { %5103 = vst [vmem:[%s8101_s7 + $0x1a8] sm:$0xff] %v5039_v27  ;;  %v4818_v58 = vpop.permute.xlu1 %4817  ;;  %v3122_v27 = vadd.f32 %v2994_v21, %v2161_v62  ;;  %v1189_v34 = vmul.f32 %v8440_v9, %v10017_v63  ;;  %v2998_v21 = vsel %vm2935_vm0, %v10019_v59, %v10018_v39  ;;  %v10020_v48 = vld [vmem:[#allocation176_spill] sm:$0xff] }
 0x5fc   : > { %v4912_v44 = vsel %vm4857_vm2, %v4818_v58, %v4820_v5 }
 0x5fd   : > { %v5040_v23 = vadd.f32 %v4912_v44, %v4079_v60  ;;  %v4828_v36 = vpop.permute.xlu0 %4827  ;;  %v2162_v60 = vadd.f32 %v10002_v56, %v1186_v10  ;;  %v4083_v58 = vadd.f32 %v3955_v25, %v3122_v27  ;;  %v3956_v44 = vsel %vm3896_vm1, %v10004_v18, %v10003_v61  ;;  %v10026_v56 = vld [vmem:[#allocation177_spill] sm:$0xff]  ;;  %v10027_v61 = vld [vmem:[#allocation47_spill] sm:$0xff] }
 0x5fe   : > { %v2165_v62 = vadd.f32 %v10020_v48, %v1189_v34  ;;  %v3959_v25 = vsel %vm3896_vm1, %v10022_v31, %v10021_v17  ;;  %v1190_v10 = vmul.f32 %v8440_v9, %v10023_v19  ;;  %v10028_v18 = vld [vmem:[#allocation45_spill] sm:$0xff] }
 0x5ff   : > { %5104 = vst [vmem:[%s8101_s7 + $0x1b0] sm:$0xff] %v5040_v23  ;;  %v4822_v47 = vpop.permute.xlu1 %4821  ;;  %v3123_v23 = vadd.f32 %v2995_v12, %v2162_v60  ;;  %v2999_v12 = vsel %vm2935_vm0, %v10025_v6, %v10024_v46 }
 0x600   : > { %v4913_v55 = vsel %vm4857_vm2, %v4822_v47, %v4824_v45  ;;  %v3126_v27 = vadd.f32 %v2998_v21, %v2165_v62  ;;  %v2166_v60 = vadd.f32 %v10026_v56, %v1190_v10 }
 0x601   : > { %v5041_v57 = vadd.f32 %v4913_v55, %v4080_v41  ;;  %v4832_v26 = vpop.permute.xlu0 %4831  ;;  %v2163_v41 = vadd.f32 %v10008_v32, %v1187_v54  ;;  %v4084_v47 = vadd.f32 %v3956_v44, %v3123_v23  ;;  %v3957_v55 = vsel %vm3896_vm1, %v10010_v43, %v10009_v3 }
 0x602   : > { %v3960_v44 = vsel %vm3896_vm1, %v10028_v18, %v10027_v61 }
 0x603   : > { %5105 = vst [vmem:[%s8101_s7 + $0x1b8] sm:$0xff] %v5041_v57  ;;  %v4826_v24 = vpop.permute.xlu1 %4825  ;;  %v3124_v57 = vadd.f32 %v2996_v42, %v2163_v41 }
 0x604   : > { %v4914_v35 = vsel %vm4857_vm2, %v4826_v24, %v4828_v36 }
 0x605   : > { %v5042_v5 = vadd.f32 %v4914_v35, %v4081_v0  ;;  %v4836_v52 = vpop.permute.xlu0 %4835  ;;  %v4085_v0 = vadd.f32 %v3957_v55, %v3124_v57  ;;  %v3958_v35 = vsel %vm3896_vm1, %v10016_v4, %v10015_v7 }
 0x607   : > { %5106 = vst [vmem:[%s8101_s7 + $0x1c0] sm:$0xff] %v5042_v5  ;;  %v4830_v50 = vpop.permute.xlu1 %4829  ;;  %v3125_v5 = vadd.f32 %v2997_v16, %v2164_v28 }
 0x608   : > { %v4915_v20 = vsel %vm4857_vm2, %v4830_v50, %v4832_v26 }
 0x609   : > { %v5043_v45 = vadd.f32 %v4915_v20, %v4082_v53  ;;  %v4840_v13 = vpop.permute.xlu0 %4839  ;;  %v4086_v53 = vadd.f32 %v3958_v35, %v3125_v5 }
 0x60b   : > { %5107 = vst [vmem:[%s8101_s7 + $0x1c8] sm:$0xff] %v5043_v45  ;;  %v4834_v2 = vpop.permute.xlu1 %4833 }
 0x60c   : > { %v4916_v29 = vsel %vm4857_vm2, %v4834_v2, %v4836_v52 }
 0x60d   : > { %v5044_v36 = vadd.f32 %v4916_v29, %v4083_v58  ;;  %v4844_v11 = vpop.permute.xlu0 %4843  ;;  %v4087_v58 = vadd.f32 %v3959_v25, %v3126_v27  ;;  %v3127_v29 = vadd.f32 %v2999_v12, %v2166_v60 }
 0x60f   : > { %5108 = vst [vmem:[%s8101_s7 + $0x1d0] sm:$0xff] %v5044_v36  ;;  %v4838_v14 = vpop.permute.xlu1 %4837  ;;  %v4088_v54 = vadd.f32 %v3960_v44, %v3127_v29 }
 0x610   : > { %v4917_v1 = vsel %vm4857_vm2, %v4838_v14, %v4840_v13 }
 0x611   : > { %v5045_v26 = vadd.f32 %v4917_v1, %v4084_v47  ;;  %v4848_v24 = vpop.permute.xlu0 %4847 }
 0x613   : > { %5109 = vst [vmem:[%s8101_s7 + $0x1d8] sm:$0xff] %v5045_v26  ;;  %v4842_v40 = vpop.permute.xlu1 %4841 }
 0x614   : > { %v4918_v37 = vsel %vm4857_vm2, %v4842_v40, %v4844_v11 }
 0x615   : > { %v5046_v52 = vadd.f32 %v4918_v37, %v4085_v0  ;;  %v4852_v45 = vpop.permute.xlu0 %4851 }
 0x617   : > { %5110 = vst [vmem:[%s8101_s7 + $0x1e0] sm:$0xff] %v5046_v52  ;;  %v4846_v50 = vpop.permute.xlu1 %4845 }
 0x618   : > { %v4919_v20 = vsel %vm4857_vm2, %v4846_v50, %v4848_v24 }
 0x619   : > { %v5047_v13 = vadd.f32 %v4919_v20, %v4086_v53  ;;  %v4856_v23 = vpop.permute.xlu0 %4855 }
 0x61b   : > { %5111 = vst [vmem:[%s8101_s7 + $0x1e8] sm:$0xff] %v5047_v13  ;;  %v4850_v2 = vpop.permute.xlu1 %4849 }
 0x61c   : > { %v4920_v9 = vsel %vm4857_vm2, %v4850_v2, %v4852_v45 }
 0x61d   : > { %v5048_v8 = vadd.f32 %v4920_v9, %v4087_v58 }
 0x61f   : > { %5112 = vst [vmem:[%s8101_s7 + $0x1f0] sm:$0xff] %v5048_v8  ;;  %v4854_v36 = vpop.permute.xlu1 %4853 }
 0x620   : > { %v4921_v11 = vsel %vm4857_vm2, %v4854_v36, %v4856_v23 }
 0x621   : > { %v5049_v30 = vadd.f32 %v4921_v11, %v4088_v54 }
 0x623   : > { %5113 = vst [vmem:[%s8101_s7 + $0x1f8] sm:$0xff] %v5049_v30 }
 0x624   : > { %5333 = shalt.err (!%p5330_p5)
}
 0x625   : > { %s5334_s27 = scalar_lea.hbm %s8976_s18, 8192  ;;  %s5338_s30 = scalar_lea.hbm %s9031_s3, 16384 }
 0x626   : > { %p5335_p6 = scmp.ne.s32.totalorder %s8976_s18, %s5334_s27  ;;  %p5339_p10 = scmp.lt.s32.totalorder %s8976_s18, %s9031_s3 }
 0x627   : > { %p5340_p11 = scmp.lt.s32.totalorder %s5338_s30, %s5334_s27 }
 0x628   : > { %p5336_p7 = pnand %p5335_p6, %p5469_p4 }
 0x629   : > { %p5341_p12 = por %p5340_p11, %p5339_p10 }
 0x62a   : > { %p5337_p9 = pneg %p5336_p7 }
 0x62c   : > { %p5342_p13 = pnand %p5341_p12, %p5337_p9 }
 0x62e   : > { %5345 = shalt.err (!%p5342_p13)
}
 0x62f   : > { %s5407_s6 = smov 128   ;;  %s5408_s7 = smov 8  }
 0x630   : > { %5225 = dma.vmem_to_hbm [thread:$0]  (%p5469_p4), %s8978_s9, 8192, %s8976_s18, %s8983_s15, %s5407_s6, %s5407_s6, %s5408_s7  }
 0x631 PF: > { %p5231_p0 = scmp.ge.s32.totalorder %s5396_s17, 2  ;;  %s5144_s8 = sand.u32 1, %s5376_s12  }
 0x632   : > { %s5145_s10 = scalar_lea.sflag [#allocation3], %s5144_s8 }
 0x633   : > { %p5228_p1 = pnand %p5231_p0, %p5476_p8 }
 0x635   : > { %p5229_p2 = pneg %p5228_p1 }
 0x637   : > { %5371 = dma.done.wait (%p5229_p2), %s5145_s10, 8192  }
 0x638   : > { %5373 = vsyncadd (%p5229_p2), %s5145_s10, 4294959104  ;;  %s16_s17 = sadd.s32 1, %s5396_s17   ;;  %s10029_s12 = smov %s5380_s13 }
 0x639   : > { %p13_p3 = scmp.ge.s32.totalorder %s16_s17, 4   ;;  %s10030_s13 = smov %s5384_s14 }
 0x63a   : > { %s10031_s14 = smov %s5482_s25  ;;  %s10032_s15 = smov %s5392_s16 }
 0x63b   : > { %s10033_s16 = smov %s10035_s20  ;;  %15 = sbr.rel (!%p13_p3) target bundleno = 4 (0x4), region = 67 }
 0x640   :  { %5150 = vsyncpa [#allocation3], 1 }
 0x641   :  { %5152 = vsyncpa [#allocation3 + $0x1], 1 }

</bundles_post_ra>
